<compile_context>
chip_gen: v6e
topology: v6e:2x2x1
jax: 0.10.0
libtpu: 0.0.40
codegen_flags: <defaults>
</compile_context>

<pallas_src>
import functools
import math

import jax
import jax.numpy as jnp
from jax import lax
from jax.experimental import pallas as pl
from jax.experimental.pallas import tpu as pltpu

# ----------------------------- model config (small) -----------------------------
VOCAB_SIZE = 100
VOCAB_PAD = 128          # pad vocab rows to a lane-friendly 128
HIDDEN = 32
LAYERS = 2
HEADS = 4
HEAD_DIM = HIDDEN // HEADS
INTER = 128              # 4 * hidden, like BERT
MAX_POS = 16
TYPE_VOCAB = 2
TYPE_PAD = 8             # pad type-vocab rows for layout friendliness
LN_EPS = 1e-12           # BERT layer-norm eps
ATTN_SCALE = 1.0 / math.sqrt(HEAD_DIM)

_VMEM = pl.BlockSpec(memory_space=pltpu.MemorySpace.VMEM)


# ----------------------------- shared math helpers -----------------------------
def _layernorm(x, g, b):
    mu = jnp.mean(x, axis=-1, keepdims=True)
    var = jnp.mean(jnp.square(x - mu), axis=-1, keepdims=True)
    return (x - mu) * lax.rsqrt(var + LN_EPS) * g + b


def _gelu_tanh(x):
    # TODO(synk): HF BERT uses exact erf-GELU; tanh approximation used here.
    return 0.5 * x * (1.0 + jnp.tanh(0.7978845608028654 * (x + 0.044715 * x * x * x)))


# ----------------------------- fused Pallas kernel -----------------------------
def _bert_fused_kernel(
    ids_ref, tids_ref, mask_ref,
    word_emb_ref, pos_emb_ref, type_emb_ref,
    emb_g_ref, emb_b_ref,
    wqkv_ref, bqkv_ref, wo_ref, bo_ref,
    ln1_g_ref, ln1_b_ref,
    w1_ref, b1_ref, w2_ref, b2_ref,
    ln2_g_ref, ln2_b_ref,
    pool_w_ref, pool_b_ref,
    last_hidden_ref, pooled_all_ref,
    *, batch, seq):
    tokens = batch * seq

    # ---- embeddings: gather via one-hot @ table (MXU, everything stays in VMEM) ----
    ids = ids_ref[...]                                            # (T, 1) int32
    tids = tids_ref[...]                                          # (T, 1) int32

    vocab_iota = lax.broadcasted_iota(jnp.int32, (tokens, VOCAB_PAD), 1)
    onehot_w = (ids == vocab_iota).astype(jnp.float32)            # (T, VOCAB_PAD)
    h = jnp.dot(onehot_w, word_emb_ref[...], preferred_element_type=jnp.float32)

    # positions are simply 0..S-1 repeated per batch row
    pos_rows = pos_emb_ref[0:seq, :]                              # (S, HIDDEN)
    h = h + jnp.concatenate([pos_rows] * batch, axis=0)           # (T, HIDDEN)

    type_iota = lax.broadcasted_iota(jnp.int32, (tokens, TYPE_PAD), 1)
    onehot_t = (tids == type_iota).astype(jnp.float32)            # (T, TYPE_PAD)
    h = h + jnp.dot(onehot_t, type_emb_ref[...], preferred_element_type=jnp.float32)

    h = _layernorm(h, emb_g_ref[...], emb_b_ref[...])

    mask = mask_ref[...]                                          # (B, S) float32

    # ---- transformer layers (unrolled; weights indexed on the leading layer axis) ----
    for l in range(LAYERS):
        x = h
        # fused Q|K|V projection -> (T, 3*HIDDEN)
        qkv = jnp.dot(x, wqkv_ref[l], preferred_element_type=jnp.float32) + bqkv_ref[l]

        ctx_rows = []
        for b in range(batch):
            r0 = b * seq
            q_b = qkv[r0:r0 + seq, 0:HIDDEN]
            k_b = qkv[r0:r0 + seq, HIDDEN:2 * HIDDEN]
            v_b = qkv[r0:r0 + seq, 2 * HIDDEN:3 * HIDDEN]
            # HF-style additive key mask, built in-kernel from the raw (B, S) mask.
            bias_b = (1.0 - mask[b:b + 1, :]) * -10000.0          # (1, S)
            head_outs = []
            for hd in range(HEADS):
                c0 = hd * HEAD_DIM
                q_h = q_b[:, c0:c0 + HEAD_DIM]                    # (S, Dh)
                k_h = k_b[:, c0:c0 + HEAD_DIM]
                v_h = v_b[:, c0:c0 + HEAD_DIM]
                # contract over head_dim without materializing a transpose
                s = lax.dot_general(q_h, k_h, (((1,), (1,)), ((), ())),
                                    preferred_element_type=jnp.float32)   # (S, S)
                s = s * ATTN_SCALE + bias_b
                s = s - jnp.max(s, axis=-1, keepdims=True)
                p = jnp.exp(s)
                p = p / jnp.sum(p, axis=-1, keepdims=True)
                head_outs.append(jnp.dot(p, v_h, preferred_element_type=jnp.float32))
            ctx_rows.append(jnp.concatenate(head_outs, axis=1))   # (S, HIDDEN)
        ctx = jnp.concatenate(ctx_rows, axis=0)                   # (T, HIDDEN)

        attn_out = jnp.dot(ctx, wo_ref[l], preferred_element_type=jnp.float32) + bo_ref[l]
        h = _layernorm(attn_out + x, ln1_g_ref[l], ln1_b_ref[l])

        ff = jnp.dot(h, w1_ref[l], preferred_element_type=jnp.float32) + b1_ref[l]
        ff = _gelu_tanh(ff)
        ff = jnp.dot(ff, w2_ref[l], preferred_element_type=jnp.float32) + b2_ref[l]
        h = _layernorm(ff + h, ln2_g_ref[l], ln2_b_ref[l])

    last_hidden_ref[...] = h

    # Pooler fused into the same kernel: apply to all tokens (tiny matmul),
    # CLS rows are selected in the wrapper.
    pooled = jnp.dot(h, pool_w_ref[...], preferred_element_type=jnp.float32) + pool_b_ref[...]
    pooled_all_ref[...] = jnp.tanh(pooled)


# ----------------------------- parameter init / packing -----------------------------
def init_params(key):
    def dense(key, fan_in, fan_out):
        return 0.02 * jax.random.normal(key, (fan_in, fan_out), jnp.float32)

    keys = iter(jax.random.split(key, 64))
    p = {
        "word_emb": 0.02 * jax.random.normal(next(keys), (VOCAB_SIZE, HIDDEN), jnp.float32),
        "pos_emb": 0.02 * jax.random.normal(next(keys), (MAX_POS, HIDDEN), jnp.float32),
        "type_emb": 0.02 * jax.random.normal(next(keys), (TYPE_VOCAB, HIDDEN), jnp.float32),
        "emb_ln_g": jnp.ones((HIDDEN,), jnp.float32),
        "emb_ln_b": jnp.zeros((HIDDEN,), jnp.float32),
        "pool_w": dense(next(keys), HIDDEN, HIDDEN),
        "pool_b": jnp.zeros((HIDDEN,), jnp.float32),
        "layers": [],
    }
    for _ in range(LAYERS):
        layer = {
            "wq": dense(next(keys), HIDDEN, HIDDEN), "bq": jnp.zeros((HIDDEN,), jnp.float32),
            "wk": dense(next(keys), HIDDEN, HIDDEN), "bk": jnp.zeros((HIDDEN,), jnp.float32),
            "wv": dense(next(keys), HIDDEN, HIDDEN), "bv": jnp.zeros((HIDDEN,), jnp.float32),
            "wo": dense(next(keys), HIDDEN, HIDDEN), "bo": jnp.zeros((HIDDEN,), jnp.float32),
            "ln1_g": jnp.ones((HIDDEN,), jnp.float32), "ln1_b": jnp.zeros((HIDDEN,), jnp.float32),
            "w1": dense(next(keys), HIDDEN, INTER), "b1": jnp.zeros((INTER,), jnp.float32),
            "w2": dense(next(keys), INTER, HIDDEN), "b2": jnp.zeros((HIDDEN,), jnp.float32),
            "ln2_g": jnp.ones((HIDDEN,), jnp.float32), "ln2_b": jnp.zeros((HIDDEN,), jnp.float32),
        }
        p["layers"].append(layer)
    return p


def pack_params(p):
    """Stack per-layer weights on a leading layer axis and fuse Q|K|V."""
    layers = p["layers"]
    packed = {
        "word_emb": jnp.zeros((VOCAB_PAD, HIDDEN), jnp.float32).at[:VOCAB_SIZE].set(p["word_emb"]),
        "pos_emb": p["pos_emb"],
        "type_emb": jnp.zeros((TYPE_PAD, HIDDEN), jnp.float32).at[:TYPE_VOCAB].set(p["type_emb"]),
        "emb_g": p["emb_ln_g"].reshape(1, HIDDEN),
        "emb_b": p["emb_ln_b"].reshape(1, HIDDEN),
        "wqkv": jnp.stack([jnp.concatenate([l["wq"], l["wk"], l["wv"]], axis=1) for l in layers]),
        "bqkv": jnp.stack([jnp.concatenate([l["bq"], l["bk"], l["bv"]]).reshape(1, 3 * HIDDEN)
                           for l in layers]),
        "wo": jnp.stack([l["wo"] for l in layers]),
        "bo": jnp.stack([l["bo"].reshape(1, HIDDEN) for l in layers]),
        "ln1_g": jnp.stack([l["ln1_g"].reshape(1, HIDDEN) for l in layers]),
        "ln1_b": jnp.stack([l["ln1_b"].reshape(1, HIDDEN) for l in layers]),
        "w1": jnp.stack([l["w1"] for l in layers]),
        "b1": jnp.stack([l["b1"].reshape(1, INTER) for l in layers]),
        "w2": jnp.stack([l["w2"] for l in layers]),
        "b2": jnp.stack([l["b2"].reshape(1, HIDDEN) for l in layers]),
        "ln2_g": jnp.stack([l["ln2_g"].reshape(1, HIDDEN) for l in layers]),
        "ln2_b": jnp.stack([l["ln2_b"].reshape(1, HIDDEN) for l in layers]),
        "pool_w": p["pool_w"],
        "pool_b": p["pool_b"].reshape(1, HIDDEN),
    }
    return packed


# ----------------------------- forward (single pallas_call) -----------------------------
def bert_embedding_forward(packed, input_ids, token_type_ids, attention_mask):
    """Returns (input_embedding, cls_embedding, length, attention_mask) like
    Bert_embedding.forward (tokenization done outside)."""
    B, S = input_ids.shape
    T = B * S

    ids = input_ids.reshape(T, 1).astype(jnp.int32)
    tids = token_type_ids.reshape(T, 1).astype(jnp.int32)
    mask_f = attention_mask.astype(jnp.float32)

    last_hidden_flat, pooled_all = pl.pallas_call(
        functools.partial(_bert_fused_kernel, batch=B, seq=S),
        out_shape=(jax.ShapeDtypeStruct((T, HIDDEN), jnp.float32),
                   jax.ShapeDtypeStruct((T, HIDDEN), jnp.float32)),
        in_specs=[_VMEM] * 22,
        out_specs=(_VMEM, _VMEM),
    )(ids, tids, mask_f,
      packed["word_emb"], packed["pos_emb"], packed["type_emb"],
      packed["emb_g"], packed["emb_b"],
      packed["wqkv"], packed["bqkv"], packed["wo"], packed["bo"],
      packed["ln1_g"], packed["ln1_b"],
      packed["w1"], packed["b1"], packed["w2"], packed["b2"],
      packed["ln2_g"], packed["ln2_b"],
      packed["pool_w"], packed["pool_b"])

    last_hidden = last_hidden_flat.reshape(B, S, HIDDEN)                  # outputs[0]
    pooled = pooled_all.reshape(B, S, HIDDEN)[:, 0, :]                    # outputs[1] (CLS rows)
    length = jnp.sum(attention_mask, axis=-1).astype(jnp.int32)
    return last_hidden, pooled, length, attention_mask


# ----------------------------- pure-JAX reference (for correctness check) -----------------------------
def bert_reference(p, input_ids, token_type_ids, attention_mask):
    B, S = input_ids.shape
    h = (p["word_emb"][input_ids]
         + p["pos_emb"][jnp.arange(S)][None, :, :]
         + p["type_emb"][token_type_ids]).astype(jnp.float32)
    h = _layernorm(h, p["emb_ln_g"], p["emb_ln_b"])
    bias = ((1.0 - attention_mask.astype(jnp.float32)) * -10000.0)[:, None, None, :]

    for layer in p["layers"]:
        x = h

        def proj(w, b):
            return jnp.einsum("bsh,hd->bsd", x, w) + b

        def heads(t):
            return t.reshape(B, S, HEADS, HEAD_DIM).transpose(0, 2, 1, 3)

        q = heads(proj(layer["wq"], layer["bq"]))
        k = heads(proj(layer["wk"], layer["bk"]))
        v = heads(proj(layer["wv"], layer["bv"]))
        s = jnp.einsum("bhqd,bhkd->bhqk", q, k) * ATTN_SCALE + bias
        pmat = jax.nn.softmax(s, axis=-1)
        ctx = jnp.einsum("bhqk,bhkd->bhqd", pmat, v).transpose(0, 2, 1, 3).reshape(B, S, HIDDEN)
        attn_out = jnp.einsum("bsh,hd->bsd", ctx, layer["wo"]) + layer["bo"]
        h = _layernorm(attn_out + x, layer["ln1_g"], layer["ln1_b"])

        ff = _gelu_tanh(jnp.einsum("bsh,hd->bsd", h, layer["w1"]) + layer["b1"])
        ff = jnp.einsum("bsd,dh->bsh", ff, layer["w2"]) + layer["b2"]
        h = _layernorm(ff + h, layer["ln2_g"], layer["ln2_b"])

    pooled = jnp.tanh(h[:, 0, :] @ p["pool_w"] + p["pool_b"])
    return h, pooled


# ----------------------------- demo -----------------------------
if __name__ == "__main__":
    # TODO(synk): BertTokenizerCN (vocab-file char tokenization) has no Pallas
    # equivalent; we feed deterministic synthetic token ids instead.
    B, S = 2, 8
    key = jax.random.PRNGKey(0)
    k_ids, _ = jax.random.split(key)

    input_ids = jax.random.randint(k_ids, (B, S), 1, VOCAB_SIZE, dtype=jnp.int32)
    token_type_ids = jnp.zeros((B, S), jnp.int32)
    # second sequence has 2 padding positions
    attention_mask = jnp.array([[1] * 8, [1] * 6 + [0] * 2], dtype=jnp.int32)
    input_ids = input_ids * attention_mask  # pad id = 0

    params = init_params(jax.random.PRNGKey(42))
    packed = pack_params(params)

    fwd = jax.jit(functools.partial(bert_embedding_forward, packed))
    input_embedding, cls_embedding, length, attn_mask_out = fwd(
        input_ids, token_type_ids, attention_mask)
    jax.block_until_ready((input_embedding, cls_embedding, length, attn_mask_out))

    assert input_embedding.shape == (B, S, HIDDEN)
    assert cls_embedding.shape == (B, HIDDEN)
    assert length.shape == (B,)

    # correctness vs. pure-JAX reference
    ref_h, ref_pooled = bert_reference(params, input_ids, token_type_ids, attention_mask)
    assert float(jnp.max(jnp.abs(input_embedding - ref_h))) < 1e-2
    assert float(jnp.max(jnp.abs(cls_embedding - ref_pooled))) < 1e-2

    print("KERNEL_OK")
</pallas_src>

<mosaic_0001>
module attributes {stable_mosaic.version = 11 : i64} {
  func.func @_bert_fused_kernel(%arg0: memref<16x1xi32, #tpu.memory_space<vmem>>, %arg1: memref<16x1xi32, #tpu.memory_space<vmem>>, %arg2: memref<2x8xf32, #tpu.memory_space<vmem>>, %arg3: memref<128x32xf32, #tpu.memory_space<vmem>>, %arg4: memref<16x32xf32, #tpu.memory_space<vmem>>, %arg5: memref<8x32xf32, #tpu.memory_space<vmem>>, %arg6: memref<1x32xf32, #tpu.memory_space<vmem>>, %arg7: memref<1x32xf32, #tpu.memory_space<vmem>>, %arg8: memref<2x32x96xf32, #tpu.memory_space<vmem>>, %arg9: memref<2x1x96xf32, #tpu.memory_space<vmem>>, %arg10: memref<2x32x32xf32, #tpu.memory_space<vmem>>, %arg11: memref<2x1x32xf32, #tpu.memory_space<vmem>>, %arg12: memref<2x1x32xf32, #tpu.memory_space<vmem>>, %arg13: memref<2x1x32xf32, #tpu.memory_space<vmem>>, %arg14: memref<2x32x128xf32, #tpu.memory_space<vmem>>, %arg15: memref<2x1x128xf32, #tpu.memory_space<vmem>>, %arg16: memref<2x128x32xf32, #tpu.memory_space<vmem>>, %arg17: memref<2x1x32xf32, #tpu.memory_space<vmem>>, %arg18: memref<2x1x32xf32, #tpu.memory_space<vmem>>, %arg19: memref<2x1x32xf32, #tpu.memory_space<vmem>>, %arg20: memref<32x32xf32, #tpu.memory_space<vmem>>, %arg21: memref<1x32xf32, #tpu.memory_space<vmem>>, %arg22: memref<16x32xf32, #tpu.memory_space<vmem>>, %arg23: memref<16x32xf32, #tpu.memory_space<vmem>>) attributes {dimension_semantics = [], scalar_prefetch = 0 : i64, scratch_operands = 0 : i64, tpu.core_type = #tpu.core_type<tc>} {
    %c0 = arith.constant 0 : index
    %c0_0 = arith.constant 0 : index
    %0 = vector.load %arg0[%c0, %c0_0] : memref<16x1xi32, #tpu.memory_space<vmem>>, vector<16x1xi32>
    %c0_1 = arith.constant 0 : index
    %c0_2 = arith.constant 0 : index
    %1 = vector.load %arg1[%c0_1, %c0_2] : memref<16x1xi32, #tpu.memory_space<vmem>>, vector<16x1xi32>
    %2 = tpu.iota {dimensions = array<i32: 1>} : vector<16x128xi32>
    %3 = vector.broadcast %0 : vector<16x1xi32> to vector<16x128xi32>
    %4 = arith.cmpi eq, %3, %2 : vector<16x128xi32>
    %5 = arith.extui %4 : vector<16x128xi1> to vector<16x128xi32>
    %6 = arith.sitofp %5 : vector<16x128xi32> to vector<16x128xf32>
    %c0_3 = arith.constant 0 : index
    %c0_4 = arith.constant 0 : index
    %7 = vector.load %arg3[%c0_3, %c0_4] : memref<128x32xf32, #tpu.memory_space<vmem>>, vector<128x32xf32>
    %cst = arith.constant dense<0.000000e+00> : vector<16x32xf32>
    %8 = tpu.matmul %6, %7, %cst {dimension_numbers = #tpu.dot_dimension_numbers<[1], [0], [0], [1], [0, 0, 1, 1], [], []>} : vector<16x128xf32>, vector<128x32xf32>, vector<16x32xf32> -> vector<16x32xf32>
    %c0_5 = arith.constant 0 : index
    %c0_6 = arith.constant 0 : index
    %9 = vector.load %arg4[%c0_5, %c0_6] : memref<16x32xf32, #tpu.memory_space<vmem>>, vector<8x32xf32>
    %10 = tpu.concatenate %9, %9 in 0 : vector<8x32xf32>, vector<8x32xf32> -> vector<16x32xf32>
    %11 = arith.addf %8, %10 : vector<16x32xf32>
    %12 = tpu.iota {dimensions = array<i32: 1>} : vector<16x8xi32>
    %13 = vector.broadcast %1 : vector<16x1xi32> to vector<16x8xi32>
    %14 = arith.cmpi eq, %13, %12 : vector<16x8xi32>
    %15 = arith.extui %14 : vector<16x8xi1> to vector<16x8xi32>
    %16 = arith.sitofp %15 : vector<16x8xi32> to vector<16x8xf32>
    %c0_7 = arith.constant 0 : index
    %c0_8 = arith.constant 0 : index
    %17 = vector.load %arg5[%c0_7, %c0_8] : memref<8x32xf32, #tpu.memory_space<vmem>>, vector<8x32xf32>
    %cst_9 = arith.constant dense<0.000000e+00> : vector<16x32xf32>
    %18 = tpu.matmul %16, %17, %cst_9 {dimension_numbers = #tpu.dot_dimension_numbers<[1], [0], [0], [1], [0, 0, 1, 1], [], []>} : vector<16x8xf32>, vector<8x32xf32>, vector<16x32xf32> -> vector<16x32xf32>
    %19 = arith.addf %11, %18 : vector<16x32xf32>
    %c0_10 = arith.constant 0 : index
    %c0_11 = arith.constant 0 : index
    %20 = vector.load %arg6[%c0_10, %c0_11] : memref<1x32xf32, #tpu.memory_space<vmem>>, vector<1x32xf32>
    %c0_12 = arith.constant 0 : index
    %c0_13 = arith.constant 0 : index
    %21 = vector.load %arg7[%c0_12, %c0_13] : memref<1x32xf32, #tpu.memory_space<vmem>>, vector<1x32xf32>
    %cst_14 = arith.constant dense<0.000000e+00> : vector<16xf32>
    %22 = vector.multi_reduction <add>, %19, %cst_14 [1] : vector<16x32xf32> to vector<16xf32>
    %23 = vector.shape_cast %22 : vector<16xf32> to vector<16x1xf32>
    %cst_15 = arith.constant 3.200000e+01 : f32
    %24 = vector.broadcast %cst_15 : f32 to vector<16x1xf32>
    %25 = arith.divf %23, %24 : vector<16x1xf32>
    %26 = vector.broadcast %25 : vector<16x1xf32> to vector<16x32xf32>
    %27 = arith.subf %19, %26 : vector<16x32xf32>
    %28 = arith.mulf %27, %27 : vector<16x32xf32>
    %cst_16 = arith.constant dense<0.000000e+00> : vector<16xf32>
    %29 = vector.multi_reduction <add>, %28, %cst_16 [1] : vector<16x32xf32> to vector<16xf32>
    %30 = vector.shape_cast %29 : vector<16xf32> to vector<16x1xf32>
    %cst_17 = arith.constant 3.200000e+01 : f32
    %31 = vector.broadcast %cst_17 : f32 to vector<16x1xf32>
    %32 = arith.divf %30, %31 : vector<16x1xf32>
    %33 = vector.broadcast %25 : vector<16x1xf32> to vector<16x32xf32>
    %34 = arith.subf %19, %33 : vector<16x32xf32>
    %cst_18 = arith.constant 9.99999996E-13 : f32
    %35 = vector.broadcast %cst_18 : f32 to vector<16x1xf32>
    %36 = arith.addf %32, %35 : vector<16x1xf32>
    %37 = math.rsqrt %36 : vector<16x1xf32>
    %38 = vector.broadcast %37 : vector<16x1xf32> to vector<16x32xf32>
    %39 = arith.mulf %34, %38 : vector<16x32xf32>
    %40 = vector.broadcast %20 : vector<1x32xf32> to vector<16x32xf32>
    %41 = arith.mulf %39, %40 : vector<16x32xf32>
    %42 = vector.broadcast %21 : vector<1x32xf32> to vector<16x32xf32>
    %43 = arith.addf %41, %42 : vector<16x32xf32>
    %c0_19 = arith.constant 0 : index
    %c0_20 = arith.constant 0 : index
    %44 = vector.load %arg2[%c0_19, %c0_20] : memref<2x8xf32, #tpu.memory_space<vmem>>, vector<2x8xf32>
    %c0_21 = arith.constant 0 : index
    %c0_22 = arith.constant 0 : index
    %c0_23 = arith.constant 0 : index
    %45 = vector.load %arg8[%c0_21, %c0_22, %c0_23] : memref<2x32x96xf32, #tpu.memory_space<vmem>>, vector<1x32x96xf32>
    %46 = vector.shape_cast %45 : vector<1x32x96xf32> to vector<32x96xf32>
    %cst_24 = arith.constant dense<0.000000e+00> : vector<16x96xf32>
    %47 = tpu.matmul %43, %46, %cst_24 {dimension_numbers = #tpu.dot_dimension_numbers<[1], [0], [0], [1], [0, 0, 1, 1], [], []>} : vector<16x32xf32>, vector<32x96xf32>, vector<16x96xf32> -> vector<16x96xf32>
    %c0_25 = arith.constant 0 : index
    %c0_26 = arith.constant 0 : index
    %c0_27 = arith.constant 0 : index
    %48 = vector.load %arg9[%c0_25, %c0_26, %c0_27] : memref<2x1x96xf32, #tpu.memory_space<vmem>>, vector<1x1x96xf32>
    %49 = vector.shape_cast %48 : vector<1x1x96xf32> to vector<1x96xf32>
    %50 = vector.broadcast %49 : vector<1x96xf32> to vector<16x96xf32>
    %51 = arith.addf %47, %50 : vector<16x96xf32>
    %52 = vector.extract_strided_slice %51 {offsets = [0, 0], sizes = [8, 32], strides = [1, 1]} : vector<16x96xf32> to vector<8x32xf32>
    %53 = vector.extract_strided_slice %51 {offsets = [0, 32], sizes = [8, 32], strides = [1, 1]} : vector<16x96xf32> to vector<8x32xf32>
    %54 = vector.extract_strided_slice %51 {offsets = [0, 64], sizes = [8, 32], strides = [1, 1]} : vector<16x96xf32> to vector<8x32xf32>
    %55 = vector.extract_strided_slice %44 {offsets = [0, 0], sizes = [1, 8], strides = [1, 1]} : vector<2x8xf32> to vector<1x8xf32>
    %cst_28 = arith.constant 1.000000e+00 : f32
    %56 = vector.broadcast %cst_28 : f32 to vector<1x8xf32>
    %57 = arith.subf %56, %55 : vector<1x8xf32>
    %cst_29 = arith.constant -1.000000e+04 : f32
    %58 = vector.broadcast %cst_29 : f32 to vector<1x8xf32>
    %59 = arith.mulf %57, %58 : vector<1x8xf32>
    %60 = vector.extract_strided_slice %52 {offsets = [0, 0], sizes = [8, 8], strides = [1, 1]} : vector<8x32xf32> to vector<8x8xf32>
    %61 = vector.extract_strided_slice %53 {offsets = [0, 0], sizes = [8, 8], strides = [1, 1]} : vector<8x32xf32> to vector<8x8xf32>
    %62 = vector.extract_strided_slice %54 {offsets = [0, 0], sizes = [8, 8], strides = [1, 1]} : vector<8x32xf32> to vector<8x8xf32>
    %cst_30 = arith.constant dense<0.000000e+00> : vector<8x8xf32>
    %63 = tpu.matmul %60, %61, %cst_30 {dimension_numbers = #tpu.dot_dimension_numbers<[1], [1], [0], [0], [0, 0, 1, 0], [], []>} : vector<8x8xf32>, vector<8x8xf32>, vector<8x8xf32> -> vector<8x8xf32>
    %cst_31 = arith.constant 0.353553385 : f32
    %64 = vector.broadcast %cst_31 : f32 to vector<8x8xf32>
    %65 = arith.mulf %63, %64 : vector<8x8xf32>
    %66 = vector.broadcast %59 : vector<1x8xf32> to vector<8x8xf32>
    %67 = arith.addf %65, %66 : vector<8x8xf32>
    %cst_32 = arith.constant dense<0xFF800000> : vector<8xf32>
    %68 = vector.multi_reduction <maximumf>, %67, %cst_32 [1] : vector<8x8xf32> to vector<8xf32>
    %69 = vector.shape_cast %68 : vector<8xf32> to vector<8x1xf32>
    %70 = vector.broadcast %69 : vector<8x1xf32> to vector<8x8xf32>
    %71 = arith.subf %67, %70 : vector<8x8xf32>
    %72 = math.exp %71 : vector<8x8xf32>
    %cst_33 = arith.constant dense<0.000000e+00> : vector<8xf32>
    %73 = vector.multi_reduction <add>, %72, %cst_33 [1] : vector<8x8xf32> to vector<8xf32>
    %74 = vector.shape_cast %73 : vector<8xf32> to vector<8x1xf32>
    %75 = vector.broadcast %74 : vector<8x1xf32> to vector<8x8xf32>
    %76 = arith.divf %72, %75 : vector<8x8xf32>
    %cst_34 = arith.constant dense<0.000000e+00> : vector<8x8xf32>
    %77 = tpu.matmul %76, %62, %cst_34 {dimension_numbers = #tpu.dot_dimension_numbers<[1], [0], [0], [1], [0, 0, 1, 1], [], []>} : vector<8x8xf32>, vector<8x8xf32>, vector<8x8xf32> -> vector<8x8xf32>
    %78 = vector.extract_strided_slice %52 {offsets = [0, 8], sizes = [8, 8], strides = [1, 1]} : vector<8x32xf32> to vector<8x8xf32>
    %79 = vector.extract_strided_slice %53 {offsets = [0, 8], sizes = [8, 8], strides = [1, 1]} : vector<8x32xf32> to vector<8x8xf32>
    %80 = vector.extract_strided_slice %54 {offsets = [0, 8], sizes = [8, 8], strides = [1, 1]} : vector<8x32xf32> to vector<8x8xf32>
    %cst_35 = arith.constant dense<0.000000e+00> : vector<8x8xf32>
    %81 = tpu.matmul %78, %79, %cst_35 {dimension_numbers = #tpu.dot_dimension_numbers<[1], [1], [0], [0], [0, 0, 1, 0], [], []>} : vector<8x8xf32>, vector<8x8xf32>, vector<8x8xf32> -> vector<8x8xf32>
    %cst_36 = arith.constant 0.353553385 : f32
    %82 = vector.broadcast %cst_36 : f32 to vector<8x8xf32>
    %83 = arith.mulf %81, %82 : vector<8x8xf32>
    %84 = vector.broadcast %59 : vector<1x8xf32> to vector<8x8xf32>
    %85 = arith.addf %83, %84 : vector<8x8xf32>
    %cst_37 = arith.constant dense<0xFF800000> : vector<8xf32>
    %86 = vector.multi_reduction <maximumf>, %85, %cst_37 [1] : vector<8x8xf32> to vector<8xf32>
    %87 = vector.shape_cast %86 : vector<8xf32> to vector<8x1xf32>
    %88 = vector.broadcast %87 : vector<8x1xf32> to vector<8x8xf32>
    %89 = arith.subf %85, %88 : vector<8x8xf32>
    %90 = math.exp %89 : vector<8x8xf32>
    %cst_38 = arith.constant dense<0.000000e+00> : vector<8xf32>
    %91 = vector.multi_reduction <add>, %90, %cst_38 [1] : vector<8x8xf32> to vector<8xf32>
    %92 = vector.shape_cast %91 : vector<8xf32> to vector<8x1xf32>
    %93 = vector.broadcast %92 : vector<8x1xf32> to vector<8x8xf32>
    %94 = arith.divf %90, %93 : vector<8x8xf32>
    %cst_39 = arith.constant dense<0.000000e+00> : vector<8x8xf32>
    %95 = tpu.matmul %94, %80, %cst_39 {dimension_numbers = #tpu.dot_dimension_numbers<[1], [0], [0], [1], [0, 0, 1, 1], [], []>} : vector<8x8xf32>, vector<8x8xf32>, vector<8x8xf32> -> vector<8x8xf32>
    %96 = vector.extract_strided_slice %52 {offsets = [0, 16], sizes = [8, 8], strides = [1, 1]} : vector<8x32xf32> to vector<8x8xf32>
    %97 = vector.extract_strided_slice %53 {offsets = [0, 16], sizes = [8, 8], strides = [1, 1]} : vector<8x32xf32> to vector<8x8xf32>
    %98 = vector.extract_strided_slice %54 {offsets = [0, 16], sizes = [8, 8], strides = [1, 1]} : vector<8x32xf32> to vector<8x8xf32>
    %cst_40 = arith.constant dense<0.000000e+00> : vector<8x8xf32>
    %99 = tpu.matmul %96, %97, %cst_40 {dimension_numbers = #tpu.dot_dimension_numbers<[1], [1], [0], [0], [0, 0, 1, 0], [], []>} : vector<8x8xf32>, vector<8x8xf32>, vector<8x8xf32> -> vector<8x8xf32>
    %cst_41 = arith.constant 0.353553385 : f32
    %100 = vector.broadcast %cst_41 : f32 to vector<8x8xf32>
    %101 = arith.mulf %99, %100 : vector<8x8xf32>
    %102 = vector.broadcast %59 : vector<1x8xf32> to vector<8x8xf32>
    %103 = arith.addf %101, %102 : vector<8x8xf32>
    %cst_42 = arith.constant dense<0xFF800000> : vector<8xf32>
    %104 = vector.multi_reduction <maximumf>, %103, %cst_42 [1] : vector<8x8xf32> to vector<8xf32>
    %105 = vector.shape_cast %104 : vector<8xf32> to vector<8x1xf32>
    %106 = vector.broadcast %105 : vector<8x1xf32> to vector<8x8xf32>
    %107 = arith.subf %103, %106 : vector<8x8xf32>
    %108 = math.exp %107 : vector<8x8xf32>
    %cst_43 = arith.constant dense<0.000000e+00> : vector<8xf32>
    %109 = vector.multi_reduction <add>, %108, %cst_43 [1] : vector<8x8xf32> to vector<8xf32>
    %110 = vector.shape_cast %109 : vector<8xf32> to vector<8x1xf32>
    %111 = vector.broadcast %110 : vector<8x1xf32> to vector<8x8xf32>
    %112 = arith.divf %108, %111 : vector<8x8xf32>
    %cst_44 = arith.constant dense<0.000000e+00> : vector<8x8xf32>
    %113 = tpu.matmul %112, %98, %cst_44 {dimension_numbers = #tpu.dot_dimension_numbers<[1], [0], [0], [1], [0, 0, 1, 1], [], []>} : vector<8x8xf32>, vector<8x8xf32>, vector<8x8xf32> -> vector<8x8xf32>
    %114 = vector.extract_strided_slice %52 {offsets = [0, 24], sizes = [8, 8], strides = [1, 1]} : vector<8x32xf32> to vector<8x8xf32>
    %115 = vector.extract_strided_slice %53 {offsets = [0, 24], sizes = [8, 8], strides = [1, 1]} : vector<8x32xf32> to vector<8x8xf32>
    %116 = vector.extract_strided_slice %54 {offsets = [0, 24], sizes = [8, 8], strides = [1, 1]} : vector<8x32xf32> to vector<8x8xf32>
    %cst_45 = arith.constant dense<0.000000e+00> : vector<8x8xf32>
    %117 = tpu.matmul %114, %115, %cst_45 {dimension_numbers = #tpu.dot_dimension_numbers<[1], [1], [0], [0], [0, 0, 1, 0], [], []>} : vector<8x8xf32>, vector<8x8xf32>, vector<8x8xf32> -> vector<8x8xf32>
    %cst_46 = arith.constant 0.353553385 : f32
    %118 = vector.broadcast %cst_46 : f32 to vector<8x8xf32>
    %119 = arith.mulf %117, %118 : vector<8x8xf32>
    %120 = vector.broadcast %59 : vector<1x8xf32> to vector<8x8xf32>
    %121 = arith.addf %119, %120 : vector<8x8xf32>
    %cst_47 = arith.constant dense<0xFF800000> : vector<8xf32>
    %122 = vector.multi_reduction <maximumf>, %121, %cst_47 [1] : vector<8x8xf32> to vector<8xf32>
    %123 = vector.shape_cast %122 : vector<8xf32> to vector<8x1xf32>
    %124 = vector.broadcast %123 : vector<8x1xf32> to vector<8x8xf32>
    %125 = arith.subf %121, %124 : vector<8x8xf32>
    %126 = math.exp %125 : vector<8x8xf32>
    %cst_48 = arith.constant dense<0.000000e+00> : vector<8xf32>
    %127 = vector.multi_reduction <add>, %126, %cst_48 [1] : vector<8x8xf32> to vector<8xf32>
    %128 = vector.shape_cast %127 : vector<8xf32> to vector<8x1xf32>
    %129 = vector.broadcast %128 : vector<8x1xf32> to vector<8x8xf32>
    %130 = arith.divf %126, %129 : vector<8x8xf32>
    %cst_49 = arith.constant dense<0.000000e+00> : vector<8x8xf32>
    %131 = tpu.matmul %130, %116, %cst_49 {dimension_numbers = #tpu.dot_dimension_numbers<[1], [0], [0], [1], [0, 0, 1, 1], [], []>} : vector<8x8xf32>, vector<8x8xf32>, vector<8x8xf32> -> vector<8x8xf32>
    %132 = tpu.concatenate %77, %95, %113, %131 in 1 : vector<8x8xf32>, vector<8x8xf32>, vector<8x8xf32>, vector<8x8xf32> -> vector<8x32xf32>
    %133 = vector.extract_strided_slice %51 {offsets = [8, 0], sizes = [8, 32], strides = [1, 1]} : vector<16x96xf32> to vector<8x32xf32>
    %134 = vector.extract_strided_slice %51 {offsets = [8, 32], sizes = [8, 32], strides = [1, 1]} : vector<16x96xf32> to vector<8x32xf32>
    %135 = vector.extract_strided_slice %51 {offsets = [8, 64], sizes = [8, 32], strides = [1, 1]} : vector<16x96xf32> to vector<8x32xf32>
    %136 = vector.extract_strided_slice %44 {offsets = [1, 0], sizes = [1, 8], strides = [1, 1]} : vector<2x8xf32> to vector<1x8xf32>
    %cst_50 = arith.constant 1.000000e+00 : f32
    %137 = vector.broadcast %cst_50 : f32 to vector<1x8xf32>
    %138 = arith.subf %137, %136 : vector<1x8xf32>
    %cst_51 = arith.constant -1.000000e+04 : f32
    %139 = vector.broadcast %cst_51 : f32 to vector<1x8xf32>
    %140 = arith.mulf %138, %139 : vector<1x8xf32>
    %141 = vector.extract_strided_slice %133 {offsets = [0, 0], sizes = [8, 8], strides = [1, 1]} : vector<8x32xf32> to vector<8x8xf32>
    %142 = vector.extract_strided_slice %134 {offsets = [0, 0], sizes = [8, 8], strides = [1, 1]} : vector<8x32xf32> to vector<8x8xf32>
    %143 = vector.extract_strided_slice %135 {offsets = [0, 0], sizes = [8, 8], strides = [1, 1]} : vector<8x32xf32> to vector<8x8xf32>
    %cst_52 = arith.constant dense<0.000000e+00> : vector<8x8xf32>
    %144 = tpu.matmul %141, %142, %cst_52 {dimension_numbers = #tpu.dot_dimension_numbers<[1], [1], [0], [0], [0, 0, 1, 0], [], []>} : vector<8x8xf32>, vector<8x8xf32>, vector<8x8xf32> -> vector<8x8xf32>
    %cst_53 = arith.constant 0.353553385 : f32
    %145 = vector.broadcast %cst_53 : f32 to vector<8x8xf32>
    %146 = arith.mulf %144, %145 : vector<8x8xf32>
    %147 = vector.broadcast %140 : vector<1x8xf32> to vector<8x8xf32>
    %148 = arith.addf %146, %147 : vector<8x8xf32>
    %cst_54 = arith.constant dense<0xFF800000> : vector<8xf32>
    %149 = vector.multi_reduction <maximumf>, %148, %cst_54 [1] : vector<8x8xf32> to vector<8xf32>
    %150 = vector.shape_cast %149 : vector<8xf32> to vector<8x1xf32>
    %151 = vector.broadcast %150 : vector<8x1xf32> to vector<8x8xf32>
    %152 = arith.subf %148, %151 : vector<8x8xf32>
    %153 = math.exp %152 : vector<8x8xf32>
    %cst_55 = arith.constant dense<0.000000e+00> : vector<8xf32>
    %154 = vector.multi_reduction <add>, %153, %cst_55 [1] : vector<8x8xf32> to vector<8xf32>
    %155 = vector.shape_cast %154 : vector<8xf32> to vector<8x1xf32>
    %156 = vector.broadcast %155 : vector<8x1xf32> to vector<8x8xf32>
    %157 = arith.divf %153, %156 : vector<8x8xf32>
    %cst_56 = arith.constant dense<0.000000e+00> : vector<8x8xf32>
    %158 = tpu.matmul %157, %143, %cst_56 {dimension_numbers = #tpu.dot_dimension_numbers<[1], [0], [0], [1], [0, 0, 1, 1], [], []>} : vector<8x8xf32>, vector<8x8xf32>, vector<8x8xf32> -> vector<8x8xf32>
    %159 = vector.extract_strided_slice %133 {offsets = [0, 8], sizes = [8, 8], strides = [1, 1]} : vector<8x32xf32> to vector<8x8xf32>
    %160 = vector.extract_strided_slice %134 {offsets = [0, 8], sizes = [8, 8], strides = [1, 1]} : vector<8x32xf32> to vector<8x8xf32>
    %161 = vector.extract_strided_slice %135 {offsets = [0, 8], sizes = [8, 8], strides = [1, 1]} : vector<8x32xf32> to vector<8x8xf32>
    %cst_57 = arith.constant dense<0.000000e+00> : vector<8x8xf32>
    %162 = tpu.matmul %159, %160, %cst_57 {dimension_numbers = #tpu.dot_dimension_numbers<[1], [1], [0], [0], [0, 0, 1, 0], [], []>} : vector<8x8xf32>, vector<8x8xf32>, vector<8x8xf32> -> vector<8x8xf32>
    %cst_58 = arith.constant 0.353553385 : f32
    %163 = vector.broadcast %cst_58 : f32 to vector<8x8xf32>
    %164 = arith.mulf %162, %163 : vector<8x8xf32>
    %165 = vector.broadcast %140 : vector<1x8xf32> to vector<8x8xf32>
    %166 = arith.addf %164, %165 : vector<8x8xf32>
    %cst_59 = arith.constant dense<0xFF800000> : vector<8xf32>
    %167 = vector.multi_reduction <maximumf>, %166, %cst_59 [1] : vector<8x8xf32> to vector<8xf32>
    %168 = vector.shape_cast %167 : vector<8xf32> to vector<8x1xf32>
    %169 = vector.broadcast %168 : vector<8x1xf32> to vector<8x8xf32>
    %170 = arith.subf %166, %169 : vector<8x8xf32>
    %171 = math.exp %170 : vector<8x8xf32>
    %cst_60 = arith.constant dense<0.000000e+00> : vector<8xf32>
    %172 = vector.multi_reduction <add>, %171, %cst_60 [1] : vector<8x8xf32> to vector<8xf32>
    %173 = vector.shape_cast %172 : vector<8xf32> to vector<8x1xf32>
    %174 = vector.broadcast %173 : vector<8x1xf32> to vector<8x8xf32>
    %175 = arith.divf %171, %174 : vector<8x8xf32>
    %cst_61 = arith.constant dense<0.000000e+00> : vector<8x8xf32>
    %176 = tpu.matmul %175, %161, %cst_61 {dimension_numbers = #tpu.dot_dimension_numbers<[1], [0], [0], [1], [0, 0, 1, 1], [], []>} : vector<8x8xf32>, vector<8x8xf32>, vector<8x8xf32> -> vector<8x8xf32>
    %177 = vector.extract_strided_slice %133 {offsets = [0, 16], sizes = [8, 8], strides = [1, 1]} : vector<8x32xf32> to vector<8x8xf32>
    %178 = vector.extract_strided_slice %134 {offsets = [0, 16], sizes = [8, 8], strides = [1, 1]} : vector<8x32xf32> to vector<8x8xf32>
    %179 = vector.extract_strided_slice %135 {offsets = [0, 16], sizes = [8, 8], strides = [1, 1]} : vector<8x32xf32> to vector<8x8xf32>
    %cst_62 = arith.constant dense<0.000000e+00> : vector<8x8xf32>
    %180 = tpu.matmul %177, %178, %cst_62 {dimension_numbers = #tpu.dot_dimension_numbers<[1], [1], [0], [0], [0, 0, 1, 0], [], []>} : vector<8x8xf32>, vector<8x8xf32>, vector<8x8xf32> -> vector<8x8xf32>
    %cst_63 = arith.constant 0.353553385 : f32
    %181 = vector.broadcast %cst_63 : f32 to vector<8x8xf32>
    %182 = arith.mulf %180, %181 : vector<8x8xf32>
    %183 = vector.broadcast %140 : vector<1x8xf32> to vector<8x8xf32>
    %184 = arith.addf %182, %183 : vector<8x8xf32>
    %cst_64 = arith.constant dense<0xFF800000> : vector<8xf32>
    %185 = vector.multi_reduction <maximumf>, %184, %cst_64 [1] : vector<8x8xf32> to vector<8xf32>
    %186 = vector.shape_cast %185 : vector<8xf32> to vector<8x1xf32>
    %187 = vector.broadcast %186 : vector<8x1xf32> to vector<8x8xf32>
    %188 = arith.subf %184, %187 : vector<8x8xf32>
    %189 = math.exp %188 : vector<8x8xf32>
    %cst_65 = arith.constant dense<0.000000e+00> : vector<8xf32>
    %190 = vector.multi_reduction <add>, %189, %cst_65 [1] : vector<8x8xf32> to vector<8xf32>
    %191 = vector.shape_cast %190 : vector<8xf32> to vector<8x1xf32>
    %192 = vector.broadcast %191 : vector<8x1xf32> to vector<8x8xf32>
    %193 = arith.divf %189, %192 : vector<8x8xf32>
    %cst_66 = arith.constant dense<0.000000e+00> : vector<8x8xf32>
    %194 = tpu.matmul %193, %179, %cst_66 {dimension_numbers = #tpu.dot_dimension_numbers<[1], [0], [0], [1], [0, 0, 1, 1], [], []>} : vector<8x8xf32>, vector<8x8xf32>, vector<8x8xf32> -> vector<8x8xf32>
    %195 = vector.extract_strided_slice %133 {offsets = [0, 24], sizes = [8, 8], strides = [1, 1]} : vector<8x32xf32> to vector<8x8xf32>
    %196 = vector.extract_strided_slice %134 {offsets = [0, 24], sizes = [8, 8], strides = [1, 1]} : vector<8x32xf32> to vector<8x8xf32>
    %197 = vector.extract_strided_slice %135 {offsets = [0, 24], sizes = [8, 8], strides = [1, 1]} : vector<8x32xf32> to vector<8x8xf32>
    %cst_67 = arith.constant dense<0.000000e+00> : vector<8x8xf32>
    %198 = tpu.matmul %195, %196, %cst_67 {dimension_numbers = #tpu.dot_dimension_numbers<[1], [1], [0], [0], [0, 0, 1, 0], [], []>} : vector<8x8xf32>, vector<8x8xf32>, vector<8x8xf32> -> vector<8x8xf32>
    %cst_68 = arith.constant 0.353553385 : f32
    %199 = vector.broadcast %cst_68 : f32 to vector<8x8xf32>
    %200 = arith.mulf %198, %199 : vector<8x8xf32>
    %201 = vector.broadcast %140 : vector<1x8xf32> to vector<8x8xf32>
    %202 = arith.addf %200, %201 : vector<8x8xf32>
    %cst_69 = arith.constant dense<0xFF800000> : vector<8xf32>
    %203 = vector.multi_reduction <maximumf>, %202, %cst_69 [1] : vector<8x8xf32> to vector<8xf32>
    %204 = vector.shape_cast %203 : vector<8xf32> to vector<8x1xf32>
    %205 = vector.broadcast %204 : vector<8x1xf32> to vector<8x8xf32>
    %206 = arith.subf %202, %205 : vector<8x8xf32>
    %207 = math.exp %206 : vector<8x8xf32>
    %cst_70 = arith.constant dense<0.000000e+00> : vector<8xf32>
    %208 = vector.multi_reduction <add>, %207, %cst_70 [1] : vector<8x8xf32> to vector<8xf32>
    %209 = vector.shape_cast %208 : vector<8xf32> to vector<8x1xf32>
    %210 = vector.broadcast %209 : vector<8x1xf32> to vector<8x8xf32>
    %211 = arith.divf %207, %210 : vector<8x8xf32>
    %cst_71 = arith.constant dense<0.000000e+00> : vector<8x8xf32>
    %212 = tpu.matmul %211, %197, %cst_71 {dimension_numbers = #tpu.dot_dimension_numbers<[1], [0], [0], [1], [0, 0, 1, 1], [], []>} : vector<8x8xf32>, vector<8x8xf32>, vector<8x8xf32> -> vector<8x8xf32>
    %213 = tpu.concatenate %158, %176, %194, %212 in 1 : vector<8x8xf32>, vector<8x8xf32>, vector<8x8xf32>, vector<8x8xf32> -> vector<8x32xf32>
    %214 = tpu.concatenate %132, %213 in 0 : vector<8x32xf32>, vector<8x32xf32> -> vector<16x32xf32>
    %c0_72 = arith.constant 0 : index
    %c0_73 = arith.constant 0 : index
    %c0_74 = arith.constant 0 : index
    %215 = vector.load %arg10[%c0_72, %c0_73, %c0_74] : memref<2x32x32xf32, #tpu.memory_space<vmem>>, vector<1x32x32xf32>
    %216 = vector.shape_cast %215 : vector<1x32x32xf32> to vector<32x32xf32>
    %cst_75 = arith.constant dense<0.000000e+00> : vector<16x32xf32>
    %217 = tpu.matmul %214, %216, %cst_75 {dimension_numbers = #tpu.dot_dimension_numbers<[1], [0], [0], [1], [0, 0, 1, 1], [], []>} : vector<16x32xf32>, vector<32x32xf32>, vector<16x32xf32> -> vector<16x32xf32>
    %c0_76 = arith.constant 0 : index
    %c0_77 = arith.constant 0 : index
    %c0_78 = arith.constant 0 : index
    %218 = vector.load %arg11[%c0_76, %c0_77, %c0_78] : memref<2x1x32xf32, #tpu.memory_space<vmem>>, vector<1x1x32xf32>
    %219 = vector.shape_cast %218 : vector<1x1x32xf32> to vector<1x32xf32>
    %220 = vector.broadcast %219 : vector<1x32xf32> to vector<16x32xf32>
    %221 = arith.addf %217, %220 : vector<16x32xf32>
    %222 = arith.addf %221, %43 : vector<16x32xf32>
    %c0_79 = arith.constant 0 : index
    %c0_80 = arith.constant 0 : index
    %c0_81 = arith.constant 0 : index
    %223 = vector.load %arg12[%c0_79, %c0_80, %c0_81] : memref<2x1x32xf32, #tpu.memory_space<vmem>>, vector<1x1x32xf32>
    %224 = vector.shape_cast %223 : vector<1x1x32xf32> to vector<1x32xf32>
    %c0_82 = arith.constant 0 : index
    %c0_83 = arith.constant 0 : index
    %c0_84 = arith.constant 0 : index
    %225 = vector.load %arg13[%c0_82, %c0_83, %c0_84] : memref<2x1x32xf32, #tpu.memory_space<vmem>>, vector<1x1x32xf32>
    %226 = vector.shape_cast %225 : vector<1x1x32xf32> to vector<1x32xf32>
    %cst_85 = arith.constant dense<0.000000e+00> : vector<16xf32>
    %227 = vector.multi_reduction <add>, %222, %cst_85 [1] : vector<16x32xf32> to vector<16xf32>
    %228 = vector.shape_cast %227 : vector<16xf32> to vector<16x1xf32>
    %cst_86 = arith.constant 3.200000e+01 : f32
    %229 = vector.broadcast %cst_86 : f32 to vector<16x1xf32>
    %230 = arith.divf %228, %229 : vector<16x1xf32>
    %231 = vector.broadcast %230 : vector<16x1xf32> to vector<16x32xf32>
    %232 = arith.subf %222, %231 : vector<16x32xf32>
    %233 = arith.mulf %232, %232 : vector<16x32xf32>
    %cst_87 = arith.constant dense<0.000000e+00> : vector<16xf32>
    %234 = vector.multi_reduction <add>, %233, %cst_87 [1] : vector<16x32xf32> to vector<16xf32>
    %235 = vector.shape_cast %234 : vector<16xf32> to vector<16x1xf32>
    %cst_88 = arith.constant 3.200000e+01 : f32
    %236 = vector.broadcast %cst_88 : f32 to vector<16x1xf32>
    %237 = arith.divf %235, %236 : vector<16x1xf32>
    %238 = vector.broadcast %230 : vector<16x1xf32> to vector<16x32xf32>
    %239 = arith.subf %222, %238 : vector<16x32xf32>
    %cst_89 = arith.constant 9.99999996E-13 : f32
    %240 = vector.broadcast %cst_89 : f32 to vector<16x1xf32>
    %241 = arith.addf %237, %240 : vector<16x1xf32>
    %242 = math.rsqrt %241 : vector<16x1xf32>
    %243 = vector.broadcast %242 : vector<16x1xf32> to vector<16x32xf32>
    %244 = arith.mulf %239, %243 : vector<16x32xf32>
    %245 = vector.broadcast %224 : vector<1x32xf32> to vector<16x32xf32>
    %246 = arith.mulf %244, %245 : vector<16x32xf32>
    %247 = vector.broadcast %226 : vector<1x32xf32> to vector<16x32xf32>
    %248 = arith.addf %246, %247 : vector<16x32xf32>
    %c0_90 = arith.constant 0 : index
    %c0_91 = arith.constant 0 : index
    %c0_92 = arith.constant 0 : index
    %249 = vector.load %arg14[%c0_90, %c0_91, %c0_92] : memref<2x32x128xf32, #tpu.memory_space<vmem>>, vector<1x32x128xf32>
    %250 = vector.shape_cast %249 : vector<1x32x128xf32> to vector<32x128xf32>
    %cst_93 = arith.constant dense<0.000000e+00> : vector<16x128xf32>
    %251 = tpu.matmul %248, %250, %cst_93 {dimension_numbers = #tpu.dot_dimension_numbers<[1], [0], [0], [1], [0, 0, 1, 1], [], []>} : vector<16x32xf32>, vector<32x128xf32>, vector<16x128xf32> -> vector<16x128xf32>
    %c0_94 = arith.constant 0 : index
    %c0_95 = arith.constant 0 : index
    %c0_96 = arith.constant 0 : index
    %252 = vector.load %arg15[%c0_94, %c0_95, %c0_96] : memref<2x1x128xf32, #tpu.memory_space<vmem>>, vector<1x1x128xf32>
    %253 = vector.shape_cast %252 : vector<1x1x128xf32> to vector<1x128xf32>
    %254 = vector.broadcast %253 : vector<1x128xf32> to vector<16x128xf32>
    %255 = arith.addf %251, %254 : vector<16x128xf32>
    %cst_97 = arith.constant 5.000000e-01 : f32
    %256 = vector.broadcast %cst_97 : f32 to vector<16x128xf32>
    %257 = arith.mulf %256, %255 : vector<16x128xf32>
    %cst_98 = arith.constant 4.471500e-02 : f32
    %258 = vector.broadcast %cst_98 : f32 to vector<16x128xf32>
    %259 = arith.mulf %258, %255 : vector<16x128xf32>
    %260 = arith.mulf %259, %255 : vector<16x128xf32>
    %261 = arith.mulf %260, %255 : vector<16x128xf32>
    %262 = arith.addf %255, %261 : vector<16x128xf32>
    %cst_99 = arith.constant 0.797884583 : f32
    %263 = vector.broadcast %cst_99 : f32 to vector<16x128xf32>
    %264 = arith.mulf %263, %262 : vector<16x128xf32>
    %265 = math.tanh %264 : vector<16x128xf32>
    %cst_100 = arith.constant 1.000000e+00 : f32
    %266 = vector.broadcast %cst_100 : f32 to vector<16x128xf32>
    %267 = arith.addf %266, %265 : vector<16x128xf32>
    %268 = arith.mulf %257, %267 : vector<16x128xf32>
    %c0_101 = arith.constant 0 : index
    %c0_102 = arith.constant 0 : index
    %c0_103 = arith.constant 0 : index
    %269 = vector.load %arg16[%c0_101, %c0_102, %c0_103] : memref<2x128x32xf32, #tpu.memory_space<vmem>>, vector<1x128x32xf32>
    %270 = vector.shape_cast %269 : vector<1x128x32xf32> to vector<128x32xf32>
    %cst_104 = arith.constant dense<0.000000e+00> : vector<16x32xf32>
    %271 = tpu.matmul %268, %270, %cst_104 {dimension_numbers = #tpu.dot_dimension_numbers<[1], [0], [0], [1], [0, 0, 1, 1], [], []>} : vector<16x128xf32>, vector<128x32xf32>, vector<16x32xf32> -> vector<16x32xf32>
    %c0_105 = arith.constant 0 : index
    %c0_106 = arith.constant 0 : index
    %c0_107 = arith.constant 0 : index
    %272 = vector.load %arg17[%c0_105, %c0_106, %c0_107] : memref<2x1x32xf32, #tpu.memory_space<vmem>>, vector<1x1x32xf32>
    %273 = vector.shape_cast %272 : vector<1x1x32xf32> to vector<1x32xf32>
    %274 = vector.broadcast %273 : vector<1x32xf32> to vector<16x32xf32>
    %275 = arith.addf %271, %274 : vector<16x32xf32>
    %276 = arith.addf %275, %248 : vector<16x32xf32>
    %c0_108 = arith.constant 0 : index
    %c0_109 = arith.constant 0 : index
    %c0_110 = arith.constant 0 : index
    %277 = vector.load %arg18[%c0_108, %c0_109, %c0_110] : memref<2x1x32xf32, #tpu.memory_space<vmem>>, vector<1x1x32xf32>
    %278 = vector.shape_cast %277 : vector<1x1x32xf32> to vector<1x32xf32>
    %c0_111 = arith.constant 0 : index
    %c0_112 = arith.constant 0 : index
    %c0_113 = arith.constant 0 : index
    %279 = vector.load %arg19[%c0_111, %c0_112, %c0_113] : memref<2x1x32xf32, #tpu.memory_space<vmem>>, vector<1x1x32xf32>
    %280 = vector.shape_cast %279 : vector<1x1x32xf32> to vector<1x32xf32>
    %cst_114 = arith.constant dense<0.000000e+00> : vector<16xf32>
    %281 = vector.multi_reduction <add>, %276, %cst_114 [1] : vector<16x32xf32> to vector<16xf32>
    %282 = vector.shape_cast %281 : vector<16xf32> to vector<16x1xf32>
    %cst_115 = arith.constant 3.200000e+01 : f32
    %283 = vector.broadcast %cst_115 : f32 to vector<16x1xf32>
    %284 = arith.divf %282, %283 : vector<16x1xf32>
    %285 = vector.broadcast %284 : vector<16x1xf32> to vector<16x32xf32>
    %286 = arith.subf %276, %285 : vector<16x32xf32>
    %287 = arith.mulf %286, %286 : vector<16x32xf32>
    %cst_116 = arith.constant dense<0.000000e+00> : vector<16xf32>
    %288 = vector.multi_reduction <add>, %287, %cst_116 [1] : vector<16x32xf32> to vector<16xf32>
    %289 = vector.shape_cast %288 : vector<16xf32> to vector<16x1xf32>
    %cst_117 = arith.constant 3.200000e+01 : f32
    %290 = vector.broadcast %cst_117 : f32 to vector<16x1xf32>
    %291 = arith.divf %289, %290 : vector<16x1xf32>
    %292 = vector.broadcast %284 : vector<16x1xf32> to vector<16x32xf32>
    %293 = arith.subf %276, %292 : vector<16x32xf32>
    %cst_118 = arith.constant 9.99999996E-13 : f32
    %294 = vector.broadcast %cst_118 : f32 to vector<16x1xf32>
    %295 = arith.addf %291, %294 : vector<16x1xf32>
    %296 = math.rsqrt %295 : vector<16x1xf32>
    %297 = vector.broadcast %296 : vector<16x1xf32> to vector<16x32xf32>
    %298 = arith.mulf %293, %297 : vector<16x32xf32>
    %299 = vector.broadcast %278 : vector<1x32xf32> to vector<16x32xf32>
    %300 = arith.mulf %298, %299 : vector<16x32xf32>
    %301 = vector.broadcast %280 : vector<1x32xf32> to vector<16x32xf32>
    %302 = arith.addf %300, %301 : vector<16x32xf32>
    %c1 = arith.constant 1 : index
    %c0_119 = arith.constant 0 : index
    %c0_120 = arith.constant 0 : index
    %303 = vector.load %arg8[%c1, %c0_119, %c0_120] : memref<2x32x96xf32, #tpu.memory_space<vmem>>, vector<1x32x96xf32>
    %304 = vector.shape_cast %303 : vector<1x32x96xf32> to vector<32x96xf32>
    %cst_121 = arith.constant dense<0.000000e+00> : vector<16x96xf32>
    %305 = tpu.matmul %302, %304, %cst_121 {dimension_numbers = #tpu.dot_dimension_numbers<[1], [0], [0], [1], [0, 0, 1, 1], [], []>} : vector<16x32xf32>, vector<32x96xf32>, vector<16x96xf32> -> vector<16x96xf32>
    %c1_122 = arith.constant 1 : index
    %c0_123 = arith.constant 0 : index
    %c0_124 = arith.constant 0 : index
    %306 = vector.load %arg9[%c1_122, %c0_123, %c0_124] : memref<2x1x96xf32, #tpu.memory_space<vmem>>, vector<1x1x96xf32>
    %307 = vector.shape_cast %306 : vector<1x1x96xf32> to vector<1x96xf32>
    %308 = vector.broadcast %307 : vector<1x96xf32> to vector<16x96xf32>
    %309 = arith.addf %305, %308 : vector<16x96xf32>
    %310 = vector.extract_strided_slice %309 {offsets = [0, 0], sizes = [8, 32], strides = [1, 1]} : vector<16x96xf32> to vector<8x32xf32>
    %311 = vector.extract_strided_slice %309 {offsets = [0, 32], sizes = [8, 32], strides = [1, 1]} : vector<16x96xf32> to vector<8x32xf32>
    %312 = vector.extract_strided_slice %309 {offsets = [0, 64], sizes = [8, 32], strides = [1, 1]} : vector<16x96xf32> to vector<8x32xf32>
    %313 = vector.extract_strided_slice %44 {offsets = [0, 0], sizes = [1, 8], strides = [1, 1]} : vector<2x8xf32> to vector<1x8xf32>
    %cst_125 = arith.constant 1.000000e+00 : f32
    %314 = vector.broadcast %cst_125 : f32 to vector<1x8xf32>
    %315 = arith.subf %314, %313 : vector<1x8xf32>
    %cst_126 = arith.constant -1.000000e+04 : f32
    %316 = vector.broadcast %cst_126 : f32 to vector<1x8xf32>
    %317 = arith.mulf %315, %316 : vector<1x8xf32>
    %318 = vector.extract_strided_slice %310 {offsets = [0, 0], sizes = [8, 8], strides = [1, 1]} : vector<8x32xf32> to vector<8x8xf32>
    %319 = vector.extract_strided_slice %311 {offsets = [0, 0], sizes = [8, 8], strides = [1, 1]} : vector<8x32xf32> to vector<8x8xf32>
    %320 = vector.extract_strided_slice %312 {offsets = [0, 0], sizes = [8, 8], strides = [1, 1]} : vector<8x32xf32> to vector<8x8xf32>
    %cst_127 = arith.constant dense<0.000000e+00> : vector<8x8xf32>
    %321 = tpu.matmul %318, %319, %cst_127 {dimension_numbers = #tpu.dot_dimension_numbers<[1], [1], [0], [0], [0, 0, 1, 0], [], []>} : vector<8x8xf32>, vector<8x8xf32>, vector<8x8xf32> -> vector<8x8xf32>
    %cst_128 = arith.constant 0.353553385 : f32
    %322 = vector.broadcast %cst_128 : f32 to vector<8x8xf32>
    %323 = arith.mulf %321, %322 : vector<8x8xf32>
    %324 = vector.broadcast %317 : vector<1x8xf32> to vector<8x8xf32>
    %325 = arith.addf %323, %324 : vector<8x8xf32>
    %cst_129 = arith.constant dense<0xFF800000> : vector<8xf32>
    %326 = vector.multi_reduction <maximumf>, %325, %cst_129 [1] : vector<8x8xf32> to vector<8xf32>
    %327 = vector.shape_cast %326 : vector<8xf32> to vector<8x1xf32>
    %328 = vector.broadcast %327 : vector<8x1xf32> to vector<8x8xf32>
    %329 = arith.subf %325, %328 : vector<8x8xf32>
    %330 = math.exp %329 : vector<8x8xf32>
    %cst_130 = arith.constant dense<0.000000e+00> : vector<8xf32>
    %331 = vector.multi_reduction <add>, %330, %cst_130 [1] : vector<8x8xf32> to vector<8xf32>
    %332 = vector.shape_cast %331 : vector<8xf32> to vector<8x1xf32>
    %333 = vector.broadcast %332 : vector<8x1xf32> to vector<8x8xf32>
    %334 = arith.divf %330, %333 : vector<8x8xf32>
    %cst_131 = arith.constant dense<0.000000e+00> : vector<8x8xf32>
    %335 = tpu.matmul %334, %320, %cst_131 {dimension_numbers = #tpu.dot_dimension_numbers<[1], [0], [0], [1], [0, 0, 1, 1], [], []>} : vector<8x8xf32>, vector<8x8xf32>, vector<8x8xf32> -> vector<8x8xf32>
    %336 = vector.extract_strided_slice %310 {offsets = [0, 8], sizes = [8, 8], strides = [1, 1]} : vector<8x32xf32> to vector<8x8xf32>
    %337 = vector.extract_strided_slice %311 {offsets = [0, 8], sizes = [8, 8], strides = [1, 1]} : vector<8x32xf32> to vector<8x8xf32>
    %338 = vector.extract_strided_slice %312 {offsets = [0, 8], sizes = [8, 8], strides = [1, 1]} : vector<8x32xf32> to vector<8x8xf32>
    %cst_132 = arith.constant dense<0.000000e+00> : vector<8x8xf32>
    %339 = tpu.matmul %336, %337, %cst_132 {dimension_numbers = #tpu.dot_dimension_numbers<[1], [1], [0], [0], [0, 0, 1, 0], [], []>} : vector<8x8xf32>, vector<8x8xf32>, vector<8x8xf32> -> vector<8x8xf32>
    %cst_133 = arith.constant 0.353553385 : f32
    %340 = vector.broadcast %cst_133 : f32 to vector<8x8xf32>
    %341 = arith.mulf %339, %340 : vector<8x8xf32>
    %342 = vector.broadcast %317 : vector<1x8xf32> to vector<8x8xf32>
    %343 = arith.addf %341, %342 : vector<8x8xf32>
    %cst_134 = arith.constant dense<0xFF800000> : vector<8xf32>
    %344 = vector.multi_reduction <maximumf>, %343, %cst_134 [1] : vector<8x8xf32> to vector<8xf32>
    %345 = vector.shape_cast %344 : vector<8xf32> to vector<8x1xf32>
    %346 = vector.broadcast %345 : vector<8x1xf32> to vector<8x8xf32>
    %347 = arith.subf %343, %346 : vector<8x8xf32>
    %348 = math.exp %347 : vector<8x8xf32>
    %cst_135 = arith.constant dense<0.000000e+00> : vector<8xf32>
    %349 = vector.multi_reduction <add>, %348, %cst_135 [1] : vector<8x8xf32> to vector<8xf32>
    %350 = vector.shape_cast %349 : vector<8xf32> to vector<8x1xf32>
    %351 = vector.broadcast %350 : vector<8x1xf32> to vector<8x8xf32>
    %352 = arith.divf %348, %351 : vector<8x8xf32>
    %cst_136 = arith.constant dense<0.000000e+00> : vector<8x8xf32>
    %353 = tpu.matmul %352, %338, %cst_136 {dimension_numbers = #tpu.dot_dimension_numbers<[1], [0], [0], [1], [0, 0, 1, 1], [], []>} : vector<8x8xf32>, vector<8x8xf32>, vector<8x8xf32> -> vector<8x8xf32>
    %354 = vector.extract_strided_slice %310 {offsets = [0, 16], sizes = [8, 8], strides = [1, 1]} : vector<8x32xf32> to vector<8x8xf32>
    %355 = vector.extract_strided_slice %311 {offsets = [0, 16], sizes = [8, 8], strides = [1, 1]} : vector<8x32xf32> to vector<8x8xf32>
    %356 = vector.extract_strided_slice %312 {offsets = [0, 16], sizes = [8, 8], strides = [1, 1]} : vector<8x32xf32> to vector<8x8xf32>
    %cst_137 = arith.constant dense<0.000000e+00> : vector<8x8xf32>
    %357 = tpu.matmul %354, %355, %cst_137 {dimension_numbers = #tpu.dot_dimension_numbers<[1], [1], [0], [0], [0, 0, 1, 0], [], []>} : vector<8x8xf32>, vector<8x8xf32>, vector<8x8xf32> -> vector<8x8xf32>
    %cst_138 = arith.constant 0.353553385 : f32
    %358 = vector.broadcast %cst_138 : f32 to vector<8x8xf32>
    %359 = arith.mulf %357, %358 : vector<8x8xf32>
    %360 = vector.broadcast %317 : vector<1x8xf32> to vector<8x8xf32>
    %361 = arith.addf %359, %360 : vector<8x8xf32>
    %cst_139 = arith.constant dense<0xFF800000> : vector<8xf32>
    %362 = vector.multi_reduction <maximumf>, %361, %cst_139 [1] : vector<8x8xf32> to vector<8xf32>
    %363 = vector.shape_cast %362 : vector<8xf32> to vector<8x1xf32>
    %364 = vector.broadcast %363 : vector<8x1xf32> to vector<8x8xf32>
    %365 = arith.subf %361, %364 : vector<8x8xf32>
    %366 = math.exp %365 : vector<8x8xf32>
    %cst_140 = arith.constant dense<0.000000e+00> : vector<8xf32>
    %367 = vector.multi_reduction <add>, %366, %cst_140 [1] : vector<8x8xf32> to vector<8xf32>
    %368 = vector.shape_cast %367 : vector<8xf32> to vector<8x1xf32>
    %369 = vector.broadcast %368 : vector<8x1xf32> to vector<8x8xf32>
    %370 = arith.divf %366, %369 : vector<8x8xf32>
    %cst_141 = arith.constant dense<0.000000e+00> : vector<8x8xf32>
    %371 = tpu.matmul %370, %356, %cst_141 {dimension_numbers = #tpu.dot_dimension_numbers<[1], [0], [0], [1], [0, 0, 1, 1], [], []>} : vector<8x8xf32>, vector<8x8xf32>, vector<8x8xf32> -> vector<8x8xf32>
    %372 = vector.extract_strided_slice %310 {offsets = [0, 24], sizes = [8, 8], strides = [1, 1]} : vector<8x32xf32> to vector<8x8xf32>
    %373 = vector.extract_strided_slice %311 {offsets = [0, 24], sizes = [8, 8], strides = [1, 1]} : vector<8x32xf32> to vector<8x8xf32>
    %374 = vector.extract_strided_slice %312 {offsets = [0, 24], sizes = [8, 8], strides = [1, 1]} : vector<8x32xf32> to vector<8x8xf32>
    %cst_142 = arith.constant dense<0.000000e+00> : vector<8x8xf32>
    %375 = tpu.matmul %372, %373, %cst_142 {dimension_numbers = #tpu.dot_dimension_numbers<[1], [1], [0], [0], [0, 0, 1, 0], [], []>} : vector<8x8xf32>, vector<8x8xf32>, vector<8x8xf32> -> vector<8x8xf32>
    %cst_143 = arith.constant 0.353553385 : f32
    %376 = vector.broadcast %cst_143 : f32 to vector<8x8xf32>
    %377 = arith.mulf %375, %376 : vector<8x8xf32>
    %378 = vector.broadcast %317 : vector<1x8xf32> to vector<8x8xf32>
    %379 = arith.addf %377, %378 : vector<8x8xf32>
    %cst_144 = arith.constant dense<0xFF800000> : vector<8xf32>
    %380 = vector.multi_reduction <maximumf>, %379, %cst_144 [1] : vector<8x8xf32> to vector<8xf32>
    %381 = vector.shape_cast %380 : vector<8xf32> to vector<8x1xf32>
    %382 = vector.broadcast %381 : vector<8x1xf32> to vector<8x8xf32>
    %383 = arith.subf %379, %382 : vector<8x8xf32>
    %384 = math.exp %383 : vector<8x8xf32>
    %cst_145 = arith.constant dense<0.000000e+00> : vector<8xf32>
    %385 = vector.multi_reduction <add>, %384, %cst_145 [1] : vector<8x8xf32> to vector<8xf32>
    %386 = vector.shape_cast %385 : vector<8xf32> to vector<8x1xf32>
    %387 = vector.broadcast %386 : vector<8x1xf32> to vector<8x8xf32>
    %388 = arith.divf %384, %387 : vector<8x8xf32>
    %cst_146 = arith.constant dense<0.000000e+00> : vector<8x8xf32>
    %389 = tpu.matmul %388, %374, %cst_146 {dimension_numbers = #tpu.dot_dimension_numbers<[1], [0], [0], [1], [0, 0, 1, 1], [], []>} : vector<8x8xf32>, vector<8x8xf32>, vector<8x8xf32> -> vector<8x8xf32>
    %390 = tpu.concatenate %335, %353, %371, %389 in 1 : vector<8x8xf32>, vector<8x8xf32>, vector<8x8xf32>, vector<8x8xf32> -> vector<8x32xf32>
    %391 = vector.extract_strided_slice %309 {offsets = [8, 0], sizes = [8, 32], strides = [1, 1]} : vector<16x96xf32> to vector<8x32xf32>
    %392 = vector.extract_strided_slice %309 {offsets = [8, 32], sizes = [8, 32], strides = [1, 1]} : vector<16x96xf32> to vector<8x32xf32>
    %393 = vector.extract_strided_slice %309 {offsets = [8, 64], sizes = [8, 32], strides = [1, 1]} : vector<16x96xf32> to vector<8x32xf32>
    %394 = vector.extract_strided_slice %44 {offsets = [1, 0], sizes = [1, 8], strides = [1, 1]} : vector<2x8xf32> to vector<1x8xf32>
    %cst_147 = arith.constant 1.000000e+00 : f32
    %395 = vector.broadcast %cst_147 : f32 to vector<1x8xf32>
    %396 = arith.subf %395, %394 : vector<1x8xf32>
    %cst_148 = arith.constant -1.000000e+04 : f32
    %397 = vector.broadcast %cst_148 : f32 to vector<1x8xf32>
    %398 = arith.mulf %396, %397 : vector<1x8xf32>
    %399 = vector.extract_strided_slice %391 {offsets = [0, 0], sizes = [8, 8], strides = [1, 1]} : vector<8x32xf32> to vector<8x8xf32>
    %400 = vector.extract_strided_slice %392 {offsets = [0, 0], sizes = [8, 8], strides = [1, 1]} : vector<8x32xf32> to vector<8x8xf32>
    %401 = vector.extract_strided_slice %393 {offsets = [0, 0], sizes = [8, 8], strides = [1, 1]} : vector<8x32xf32> to vector<8x8xf32>
    %cst_149 = arith.constant dense<0.000000e+00> : vector<8x8xf32>
    %402 = tpu.matmul %399, %400, %cst_149 {dimension_numbers = #tpu.dot_dimension_numbers<[1], [1], [0], [0], [0, 0, 1, 0], [], []>} : vector<8x8xf32>, vector<8x8xf32>, vector<8x8xf32> -> vector<8x8xf32>
    %cst_150 = arith.constant 0.353553385 : f32
    %403 = vector.broadcast %cst_150 : f32 to vector<8x8xf32>
    %404 = arith.mulf %402, %403 : vector<8x8xf32>
    %405 = vector.broadcast %398 : vector<1x8xf32> to vector<8x8xf32>
    %406 = arith.addf %404, %405 : vector<8x8xf32>
    %cst_151 = arith.constant dense<0xFF800000> : vector<8xf32>
    %407 = vector.multi_reduction <maximumf>, %406, %cst_151 [1] : vector<8x8xf32> to vector<8xf32>
    %408 = vector.shape_cast %407 : vector<8xf32> to vector<8x1xf32>
    %409 = vector.broadcast %408 : vector<8x1xf32> to vector<8x8xf32>
    %410 = arith.subf %406, %409 : vector<8x8xf32>
    %411 = math.exp %410 : vector<8x8xf32>
    %cst_152 = arith.constant dense<0.000000e+00> : vector<8xf32>
    %412 = vector.multi_reduction <add>, %411, %cst_152 [1] : vector<8x8xf32> to vector<8xf32>
    %413 = vector.shape_cast %412 : vector<8xf32> to vector<8x1xf32>
    %414 = vector.broadcast %413 : vector<8x1xf32> to vector<8x8xf32>
    %415 = arith.divf %411, %414 : vector<8x8xf32>
    %cst_153 = arith.constant dense<0.000000e+00> : vector<8x8xf32>
    %416 = tpu.matmul %415, %401, %cst_153 {dimension_numbers = #tpu.dot_dimension_numbers<[1], [0], [0], [1], [0, 0, 1, 1], [], []>} : vector<8x8xf32>, vector<8x8xf32>, vector<8x8xf32> -> vector<8x8xf32>
    %417 = vector.extract_strided_slice %391 {offsets = [0, 8], sizes = [8, 8], strides = [1, 1]} : vector<8x32xf32> to vector<8x8xf32>
    %418 = vector.extract_strided_slice %392 {offsets = [0, 8], sizes = [8, 8], strides = [1, 1]} : vector<8x32xf32> to vector<8x8xf32>
    %419 = vector.extract_strided_slice %393 {offsets = [0, 8], sizes = [8, 8], strides = [1, 1]} : vector<8x32xf32> to vector<8x8xf32>
    %cst_154 = arith.constant dense<0.000000e+00> : vector<8x8xf32>
    %420 = tpu.matmul %417, %418, %cst_154 {dimension_numbers = #tpu.dot_dimension_numbers<[1], [1], [0], [0], [0, 0, 1, 0], [], []>} : vector<8x8xf32>, vector<8x8xf32>, vector<8x8xf32> -> vector<8x8xf32>
    %cst_155 = arith.constant 0.353553385 : f32
    %421 = vector.broadcast %cst_155 : f32 to vector<8x8xf32>
    %422 = arith.mulf %420, %421 : vector<8x8xf32>
    %423 = vector.broadcast %398 : vector<1x8xf32> to vector<8x8xf32>
    %424 = arith.addf %422, %423 : vector<8x8xf32>
    %cst_156 = arith.constant dense<0xFF800000> : vector<8xf32>
    %425 = vector.multi_reduction <maximumf>, %424, %cst_156 [1] : vector<8x8xf32> to vector<8xf32>
    %426 = vector.shape_cast %425 : vector<8xf32> to vector<8x1xf32>
    %427 = vector.broadcast %426 : vector<8x1xf32> to vector<8x8xf32>
    %428 = arith.subf %424, %427 : vector<8x8xf32>
    %429 = math.exp %428 : vector<8x8xf32>
    %cst_157 = arith.constant dense<0.000000e+00> : vector<8xf32>
    %430 = vector.multi_reduction <add>, %429, %cst_157 [1] : vector<8x8xf32> to vector<8xf32>
    %431 = vector.shape_cast %430 : vector<8xf32> to vector<8x1xf32>
    %432 = vector.broadcast %431 : vector<8x1xf32> to vector<8x8xf32>
    %433 = arith.divf %429, %432 : vector<8x8xf32>
    %cst_158 = arith.constant dense<0.000000e+00> : vector<8x8xf32>
    %434 = tpu.matmul %433, %419, %cst_158 {dimension_numbers = #tpu.dot_dimension_numbers<[1], [0], [0], [1], [0, 0, 1, 1], [], []>} : vector<8x8xf32>, vector<8x8xf32>, vector<8x8xf32> -> vector<8x8xf32>
    %435 = vector.extract_strided_slice %391 {offsets = [0, 16], sizes = [8, 8], strides = [1, 1]} : vector<8x32xf32> to vector<8x8xf32>
    %436 = vector.extract_strided_slice %392 {offsets = [0, 16], sizes = [8, 8], strides = [1, 1]} : vector<8x32xf32> to vector<8x8xf32>
    %437 = vector.extract_strided_slice %393 {offsets = [0, 16], sizes = [8, 8], strides = [1, 1]} : vector<8x32xf32> to vector<8x8xf32>
    %cst_159 = arith.constant dense<0.000000e+00> : vector<8x8xf32>
    %438 = tpu.matmul %435, %436, %cst_159 {dimension_numbers = #tpu.dot_dimension_numbers<[1], [1], [0], [0], [0, 0, 1, 0], [], []>} : vector<8x8xf32>, vector<8x8xf32>, vector<8x8xf32> -> vector<8x8xf32>
    %cst_160 = arith.constant 0.353553385 : f32
    %439 = vector.broadcast %cst_160 : f32 to vector<8x8xf32>
    %440 = arith.mulf %438, %439 : vector<8x8xf32>
    %441 = vector.broadcast %398 : vector<1x8xf32> to vector<8x8xf32>
    %442 = arith.addf %440, %441 : vector<8x8xf32>
    %cst_161 = arith.constant dense<0xFF800000> : vector<8xf32>
    %443 = vector.multi_reduction <maximumf>, %442, %cst_161 [1] : vector<8x8xf32> to vector<8xf32>
    %444 = vector.shape_cast %443 : vector<8xf32> to vector<8x1xf32>
    %445 = vector.broadcast %444 : vector<8x1xf32> to vector<8x8xf32>
    %446 = arith.subf %442, %445 : vector<8x8xf32>
    %447 = math.exp %446 : vector<8x8xf32>
    %cst_162 = arith.constant dense<0.000000e+00> : vector<8xf32>
    %448 = vector.multi_reduction <add>, %447, %cst_162 [1] : vector<8x8xf32> to vector<8xf32>
    %449 = vector.shape_cast %448 : vector<8xf32> to vector<8x1xf32>
    %450 = vector.broadcast %449 : vector<8x1xf32> to vector<8x8xf32>
    %451 = arith.divf %447, %450 : vector<8x8xf32>
    %cst_163 = arith.constant dense<0.000000e+00> : vector<8x8xf32>
    %452 = tpu.matmul %451, %437, %cst_163 {dimension_numbers = #tpu.dot_dimension_numbers<[1], [0], [0], [1], [0, 0, 1, 1], [], []>} : vector<8x8xf32>, vector<8x8xf32>, vector<8x8xf32> -> vector<8x8xf32>
    %453 = vector.extract_strided_slice %391 {offsets = [0, 24], sizes = [8, 8], strides = [1, 1]} : vector<8x32xf32> to vector<8x8xf32>
    %454 = vector.extract_strided_slice %392 {offsets = [0, 24], sizes = [8, 8], strides = [1, 1]} : vector<8x32xf32> to vector<8x8xf32>
    %455 = vector.extract_strided_slice %393 {offsets = [0, 24], sizes = [8, 8], strides = [1, 1]} : vector<8x32xf32> to vector<8x8xf32>
    %cst_164 = arith.constant dense<0.000000e+00> : vector<8x8xf32>
    %456 = tpu.matmul %453, %454, %cst_164 {dimension_numbers = #tpu.dot_dimension_numbers<[1], [1], [0], [0], [0, 0, 1, 0], [], []>} : vector<8x8xf32>, vector<8x8xf32>, vector<8x8xf32> -> vector<8x8xf32>
    %cst_165 = arith.constant 0.353553385 : f32
    %457 = vector.broadcast %cst_165 : f32 to vector<8x8xf32>
    %458 = arith.mulf %456, %457 : vector<8x8xf32>
    %459 = vector.broadcast %398 : vector<1x8xf32> to vector<8x8xf32>
    %460 = arith.addf %458, %459 : vector<8x8xf32>
    %cst_166 = arith.constant dense<0xFF800000> : vector<8xf32>
    %461 = vector.multi_reduction <maximumf>, %460, %cst_166 [1] : vector<8x8xf32> to vector<8xf32>
    %462 = vector.shape_cast %461 : vector<8xf32> to vector<8x1xf32>
    %463 = vector.broadcast %462 : vector<8x1xf32> to vector<8x8xf32>
    %464 = arith.subf %460, %463 : vector<8x8xf32>
    %465 = math.exp %464 : vector<8x8xf32>
    %cst_167 = arith.constant dense<0.000000e+00> : vector<8xf32>
    %466 = vector.multi_reduction <add>, %465, %cst_167 [1] : vector<8x8xf32> to vector<8xf32>
    %467 = vector.shape_cast %466 : vector<8xf32> to vector<8x1xf32>
    %468 = vector.broadcast %467 : vector<8x1xf32> to vector<8x8xf32>
    %469 = arith.divf %465, %468 : vector<8x8xf32>
    %cst_168 = arith.constant dense<0.000000e+00> : vector<8x8xf32>
    %470 = tpu.matmul %469, %455, %cst_168 {dimension_numbers = #tpu.dot_dimension_numbers<[1], [0], [0], [1], [0, 0, 1, 1], [], []>} : vector<8x8xf32>, vector<8x8xf32>, vector<8x8xf32> -> vector<8x8xf32>
    %471 = tpu.concatenate %416, %434, %452, %470 in 1 : vector<8x8xf32>, vector<8x8xf32>, vector<8x8xf32>, vector<8x8xf32> -> vector<8x32xf32>
    %472 = tpu.concatenate %390, %471 in 0 : vector<8x32xf32>, vector<8x32xf32> -> vector<16x32xf32>
    %c1_169 = arith.constant 1 : index
    %c0_170 = arith.constant 0 : index
    %c0_171 = arith.constant 0 : index
    %473 = vector.load %arg10[%c1_169, %c0_170, %c0_171] : memref<2x32x32xf32, #tpu.memory_space<vmem>>, vector<1x32x32xf32>
    %474 = vector.shape_cast %473 : vector<1x32x32xf32> to vector<32x32xf32>
    %cst_172 = arith.constant dense<0.000000e+00> : vector<16x32xf32>
    %475 = tpu.matmul %472, %474, %cst_172 {dimension_numbers = #tpu.dot_dimension_numbers<[1], [0], [0], [1], [0, 0, 1, 1], [], []>} : vector<16x32xf32>, vector<32x32xf32>, vector<16x32xf32> -> vector<16x32xf32>
    %c1_173 = arith.constant 1 : index
    %c0_174 = arith.constant 0 : index
    %c0_175 = arith.constant 0 : index
    %476 = vector.load %arg11[%c1_173, %c0_174, %c0_175] : memref<2x1x32xf32, #tpu.memory_space<vmem>>, vector<1x1x32xf32>
    %477 = vector.shape_cast %476 : vector<1x1x32xf32> to vector<1x32xf32>
    %478 = vector.broadcast %477 : vector<1x32xf32> to vector<16x32xf32>
    %479 = arith.addf %475, %478 : vector<16x32xf32>
    %480 = arith.addf %479, %302 : vector<16x32xf32>
    %c1_176 = arith.constant 1 : index
    %c0_177 = arith.constant 0 : index
    %c0_178 = arith.constant 0 : index
    %481 = vector.load %arg12[%c1_176, %c0_177, %c0_178] : memref<2x1x32xf32, #tpu.memory_space<vmem>>, vector<1x1x32xf32>
    %482 = vector.shape_cast %481 : vector<1x1x32xf32> to vector<1x32xf32>
    %c1_179 = arith.constant 1 : index
    %c0_180 = arith.constant 0 : index
    %c0_181 = arith.constant 0 : index
    %483 = vector.load %arg13[%c1_179, %c0_180, %c0_181] : memref<2x1x32xf32, #tpu.memory_space<vmem>>, vector<1x1x32xf32>
    %484 = vector.shape_cast %483 : vector<1x1x32xf32> to vector<1x32xf32>
    %cst_182 = arith.constant dense<0.000000e+00> : vector<16xf32>
    %485 = vector.multi_reduction <add>, %480, %cst_182 [1] : vector<16x32xf32> to vector<16xf32>
    %486 = vector.shape_cast %485 : vector<16xf32> to vector<16x1xf32>
    %cst_183 = arith.constant 3.200000e+01 : f32
    %487 = vector.broadcast %cst_183 : f32 to vector<16x1xf32>
    %488 = arith.divf %486, %487 : vector<16x1xf32>
    %489 = vector.broadcast %488 : vector<16x1xf32> to vector<16x32xf32>
    %490 = arith.subf %480, %489 : vector<16x32xf32>
    %491 = arith.mulf %490, %490 : vector<16x32xf32>
    %cst_184 = arith.constant dense<0.000000e+00> : vector<16xf32>
    %492 = vector.multi_reduction <add>, %491, %cst_184 [1] : vector<16x32xf32> to vector<16xf32>
    %493 = vector.shape_cast %492 : vector<16xf32> to vector<16x1xf32>
    %cst_185 = arith.constant 3.200000e+01 : f32
    %494 = vector.broadcast %cst_185 : f32 to vector<16x1xf32>
    %495 = arith.divf %493, %494 : vector<16x1xf32>
    %496 = vector.broadcast %488 : vector<16x1xf32> to vector<16x32xf32>
    %497 = arith.subf %480, %496 : vector<16x32xf32>
    %cst_186 = arith.constant 9.99999996E-13 : f32
    %498 = vector.broadcast %cst_186 : f32 to vector<16x1xf32>
    %499 = arith.addf %495, %498 : vector<16x1xf32>
    %500 = math.rsqrt %499 : vector<16x1xf32>
    %501 = vector.broadcast %500 : vector<16x1xf32> to vector<16x32xf32>
    %502 = arith.mulf %497, %501 : vector<16x32xf32>
    %503 = vector.broadcast %482 : vector<1x32xf32> to vector<16x32xf32>
    %504 = arith.mulf %502, %503 : vector<16x32xf32>
    %505 = vector.broadcast %484 : vector<1x32xf32> to vector<16x32xf32>
    %506 = arith.addf %504, %505 : vector<16x32xf32>
    %c1_187 = arith.constant 1 : index
    %c0_188 = arith.constant 0 : index
    %c0_189 = arith.constant 0 : index
    %507 = vector.load %arg14[%c1_187, %c0_188, %c0_189] : memref<2x32x128xf32, #tpu.memory_space<vmem>>, vector<1x32x128xf32>
    %508 = vector.shape_cast %507 : vector<1x32x128xf32> to vector<32x128xf32>
    %cst_190 = arith.constant dense<0.000000e+00> : vector<16x128xf32>
    %509 = tpu.matmul %506, %508, %cst_190 {dimension_numbers = #tpu.dot_dimension_numbers<[1], [0], [0], [1], [0, 0, 1, 1], [], []>} : vector<16x32xf32>, vector<32x128xf32>, vector<16x128xf32> -> vector<16x128xf32>
    %c1_191 = arith.constant 1 : index
    %c0_192 = arith.constant 0 : index
    %c0_193 = arith.constant 0 : index
    %510 = vector.load %arg15[%c1_191, %c0_192, %c0_193] : memref<2x1x128xf32, #tpu.memory_space<vmem>>, vector<1x1x128xf32>
    %511 = vector.shape_cast %510 : vector<1x1x128xf32> to vector<1x128xf32>
    %512 = vector.broadcast %511 : vector<1x128xf32> to vector<16x128xf32>
    %513 = arith.addf %509, %512 : vector<16x128xf32>
    %cst_194 = arith.constant 5.000000e-01 : f32
    %514 = vector.broadcast %cst_194 : f32 to vector<16x128xf32>
    %515 = arith.mulf %514, %513 : vector<16x128xf32>
    %cst_195 = arith.constant 4.471500e-02 : f32
    %516 = vector.broadcast %cst_195 : f32 to vector<16x128xf32>
    %517 = arith.mulf %516, %513 : vector<16x128xf32>
    %518 = arith.mulf %517, %513 : vector<16x128xf32>
    %519 = arith.mulf %518, %513 : vector<16x128xf32>
    %520 = arith.addf %513, %519 : vector<16x128xf32>
    %cst_196 = arith.constant 0.797884583 : f32
    %521 = vector.broadcast %cst_196 : f32 to vector<16x128xf32>
    %522 = arith.mulf %521, %520 : vector<16x128xf32>
    %523 = math.tanh %522 : vector<16x128xf32>
    %cst_197 = arith.constant 1.000000e+00 : f32
    %524 = vector.broadcast %cst_197 : f32 to vector<16x128xf32>
    %525 = arith.addf %524, %523 : vector<16x128xf32>
    %526 = arith.mulf %515, %525 : vector<16x128xf32>
    %c1_198 = arith.constant 1 : index
    %c0_199 = arith.constant 0 : index
    %c0_200 = arith.constant 0 : index
    %527 = vector.load %arg16[%c1_198, %c0_199, %c0_200] : memref<2x128x32xf32, #tpu.memory_space<vmem>>, vector<1x128x32xf32>
    %528 = vector.shape_cast %527 : vector<1x128x32xf32> to vector<128x32xf32>
    %cst_201 = arith.constant dense<0.000000e+00> : vector<16x32xf32>
    %529 = tpu.matmul %526, %528, %cst_201 {dimension_numbers = #tpu.dot_dimension_numbers<[1], [0], [0], [1], [0, 0, 1, 1], [], []>} : vector<16x128xf32>, vector<128x32xf32>, vector<16x32xf32> -> vector<16x32xf32>
    %c1_202 = arith.constant 1 : index
    %c0_203 = arith.constant 0 : index
    %c0_204 = arith.constant 0 : index
    %530 = vector.load %arg17[%c1_202, %c0_203, %c0_204] : memref<2x1x32xf32, #tpu.memory_space<vmem>>, vector<1x1x32xf32>
    %531 = vector.shape_cast %530 : vector<1x1x32xf32> to vector<1x32xf32>
    %532 = vector.broadcast %531 : vector<1x32xf32> to vector<16x32xf32>
    %533 = arith.addf %529, %532 : vector<16x32xf32>
    %534 = arith.addf %533, %506 : vector<16x32xf32>
    %c1_205 = arith.constant 1 : index
    %c0_206 = arith.constant 0 : index
    %c0_207 = arith.constant 0 : index
    %535 = vector.load %arg18[%c1_205, %c0_206, %c0_207] : memref<2x1x32xf32, #tpu.memory_space<vmem>>, vector<1x1x32xf32>
    %536 = vector.shape_cast %535 : vector<1x1x32xf32> to vector<1x32xf32>
    %c1_208 = arith.constant 1 : index
    %c0_209 = arith.constant 0 : index
    %c0_210 = arith.constant 0 : index
    %537 = vector.load %arg19[%c1_208, %c0_209, %c0_210] : memref<2x1x32xf32, #tpu.memory_space<vmem>>, vector<1x1x32xf32>
    %538 = vector.shape_cast %537 : vector<1x1x32xf32> to vector<1x32xf32>
    %cst_211 = arith.constant dense<0.000000e+00> : vector<16xf32>
    %539 = vector.multi_reduction <add>, %534, %cst_211 [1] : vector<16x32xf32> to vector<16xf32>
    %540 = vector.shape_cast %539 : vector<16xf32> to vector<16x1xf32>
    %cst_212 = arith.constant 3.200000e+01 : f32
    %541 = vector.broadcast %cst_212 : f32 to vector<16x1xf32>
    %542 = arith.divf %540, %541 : vector<16x1xf32>
    %543 = vector.broadcast %542 : vector<16x1xf32> to vector<16x32xf32>
    %544 = arith.subf %534, %543 : vector<16x32xf32>
    %545 = arith.mulf %544, %544 : vector<16x32xf32>
    %cst_213 = arith.constant dense<0.000000e+00> : vector<16xf32>
    %546 = vector.multi_reduction <add>, %545, %cst_213 [1] : vector<16x32xf32> to vector<16xf32>
    %547 = vector.shape_cast %546 : vector<16xf32> to vector<16x1xf32>
    %cst_214 = arith.constant 3.200000e+01 : f32
    %548 = vector.broadcast %cst_214 : f32 to vector<16x1xf32>
    %549 = arith.divf %547, %548 : vector<16x1xf32>
    %550 = vector.broadcast %542 : vector<16x1xf32> to vector<16x32xf32>
    %551 = arith.subf %534, %550 : vector<16x32xf32>
    %cst_215 = arith.constant 9.99999996E-13 : f32
    %552 = vector.broadcast %cst_215 : f32 to vector<16x1xf32>
    %553 = arith.addf %549, %552 : vector<16x1xf32>
    %554 = math.rsqrt %553 : vector<16x1xf32>
    %555 = vector.broadcast %554 : vector<16x1xf32> to vector<16x32xf32>
    %556 = arith.mulf %551, %555 : vector<16x32xf32>
    %557 = vector.broadcast %536 : vector<1x32xf32> to vector<16x32xf32>
    %558 = arith.mulf %556, %557 : vector<16x32xf32>
    %559 = vector.broadcast %538 : vector<1x32xf32> to vector<16x32xf32>
    %560 = arith.addf %558, %559 : vector<16x32xf32>
    %c0_216 = arith.constant 0 : index
    %c0_217 = arith.constant 0 : index
    %561 = vector.load %arg22[%c0_216, %c0_217] : memref<16x32xf32, #tpu.memory_space<vmem>>, vector<16x32xf32>
    tpu.vector_store %arg22[%c0_216, %c0_217], %560 {strides = array<i32>} : memref<16x32xf32, #tpu.memory_space<vmem>>, vector<16x32xf32>,
    %c0_218 = arith.constant 0 : index
    %c0_219 = arith.constant 0 : index
    %562 = vector.load %arg20[%c0_218, %c0_219] : memref<32x32xf32, #tpu.memory_space<vmem>>, vector<32x32xf32>
    %cst_220 = arith.constant dense<0.000000e+00> : vector<16x32xf32>
    %563 = tpu.matmul %560, %562, %cst_220 {dimension_numbers = #tpu.dot_dimension_numbers<[1], [0], [0], [1], [0, 0, 1, 1], [], []>} : vector<16x32xf32>, vector<32x32xf32>, vector<16x32xf32> -> vector<16x32xf32>
    %c0_221 = arith.constant 0 : index
    %c0_222 = arith.constant 0 : index
    %564 = vector.load %arg21[%c0_221, %c0_222] : memref<1x32xf32, #tpu.memory_space<vmem>>, vector<1x32xf32>
    %565 = vector.broadcast %564 : vector<1x32xf32> to vector<16x32xf32>
    %566 = arith.addf %563, %565 : vector<16x32xf32>
    %567 = math.tanh %566 : vector<16x32xf32>
    %c0_223 = arith.constant 0 : index
    %c0_224 = arith.constant 0 : index
    %568 = vector.load %arg23[%c0_223, %c0_224] : memref<16x32xf32, #tpu.memory_space<vmem>>, vector<16x32xf32>
    tpu.vector_store %arg23[%c0_223, %c0_224], %567 {strides = array<i32>} : memref<16x32xf32, #tpu.memory_space<vmem>>, vector<16x32xf32>,
    return
  }
}

</mosaic_0001>

<bundles_post_ra>
// kernel: bert_embedding_forward.1
= control target key start
LH: loop header
LB: loop body
LE: loop exit
PB: predicated region body
PF: predicated region fallthrough
CT: control target
= control target key end

     0   :  { %s5859_s0 = inlined_call_operand.vmem [shape: s32[16,1], index: 0, kind: input, shape index: {}]   ;;  %s5860_s1 = inlined_call_operand.vmem [shape: s32[16,1], index: 1, kind: input, shape index: {}]   ;;  %s5861_s2 = inlined_call_operand.vmem [shape: f32[2,8], index: 2, kind: input, shape index: {}]   ;;  %s5862_s3 = inlined_call_operand.hbm [shape: f32[128,32], index: 3, kind: input, shape index: {}]   ;;  %s5863_s4 = inlined_call_operand.hbm [shape: f32[16,32], index: 4, kind: input, shape index: {}]   ;;  %s5864_s5 = inlined_call_operand.vmem [shape: f32[8,32], index: 5, kind: input, shape index: {}]   ;;  %s5865_s6 = inlined_call_operand.vmem [shape: f32[1,32], index: 6, kind: input, shape index: {}]   ;;  %s5866_s7 = inlined_call_operand.vmem [shape: f32[1,32], index: 7, kind: input, shape index: {}, may-alias: {7,21}]   ;;  %s5867_s8 = inlined_call_operand.vmem [shape: f32[2,32,96], index: 8, kind: input, shape index: {}]   ;;  %s5868_s9 = inlined_call_operand.vmem [shape: f32[2,1,96], index: 9, kind: input, shape index: {}]   ;;  %s5869_s10 = inlined_call_operand.hbm [shape: f32[2,32,32], index: 10, kind: input, shape index: {}]   ;;  %s5870_s11 = inlined_call_operand.vmem [shape: f32[2,1,32], index: 11, kind: input, shape index: {}, may-alias: {11,13,17,19}]   ;;  %s5871_s12 = inlined_call_operand.vmem [shape: f32[2,1,32], index: 12, kind: input, shape index: {}, may-alias: {12,18}]   ;;  %s5872_s13 = inlined_call_operand.vmem [shape: f32[2,1,32], index: 13, kind: input, shape index: {}, may-alias: {11,13,17,19}]   ;;  %s5873_s14 = inlined_call_operand.hbm [shape: f32[2,32,128], index: 14, kind: input, shape index: {}]   ;;  %s5874_s15 = inlined_call_operand.vmem [shape: f32[2,1,128], index: 15, kind: input, shape index: {}]   ;;  %s5875_s16 = inlined_call_operand.hbm [shape: f32[2,128,32], index: 16, kind: input, shape index: {}]   ;;  %s5876_s17 = inlined_call_operand.vmem [shape: f32[2,1,32], index: 17, kind: input, shape index: {}, may-alias: {11,13,17,19}]   ;;  %s5877_s18 = inlined_call_operand.vmem [shape: f32[2,1,32], index: 18, kind: input, shape index: {}, may-alias: {12,18}]   ;;  %s5878_s19 = inlined_call_operand.vmem [shape: f32[2,1,32], index: 19, kind: input, shape index: {}, may-alias: {11,13,17,19}]   ;;  %s5879_s20 = inlined_call_operand.hbm [shape: f32[32,32], index: 20, kind: input, shape index: {}]   ;;  %s5880_s21 = inlined_call_operand.vmem [shape: f32[1,32], index: 21, kind: input, shape index: {}, may-alias: {7,21}]   ;;  %s5881_s22 = inlined_call_operand.hbm [shape: f32[16,32], index: 22, kind: output, shape index: {0}]   ;;  %s5882_s23 = inlined_call_operand.vmem [shape: f32[16,32], index: 23, kind: output, shape index: {1}]  }
   0x1   :  { %5892 = sst [smem:[#allocation19_spill]] %s5859_s0 }
   0x2   :  { %5893 = sst [smem:[#allocation20_spill]] %s5860_s1 }
   0x3   :  { %5894 = sst [smem:[#allocation21_spill]] %s5861_s2 }
   0x4   :  { %5895 = sst [smem:[#allocation22_spill]] %s5862_s3 }
   0x5   :  { %5896 = sst [smem:[#allocation23_spill]] %s5863_s4 }
   0x6   :  { %5897 = sst [smem:[#allocation24_spill]] %s5864_s5 }
   0x7   :  { %5898 = sst [smem:[#allocation25_spill]] %s5865_s6 }
   0x8   :  { %5899 = sst [smem:[#allocation26_spill]] %s5866_s7 }
   0x9   :  { %29 = vsyncpa [#allocation3], 0 }
   0xa   :  { %30 = vsyncpa [#allocation6], 0 }
   0xb   :  { %31 = vsyncpa [#allocation9], 0 }
   0xc   :  { %32 = vsyncpa [#allocation12], 0 }
   0xd   :  { %33 = vsyncpa [#allocation4], 0  ;;  %s5137_s4 = smov [#allocation5]   ;;  %s5138_s24 = smov [#allocation8]  }
   0xe   :  { %s57_s30 = sshll.u32 %s5137_s4, 4  ;;  %s97_s25 = sshll.u32 %s5138_s24, 4  ;;  %s58_s30 = int_to_ptr.vmem [resolvable:$true] %s57_s30  ;;  %s98_s25 = int_to_ptr.vmem [resolvable:$true] %s97_s25 }
   0xf   :  { %s4995_s5 = scalar_lea.vmem %s58_s30, 256  ;;  %p5000_p1 = scmp.lt.s32.totalorder %s58_s30, %s58_s30 }
  0x10   :  { %p4996_p0 = scmp.ne.s32.totalorder %s58_s30, %s4995_s5  ;;  %p5001_p2 = scmp.lt.s32.totalorder %s4995_s5, %s4995_s5 }
  0x12   :  { %p5002_p3 = por %p5001_p2, %p5000_p1 }
  0x14   :  { %p5003_p4 = pnand %p5002_p3, %p4996_p0 }
  0x16   :  { %5006 = shalt.err (!%p5003_p4)
}
  0x17   :  { %s5885_s1 = smov 128   ;;  %s5890_s26 = smov 8  }
  0x18   :  { %s5900_s27 = sld [smem:[#allocation23_spill]]  ;;  %s5015_s7 = scalar_lea.vmem %s98_s25, 1024 }
  0x19   :  { %p5016_p5 = scmp.ne.s32.totalorder %s98_s25, %s5015_s7  ;;  %p5020_p6 = scmp.lt.s32.totalorder %s98_s25, %s98_s25 }
  0x1a   :  { %p5021_p7 = scmp.lt.s32.totalorder %s5015_s7, %s5015_s7 }
  0x1c   :  { %p5022_p8 = por %p5021_p7, %p5020_p6 }
  0x1e   :  { %63 = dma.hbm_to_vmem [thread:$0]  %s5900_s27, 256, %s58_s30, [#allocation6], %s5885_s1, %s5885_s1, %s5890_s26  }
  0x1f   :  { %p5023_p9 = pnand %p5022_p8, %p5016_p5 }
  0x21   :  { %5026 = shalt.err (!%p5023_p9)
}
  0x22   :  { %103 = dma.hbm_to_vmem [thread:$0]  %s5873_s14, 1024, %s98_s25, [#allocation9], %s5885_s1, %s5885_s1, %s5890_s26  }
  0x23   :  { %s5141_s3 = smov [#allocation2]   ;;  %s5142_s4 = smov [#allocation7]  }
  0x24   :  { %s45_s0 = sshll.u32 %s5141_s3, 4  ;;  %s79_s24 = sshll.u32 %s5142_s4, 4  ;;  %s46_s0 = int_to_ptr.vmem [resolvable:$true] %s45_s0  ;;  %s80_s24 = int_to_ptr.vmem [resolvable:$true] %s79_s24 }
  0x25   :  { %s5035_s30 = scalar_lea.vmem %s46_s0, 2048  ;;  %p5040_p11 = scmp.lt.s32.totalorder %s46_s0, %s46_s0 }
  0x26   :  { %p5036_p10 = scmp.ne.s32.totalorder %s46_s0, %s5035_s30  ;;  %p5041_p12 = scmp.lt.s32.totalorder %s5035_s30, %s5035_s30 }
  0x28   :  { %p5042_p13 = por %p5041_p12, %p5040_p11 }
  0x2a   :  { %p5043_p0 = pnand %p5042_p13, %p5036_p10 }
  0x2c   :  { %5046 = shalt.err (!%p5043_p0)
}
  0x2d   :  { %s5901_s6 = sld [smem:[#allocation22_spill]]  ;;  %s5055_s14 = scalar_lea.vmem %s80_s24, 1024 }
  0x2e   :  { %p5056_p1 = scmp.ne.s32.totalorder %s80_s24, %s5055_s14  ;;  %p5060_p2 = scmp.lt.s32.totalorder %s80_s24, %s80_s24 }
  0x2f   :  { %p5061_p3 = scmp.lt.s32.totalorder %s5055_s14, %s5055_s14 }
  0x31   :  { %p5062_p4 = por %p5061_p3, %p5060_p2 }
  0x33   :  { %51 = dma.hbm_to_vmem [thread:$0]  %s5901_s6, 2048, %s46_s0, [#allocation3], %s5885_s1, %s5885_s1, %s5890_s26  }
  0x34   :  { %p5063_p5 = pnand %p5062_p4, %p5056_p1 }
  0x36   :  { %5066 = shalt.err (!%p5063_p5)
}
  0x37   :  { %85 = dma.hbm_to_vmem [thread:$0]  %s5869_s10, 1024, %s80_s24, [#allocation6], %s5885_s1, %s5885_s1, %s5890_s26  }
  0x38   :  { %s5143_s7 = smov [#allocation10]   ;;  %s5144_s29 = smov [#allocation11]  }
  0x39   :  { %s111_s28 = sshll.u32 %s5143_s7, 4  ;;  %s129_s3 = sshll.u32 %s5144_s29, 4  ;;  %s112_s28 = int_to_ptr.vmem [resolvable:$true] %s111_s28  ;;  %s130_s3 = int_to_ptr.vmem [resolvable:$true] %s129_s3 }
  0x3a   :  { %s5075_s0 = scalar_lea.vmem %s112_s28, 4096  ;;  %p5080_p7 = scmp.lt.s32.totalorder %s112_s28, %s112_s28 }
  0x3b   :  { %p5076_p6 = scmp.ne.s32.totalorder %s112_s28, %s5075_s0  ;;  %p5081_p8 = scmp.lt.s32.totalorder %s5075_s0, %s5075_s0 }
  0x3d   :  { %p5082_p9 = por %p5081_p8, %p5080_p7 }
  0x3f   :  { %p5083_p10 = pnand %p5082_p9, %p5076_p6 }
  0x41   :  { %5086 = shalt.err (!%p5083_p10)
}
  0x42   :  { %117 = dma.hbm_to_vmem [thread:$0]  %s5875_s16, 4096, %s112_s28, [#allocation9], %s5885_s1, %s5885_s1, %s5890_s26  }
  0x43   :  { %s5095_s10 = scalar_lea.vmem %s130_s3, 512  ;;  %p5100_p12 = scmp.lt.s32.totalorder %s130_s3, %s130_s3 }
  0x44   :  { %p5096_p11 = scmp.ne.s32.totalorder %s130_s3, %s5095_s10  ;;  %p5101_p13 = scmp.lt.s32.totalorder %s5095_s10, %s5095_s10 }
  0x46   :  { %p5102_p0 = por %p5101_p13, %p5100_p12 }
  0x48   :  { %p5103_p1 = pnand %p5102_p0, %p5096_p11 }
  0x4a   :  { %5106 = shalt.err (!%p5103_p1)
}
  0x4b   :  { %135 = dma.hbm_to_vmem [thread:$0]  %s5879_s20, 512, %s130_s3, [#allocation12], %s5885_s1, %s5885_s1, %s5890_s26  }
  0x4c   :  { %5127 = dma.done.wait [#allocation3], 2048  }
  0x4d   :  { %5128 = vsyncadd [#allocation3], 4294965248 }
  0x4e   :  { %5129 = dma.done.wait [#allocation6], 1280  }
  0x4f   :  { %5130 = vsyncadd [#allocation6], 4294966016 }
  0x50   :  { %5131 = dma.done.wait [#allocation9], 5120  }
  0x51   :  { %5132 = vsyncadd [#allocation9], 4294962176 }
  0x52   :  { %5133 = dma.done.wait [#allocation12], 512  }
  0x53   :  { %5134 = vsyncadd [#allocation12], 4294966784  ;;  %v5145_v0 = vmov 0   ;;  %s5902_s6 = sld [smem:[#allocation20_spill]]  ;;  %v189_v3 = vld [vmem:[#allocation2 + $0x78] sm:$0xff]  ;;  %v188_v4 = vld [vmem:[#allocation2 + $0x70] sm:$0xff]  ;;  %v160_v7 = vlaneseq }
  0x54   :  { %4890 = vset.pattern.permute.xlu1 %v5145_v0  ;;  %4889 = vset.pattern.permute.xlu0 %v5145_v0  ;;  %s5903_s27 = sld [smem:[#allocation19_spill]]  ;;  %v187_v8 = vld [vmem:[#allocation2 + $0x68] sm:$0xff]  ;;  %v186_v10 = vld [vmem:[#allocation2 + $0x60] sm:$0xff]  ;;  %v185_v15 = vld [vmem:[#allocation2 + $0x58] sm:$0xff]  ;;  %v5146_v29 = vmov 0.0   ;;  %vm279_vm0 = vcmask 64512  }
  0x55   :  { %4516 = vmatprep.subr.mxu0 %v189_v3  ;;  %v5331_v9 = vshrl.u32 %v160_v7, 7  ;;  %s5904_s4 = sld [smem:[#allocation21_spill]]  ;;  %v184_v17 = vld [vmem:[#allocation2 + $0x50] sm:$0xff]  ;;  %v183_v19 = vld [vmem:[#allocation2 + $0x48] sm:$0xff]  ;;  %v182_v20 = vld [vmem:[#allocation2 + $0x40] sm:$0xff]  ;;  %v161_v30 = vand.u32 127, %v160_v7 }
  0x56   :  { %4517 = vmatpush3.msra.mxu0 %v189_v3  ;;  %s5905_s24 = sld [smem:[#allocation24_spill]]  ;;  %v181_v21 = vld [vmem:[#allocation2 + $0x38] sm:$0xff]  ;;  %v180_v22 = vld [vmem:[#allocation2 + $0x30] sm:$0xff]  ;;  %v179_v23 = vld [vmem:[#allocation2 + $0x28] sm:$0xff]  ;;  %v5147_v33 = vmov 1.0   ;;  %vm365_vm5 = vcmask 261120  }
  0x57   :  { %4518 = vmatprep.subr.mxu0 %v188_v4  ;;  %v1272_v13 = vsub.s32 1, %v5331_v9  ;;  %v178_v24 = vld [vmem:[#allocation2 + $0x20] sm:$0xff]  ;;  %v177_v25 = vld [vmem:[#allocation2 + $0x18] sm:$0xff]  ;;  %v176_v26 = vld [vmem:[#allocation2 + $0x10] sm:$0xff]  ;;  %s5906_s29 = sld [smem:[#allocation25_spill]]  ;;  %vm5148_vm6 = vmmov 0  }
  0x58   :  { %4519 = vmatpush3.msra.mxu0 %v188_v4  ;;  %v175_v27 = vld [vmem:[#allocation2 + $0x8] sm:$0xff]  ;;  %v174_v28 = vld [vmem:[#allocation2] sm:$0xff]  ;;  %v413_v59 = vld [vmem:[%s5867_s8 + $0x18] sm:$0xff]  ;;  %s5150_s5 = smov 88   ;;  %s5151_s16 = smov 120   ;;  %vm1188_vm7 = vcmask 130048  }
  0x59   :  { %v158_v1 = vld [vmem:[%s5902_s6] sm:$0xff]  ;;  %v159_v5 = vld [vmem:[%s5902_s6 + $0x8] sm:$0xff]  ;;  %4520 = vmatprep.subr.mxu0 %v187_v8  ;;  %v412_v60 = vld [vmem:[%s5867_s8 + $0x10] sm:$0xff]  ;;  %s5152_s2 = smov 64   ;;  %s5153_s6 = smov 56   ;;  %vm1190_vm8 = vcmask 195584  }
  0x5a   :  { %v156_v2 = vld [vmem:[%s5903_s27] sm:$0xff]  ;;  %267 = vperm.xlu1 %4890, %v158_v1   ;;  %v157_v6 = vld [vmem:[%s5903_s27 + $0x8] sm:$0xff]  ;;  %4521 = vmatpush3.msra.mxu0 %v187_v8  ;;  %s5154_s14 = smov 112   ;;  %s5155_s25 = smov 80  }
  0x5b   :  { %163 = vperm.xlu0 %4889, %v156_v2   ;;  %v409_v11 = vld [vmem:[%s5904_s4] sm:$0x3]  ;;  %4522 = vmatprep.subr.mxu0 %v186_v10  ;;  %v411_v61 = vld [vmem:[%s5867_s8 + $0x8] sm:$0xff]  ;;  %s5907_s4 = sld [smem:[#allocation26_spill]]  ;;  %s5156_s27 = smov 72  }
  0x5c   :  { %v502_v12 = vsub.f32 1.0, %v409_v11  ;;  %v278_v14 = vld [vmem:[%s5905_s24] sm:$0xff]  ;;  %4523 = vmatpush3.msra.mxu0 %v186_v10  ;;  %s5149_s24 = smov 96   ;;  %s5157_s20 = smov 104  }
  0x5d   :  { %4551 = vmatprep.subr.mxu1 %v278_v14  ;;  %4524 = vmatprep.subr.mxu0 %v185_v15  ;;  %v190_v38 = vld [vmem:[#allocation5] sm:$0xff]  ;;  %s5158_s7 = smov 48   ;;  %s5159_s28 = smov 40  }
  0x5e   :  { %270 = vperm.xlu1 %4890, %v159_v5   ;;  %v5340_v16 = vmul.f32 -10000.0, %v502_v12  ;;  %4552 = vmatpush3.msra.mxu1 %v278_v14  ;;  %v410_v62 = vld [vmem:[%s5867_s8] sm:$0xff]  ;;  %s5886_s3 = smov 24  }
  0x5f   :  { %166 = vperm.xlu0 %4889, %v157_v6   ;;  %4525 = vmatpush3.msra.mxu0 %v185_v15  ;;  %v4260_v6 = vld [vmem:[%s5906_s29] ss:$0 sm:$0xff]  ;;  %s5888_s29 = smov 16  }
  0x60   :  { %v5343_v18 = vrot.slane %v5340_v16, %v1272_v13  ;;  %4526 = vmatprep.subr.mxu0 %v184_v17  ;;  %4556 = vmatprep.subr.mxu1 %v413_v59 }
  0x61   :  { %4527 = vmatpush3.msra.mxu0 %v184_v17  ;;  %v4261_v8 = vld [vmem:[%s5907_s4] ss:$0 sm:$0xff] }
  0x62   :  { %4528 = vmatprep.subr.mxu0 %v183_v19  ;;  %v4262_v17 = vld [vmem:[%s5868_s9] ss:$0 sm:$0xff] }
  0x63   :  { %4529 = vmatpush3.msra.mxu0 %v183_v19 }
  0x64   :  { %4530 = vmatprep.subr.mxu0 %v182_v20 }
  0x65   :  { %4531 = vmatpush3.msra.mxu0 %v182_v20 }
  0x66   :  { %4532 = vmatprep.subr.mxu0 %v181_v21 }
  0x67   :  { %4533 = vmatpush3.msra.mxu0 %v181_v21 }
  0x68   :  { %4534 = vmatprep.subr.mxu0 %v180_v22 }
  0x69   :  { %4535 = vmatpush3.msra.mxu0 %v180_v22 }
  0x6a   :  { %4536 = vmatprep.subr.mxu0 %v179_v23 }
  0x6b   :  { %4537 = vmatpush3.msra.mxu0 %v179_v23 }
  0x6c   :  { %4538 = vmatprep.subr.mxu0 %v178_v24 }
  0x6d   :  { %4539 = vmatpush3.msra.mxu0 %v178_v24  ;;  %v584_v24 = vsub.s32 0, %v5331_v9 }
  0x6e   :  { %4540 = vmatprep.subr.mxu0 %v177_v25 }
  0x6f   :  { %4541 = vmatpush3.msra.mxu0 %v177_v25  ;;  %v5406_v25 = vrot.slane %v5340_v16, %v584_v24 }
  0x70   :  { %4542 = vmatprep.subr.mxu0 %v176_v26 }
  0x71   :  { %4543 = vmatpush3.msra.mxu0 %v176_v26 }
  0x72   :  { %4544 = vmatprep.subr.mxu0 %v175_v27 }
  0x73   :  { %4545 = vmatpush3.msra.mxu0 %v175_v27 }
  0x74   :  { %4546 = vmatprep.subr.mxu0 %v174_v28 }
  0x75   :  { %4547 = vmatpush3.msra.mxu0 %v174_v28 }
  0x76   :  { %4607 = vmatprep.subr.mxu0 %v5146_v29 }
  0xd5   :  { %v268_v31 = vpop.permute.xlu1 %267 }
  0xd6   :  { %v164_v32 = vpop.permute.xlu0 %163  ;;  %vm272_vm2 = vcmp.eq.s32.totalorder %v268_v31, %v161_v30 }
  0xd7   :  { %vm168_vm1 = vcmp.eq.s32.totalorder %v164_v32, %v161_v30  ;;  %v4256_v34 = vsel %vm272_vm2, 1.0, %v5146_v29 }
  0xd8   :  { %4548 = vmatprep.mubr.msk.f32.mxu0 %vm168_vm1, %v5147_v33  ;;  %4553 = vmatprep.mubr.msk.f32.mxu1 %vm279_vm0, %v4256_v34 }
  0xd9   :  { %v271_v35 = vpop.permute.xlu1 %270 }
  0xda   :  { %v167_v36 = vpop.permute.xlu0 %166  ;;  %vm273_vm3 = vcmp.eq.s32.totalorder %v271_v35, %v161_v30 }
  0xdb   :  { %vm169_vm4 = vcmp.eq.s32.totalorder %v167_v36, %v161_v30  ;;  %v4257_v37 = vsel %vm273_vm3, 1.0, %v5146_v29 }
  0xdc   :  { %4549 = vmatmul.mubr.msk.f32.vlgmr.msra.gmra.mxu0 %vm169_vm4, %v5147_v33  ;;  %4554 = vmatmul.mubr.msk.f32.vlgmr.msra.gmra.mxu1 %vm279_vm0, %v4257_v37 }
  0xdd   :  { %4557 = vmatpush3.msra.mxu1 %v413_v59  ;;  %4609 = vmatprep.mubr.msk.f32.mxu0 %vm5148_vm6, %v5146_v29 }
  0xde   :  { %4558 = vmatprep.subr.mxu1 %v412_v60 }
  0xdf   :  { %4559 = vmatpush3.msra.mxu1 %v412_v60 }
  0xe0   :  { %4560 = vmatprep.subr.mxu1 %v411_v61 }
  0xe1   :  { %4561 = vmatpush3.msra.mxu1 %v411_v61 }
  0xe2   :  { %4562 = vmatprep.subr.mxu1 %v410_v62 }
  0xe3   :  { %4563 = vmatpush3.msra.mxu1 %v410_v62 }
  0xe4   :  { %4567 = vmatprep.subr.mxu1 %v5146_v29 }
 0x19c   :  { %v4550_v39 = vpop.f32.mrf.mxu0  ;;  %v4555_v41 = vpop.f32.mrf.mxu1 }
 0x19d   :  { %v263_v40 = vadd.f32 %v4550_v39, %v190_v38 }
 0x19e   :  { %v257_v42 = vpop.f32.mrf.mxu0  ;;  %v352_v45 = vpop.f32.mrf.mxu1 }
 0x19f   :  { %v362_v43 = vadd.f32 %v4555_v41, %v263_v40  ;;  %v258_v44 = vadd.f32 %v257_v42, %v190_v38 }
 0x1a1   :  { %v361_v46 = vadd.f32 %v352_v45, %v258_v44  ;;  %v369_v47 = vsel %vm365_vm5, %v362_v43, 0.0 }
 0x1a2   :  { %370 = vadd.xlane.f32.xlu1 %v369_v47 }
 0x1a3   :  { %v366_v48 = vsel %vm365_vm5, %v361_v46, 0.0 }
 0x1a4   :  { %367 = vadd.xlane.f32.xlu0 %v366_v48 }
 0x22b   :  { %v371_v49 = vpop.xlane.xlu1 %370 }
 0x22c   :  { %v374_v50 = vmul.f32 0.03125, %v371_v49 }
 0x22d   :  { %v368_v51 = vpop.xlane.xlu0 %367 }
 0x22e   :  { %v373_v52 = vmul.f32 0.03125, %v368_v51  ;;  %v376_v53 = vsub.f32 %v362_v43, %v374_v50 }
 0x230   :  { %v375_v54 = vsub.f32 %v361_v46, %v373_v52  ;;  %v378_v57 = vmul.f32 %v376_v53, %v376_v53 }
 0x232   :  { %v377_v55 = vmul.f32 %v375_v54, %v375_v54  ;;  %v382_v58 = vsel %vm365_vm5, %v378_v57, 0.0 }
 0x234   :  { %v379_v56 = vsel %vm365_vm5, %v377_v55, 0.0 }
 0x235   :  { %380 = vadd.xlane.f32.xlu0 %v379_v56 }
 0x239   :  { %383 = vadd.xlane.f32.xlu0 %v382_v58 }
 0x2be   :  { %v381_v63 = vpop.xlane.xlu0 %380 }
 0x2bf   :  { %v385_v0 = vmul.f32 0.03125, %v381_v63 }
 0x2c1   :  { %v387_v1 = vadd.f32 1e-12, %v385_v0 }
 0x2c2   :  { %v384_v2 = vpop.xlane.xlu0 %383 }
 0x2c3   :  { %4891 = vrsqrt.f32 %v387_v1  ;;  %v386_v3 = vmul.f32 0.03125, %v384_v2 }
 0x2c5   :  { %v388_v4 = vadd.f32 1e-12, %v386_v3 }
 0x2c7   :  { %4893 = vrsqrt.f32 %v388_v4 }
 0x2d0   :  { %v4892_v5 = vpop.eup %4891 }
 0x2d1   :  { %v391_v7 = vmul.f32 %v4892_v5, %v375_v54 }
 0x2d3   :  { %v399_v10 = vmul.f32 %v4260_v6, %v391_v7 }
 0x2d4   :  { %v4894_v11 = vpop.eup %4893 }
 0x2d5   :  { %v392_v12 = vmul.f32 %v4894_v11, %v376_v53  ;;  %v5373_v13 = vadd.f32 %v4261_v8, %v399_v10 }
 0x2d7   :  { %v400_v14 = vmul.f32 %v4260_v6, %v392_v12  ;;  %4564 = vmatprep.mubr.msk.f32.mxu1 %vm365_vm5, %v5373_v13 }
 0x2d9   :  { %v5377_v15 = vadd.f32 %v4261_v8, %v400_v14 }
 0x2db   :  { %4565 = vmatmul.mubr.msk.f32.vlgmr.msra.gmra.mxu1 %vm365_vm5, %v5377_v15 }
 0x2dc   :  { %4569 = vmatprep.mubr.msk.f32.mxu1 %vm5148_vm6, %v5146_v29 }
 0x39b   :  { %v4566_v19 = vpop.f32.mrf.mxu1 }
 0x39c   :  { %v5388_v20 = vadd.f32 %v4566_v19, %v4262_v17 }
 0x39d   :  { %v493_v21 = vpop.f32.mrf.mxu1 }
 0x39e   :  { %v5390_v22 = vadd.f32 %v4262_v17, %v493_v21 }
 0x3a0   :  { %505 = vrot.lane.b32.xlu1 %v5390_v22, %s5149_s24 }
 0x3a4   :  { %676 = vrot.lane.b32.xlu1 %v5390_v22, %s5150_s5 }
 0x3a8   :  { %674 = vrot.lane.b32.xlu1 %v5390_v22, %s5151_s16 }
 0x412   :  { %v506_v23 = vpop.permute.xlu1 %505 }
 0x413   :  { %4568 = vmatpush3.xpose.msk.msra.mxu1 %vm279_vm0, %v506_v23 }
 0x414   :  { %4572 = vmatprep.subr.mxu1 %v5146_v29 }
 0x416   :  { %4570 = vmatmul.mubr.msk.f32.vlgmr.msra.gmra.mxu1 %vm279_vm0, %v5390_v22  ;;  %v677_v38 = vpop.permute.xlu1 %676 }
 0x417   :  { %4574 = vmatprep.mubr.msk.f32.mxu1 %vm5148_vm6, %v5146_v29 }
 0x41a   :  { %v675_v40 = vpop.permute.xlu1 %674 }
 0x4d6   :  { %v577_v26 = vpop.f32.mrf.mxu1 }
 0x4d7   :  { %v581_v27 = vmul.f32 0.35355338, %v577_v26 }
 0x4d8   :  { %v4571_v28 = vpop.f32.mrf.mxu1 }
 0x4d9   :  { %v586_v30 = vadd.f32 %v5406_v25, %v581_v27 }
 0x4db   :  { %v587_v31 = vsel %vm279_vm0, %v586_v30, -inf }
 0x4dc   :  { %588 = vmax.xlane.f32.xlu0 %v587_v31 }
 0x565   :  { %v589_v32 = vpop.xlane.xlu0 %588 }
 0x566   :  { %v590_v33 = vsub.f32 %v586_v30, %v589_v32 }
 0x568   :  { %v591_v34 = vmul.f32 1.442695, %v590_v33 }
 0x56a   :  { %4895 = vpow2.f32 %v591_v34 }
 0x577   :  { %v4896_v35 = vpop.eup %4895 }
 0x578   :  { %v593_v36 = vsel %vm279_vm0, %v4896_v35, 0.0 }
 0x579   :  { %594 = vadd.xlane.f32.xlu0 %v593_v36 }
 0x58f   :  { %598 = vrot.lane.b32.xlu0 %v5390_v22, %s5152_s2 }
 0x602   :  { %v595_v9 = vpop.xlane.xlu0 %594 }
 0x603   :  { %4897 = vrcp.f32 %v595_v9 }
 0x606   :  { %v599_v16 = vpop.permute.xlu0 %598 }
 0x607   :  { %4573 = vmatpush3.msra.mxu1 %v599_v16 }
 0x608   :  { %4577 = vmatprep.subr.mxu1 %v5146_v29 }
 0x610   :  { %v4898_v37 = vpop.eup %4897 }
 0x611   :  { %v597_v39 = vmul.f32 %v4898_v37, %v4896_v35 }
 0x613   :  { %4575 = vmatmul.mubr.msk.f32.vlgmr.msra.gmra.mxu1 %vm279_vm0, %v597_v39 }
 0x614   :  { %4578 = vmatpush3.xpose.msk.msra.mxu1 %vm279_vm0, %v677_v38  ;;  %4579 = vmatprep.mubr.msk.f32.mxu1 %vm5148_vm6, %v5146_v29 }
 0x615   :  { %4582 = vmatprep.subr.mxu1 %v5146_v29 }
 0x617   :  { %4580 = vmatmul.mubr.msk.f32.vlgmr.msra.gmra.mxu1 %vm279_vm0, %v675_v40 }
 0x618   :  { %4584 = vmatprep.mubr.msk.f32.mxu1 %vm5148_vm6, %v5146_v29 }
 0x6d3   :  { %v5422_v41 = vpop.f32.mrf.mxu1 }
 0x6d5   :  { %v4576_v42 = vpop.f32.mrf.mxu1 }
 0x6d7   :  { %v748_v43 = vpop.f32.mrf.mxu1 }
 0x6d8   :  { %v752_v44 = vmul.f32 0.35355338, %v748_v43 }
 0x6d9   :  { %v4581_v45 = vpop.f32.mrf.mxu1 }
 0x6da   :  { %v753_v46 = vadd.f32 %v752_v44, %v5406_v25 }
 0x6dc   :  { %v754_v47 = vsel %vm279_vm0, %v753_v46, -inf }
 0x6dd   :  { %755 = vmax.xlane.f32.xlu1 %v754_v47 }
 0x6ee   :  { %765 = vrot.lane.b32.xlu1 %v5390_v22, %s5153_s6 }
 0x6f2   :  { %841 = vrot.lane.b32.xlu1 %v5390_v22, %s5154_s14 }
 0x766   :  { %v756_v48 = vpop.xlane.xlu1 %755 }
 0x767   :  { %v757_v49 = vsub.f32 %v753_v46, %v756_v48 }
 0x769   :  { %v758_v50 = vmul.f32 1.442695, %v757_v49 }
 0x76a   :  { %v766_v51 = vpop.permute.xlu1 %765 }
 0x76b   :  { %4899 = vpow2.f32 %v758_v50  ;;  %4583 = vmatpush3.msra.mxu1 %v766_v51 }
 0x76c   :  { %4587 = vmatprep.subr.mxu1 %v5146_v29 }
 0x76e   :  { %v842_v58 = vpop.permute.xlu1 %841 }
 0x778   :  { %v4900_v52 = vpop.eup %4899 }
 0x779   :  { %v760_v53 = vsel %vm279_vm0, %v4900_v52, 0.0 }
 0x77a   :  { %761 = vadd.xlane.f32.xlu0 %v760_v53 }
 0x790   :  { %843 = vrot.lane.b32.xlu0 %v5390_v22, %s5155_s25 }
 0x803   :  { %v762_v54 = vpop.xlane.xlu0 %761 }
 0x804   :  { %4901 = vrcp.f32 %v762_v54 }
 0x807   :  { %v844_v57 = vpop.permute.xlu0 %843 }
 0x811   :  { %v4902_v55 = vpop.eup %4901 }
 0x812   :  { %v764_v56 = vmul.f32 %v4902_v55, %v4900_v52 }
 0x814   :  { %4585 = vmatmul.mubr.msk.f32.vlgmr.msra.gmra.mxu1 %vm279_vm0, %v764_v56 }
 0x815   :  { %4588 = vmatpush3.xpose.msk.msra.mxu1 %vm279_vm0, %v844_v57  ;;  %4589 = vmatprep.mubr.msk.f32.mxu1 %vm5148_vm6, %v5146_v29 }
 0x816   :  { %4592 = vmatprep.subr.mxu1 %v5146_v29 }
 0x818   :  { %4590 = vmatmul.mubr.msk.f32.vlgmr.msra.gmra.mxu1 %vm279_vm0, %v842_v58 }
 0x819   :  { %4594 = vmatprep.mubr.msk.f32.mxu1 %vm5148_vm6, %v5146_v29 }
 0x8d4   :  { %v5442_v59 = vpop.f32.mrf.mxu1 }
 0x8d6   :  { %v4586_v60 = vpop.f32.mrf.mxu1 }
 0x8d8   :  { %v915_v61 = vpop.f32.mrf.mxu1 }
 0x8d9   :  { %v919_v62 = vmul.f32 0.35355338, %v915_v61 }
 0x8da   :  { %v4591_v63 = vpop.f32.mrf.mxu1 }
 0x8db   :  { %v920_v0 = vadd.f32 %v919_v62, %v5406_v25 }
 0x8dd   :  { %v921_v1 = vsel %vm279_vm0, %v920_v0, -inf }
 0x8de   :  { %922 = vmax.xlane.f32.xlu1 %v921_v1 }
 0x8ef   :  { %1010 = vrot.lane.b32.xlu1 %v5390_v22, %s5156_s27 }
 0x8f3   :  { %1008 = vrot.lane.b32.xlu1 %v5390_v22, %s5157_s20 }
 0x8f7   :  { %1364 = vrot.lane.b32.xlu1 %v5388_v20, %s5150_s5 }
 0x8fb   :  { %1531 = vrot.lane.b32.xlu1 %v5388_v20, %s5155_s25 }
 0x8ff   :  { %1698 = vrot.lane.b32.xlu1 %v5388_v20, %s5156_s27 }
 0x967   :  { %v923_v2 = vpop.xlane.xlu1 %922 }
 0x968   :  { %v924_v3 = vsub.f32 %v920_v0, %v923_v2 }
 0x96a   :  { %v925_v4 = vmul.f32 1.442695, %v924_v3 }
 0x96b   :  { %v1011_v7 = vpop.permute.xlu1 %1010 }
 0x96c   :  { %4903 = vpow2.f32 %v925_v4 }
 0x96f   :  { %v1009_v10 = vpop.permute.xlu1 %1008 }
 0x973   :  { %v1365_v12 = vpop.permute.xlu1 %1364 }
 0x977   :  { %v1532_v21 = vpop.permute.xlu1 %1531 }
 0x979   :  { %v4904_v5 = vpop.eup %4903 }
 0x97a   :  { %v927_v6 = vsel %vm279_vm0, %v4904_v5, 0.0 }
 0x97b   :  { %928 = vadd.xlane.f32.xlu0 %v927_v6  ;;  %v1699_v26 = vpop.permute.xlu1 %1698 }
 0x991   :  { %932 = vrot.lane.b32.xlu0 %v5390_v22, %s5158_s7 }
 0x995   :  { %1193 = vrot.lane.b32.xlu0 %v5388_v20, %s5149_s24 }
 0x999   :  { %1362 = vrot.lane.b32.xlu0 %v5388_v20, %s5151_s16 }
 0x99d   :  { %1529 = vrot.lane.b32.xlu0 %v5388_v20, %s5154_s14 }
 0x9a1   :  { %1696 = vrot.lane.b32.xlu0 %v5388_v20, %s5157_s20 }
 0xa04   :  { %v929_v8 = vpop.xlane.xlu0 %928 }
 0xa05   :  { %4905 = vrcp.f32 %v929_v8 }
 0xa08   :  { %v933_v11 = vpop.permute.xlu0 %932 }
 0xa09   :  { %4593 = vmatpush3.msra.mxu1 %v933_v11 }
 0xa0a   :  { %4597 = vmatprep.subr.mxu1 %v5146_v29 }
 0xa0c   :  { %v1194_v14 = vpop.permute.xlu0 %1193 }
 0xa0d   :  { %4608 = vmatpush3.xpose.msk.msra.mxu0 %vm279_vm0, %v1194_v14 }
 0xa0e   :  { %4617 = vmatprep.subr.mxu0 %v5146_v29 }
 0xa10   :  { %4610 = vmatmul.mubr.msk.f32.vlgmr.msra.gmra.mxu0 %vm279_vm0, %v5388_v20  ;;  %v1363_v17 = vpop.permute.xlu0 %1362 }
 0xa11   :  { %4618 = vmatpush3.xpose.msk.msra.mxu0 %vm279_vm0, %v1365_v12  ;;  %4619 = vmatprep.mubr.msk.f32.mxu0 %vm5148_vm6, %v5146_v29 }
 0xa12   :  { %v4906_v19 = vpop.eup %4905  ;;  %4627 = vmatprep.subr.mxu0 %v5146_v29 }
 0xa13   :  { %v931_v23 = vmul.f32 %v4906_v19, %v4904_v5 }
 0xa14   :  { %4620 = vmatmul.mubr.msk.f32.vlgmr.msra.gmra.mxu0 %vm279_vm0, %v1363_v17  ;;  %v1530_v24 = vpop.permute.xlu0 %1529 }
 0xa15   :  { %4595 = vmatmul.mubr.msk.f32.vlgmr.msra.gmra.mxu1 %vm279_vm0, %v931_v23  ;;  %4628 = vmatpush3.xpose.msk.msra.mxu0 %vm279_vm0, %v1532_v21 }
 0xa16   :  { %4598 = vmatpush3.xpose.msk.msra.mxu1 %vm279_vm0, %v1011_v7  ;;  %4629 = vmatprep.mubr.msk.f32.mxu0 %vm5148_vm6, %v5146_v29 }
 0xa17   :  { %4599 = vmatprep.mubr.msk.f32.mxu1 %vm5148_vm6, %v5146_v29  ;;  %4637 = vmatprep.subr.mxu0 %v5146_v29 }
 0xa18   :  { %4630 = vmatmul.mubr.msk.f32.vlgmr.msra.gmra.mxu0 %vm279_vm0, %v1530_v24  ;;  %4602 = vmatprep.subr.mxu1 %v5146_v29  ;;  %v1697_v27 = vpop.permute.xlu0 %1696 }
 0xa19   :  { %4600 = vmatmul.mubr.msk.f32.vlgmr.msra.gmra.mxu1 %vm279_vm0, %v1009_v10  ;;  %4638 = vmatpush3.xpose.msk.msra.mxu0 %vm279_vm0, %v1699_v26 }
 0xa1a   :  { %4639 = vmatprep.mubr.msk.f32.mxu0 %vm5148_vm6, %v5146_v29  ;;  %4604 = vmatprep.mubr.msk.f32.mxu1 %vm5148_vm6, %v5146_v29 }
 0xa1c   :  { %4640 = vmatmul.mubr.msk.f32.vlgmr.msra.gmra.mxu0 %vm279_vm0, %v1697_v27 }
 0xad0   :  { %v1265_v28 = vpop.f32.mrf.mxu0 }
 0xad1   :  { %v1269_v30 = vmul.f32 0.35355338, %v1265_v28 }
 0xad2   :  { %v4611_v31 = vpop.f32.mrf.mxu0 }
 0xad3   :  { %v1274_v32 = vadd.f32 %v5343_v18, %v1269_v30 }
 0xad4   :  { %v1436_v33 = vpop.f32.mrf.mxu0 }
 0xad5   :  { %v1440_v34 = vmul.f32 0.35355338, %v1436_v33  ;;  %v5495_v35 = vpop.f32.mrf.mxu1  ;;  %v1275_v36 = vsel %vm279_vm0, %v1274_v32, -inf }
 0xad6   :  { %1276 = vmax.xlane.f32.xlu0 %v1275_v36  ;;  %v4621_v9 = vpop.f32.mrf.mxu0 }
 0xad7   :  { %v4596_v16 = vpop.f32.mrf.mxu1  ;;  %v1441_v37 = vadd.f32 %v1440_v34, %v5343_v18 }
 0xad8   :  { %v1603_v38 = vpop.f32.mrf.mxu0 }
 0xad9   :  { %v1082_v39 = vpop.f32.mrf.mxu1  ;;  %v1442_v40 = vsel %vm279_vm0, %v1441_v37, -inf  ;;  %v1607_v42 = vmul.f32 0.35355338, %v1603_v38 }
 0xada   :  { %v1086_v43 = vmul.f32 0.35355338, %v1082_v39  ;;  %1443 = vmax.xlane.f32.xlu0 %v1442_v40  ;;  %v4631_v44 = vpop.f32.mrf.mxu0 }
 0xadb   :  { %v4601_v45 = vpop.f32.mrf.mxu1  ;;  %v1608_v51 = vadd.f32 %v1607_v42, %v5343_v18  ;;  %v1881_v42 = vld [vmem:[#allocation7 + $0x18] sm:$0xff] }
 0xadc   :  { %v1770_v46 = vpop.f32.mrf.mxu0  ;;  %v1087_v47 = vadd.f32 %v1086_v43, %v5406_v25  ;;  %v1880_v43 = vld [vmem:[#allocation7 + $0x10] sm:$0xff]  ;;  %v1879_v45 = vld [vmem:[#allocation7 + $0x8] sm:$0xff] }
 0xadd   :  { %v1774_v48 = vmul.f32 0.35355338, %v1770_v46  ;;  %v1609_v54 = vsel %vm279_vm0, %v1608_v51, -inf  ;;  %v1878_v46 = vld [vmem:[#allocation7] sm:$0xff] }
 0xade   :  { %v4641_v49 = vpop.f32.mrf.mxu0  ;;  %v1088_v50 = vsel %vm279_vm0, %v1087_v47, -inf }
 0xadf   :  { %1089 = vmax.xlane.f32.xlu1 %v1088_v50  ;;  %v1775_v52 = vadd.f32 %v1774_v48, %v5343_v18 }
 0xae1   :  { %v1776_v53 = vsel %vm279_vm0, %v1775_v52, -inf }
 0xae2   :  { %1777 = vmax.xlane.f32.xlu0 %v1776_v53 }
 0xae3   :  { %1610 = vmax.xlane.f32.xlu1 %v1609_v54 }
 0xb5f   :  { %v1277_v55 = vpop.xlane.xlu0 %1276 }
 0xb60   :  { %v1278_v56 = vsub.f32 %v1274_v32, %v1277_v55 }
 0xb62   :  { %v1279_v57 = vmul.f32 1.442695, %v1278_v56 }
 0xb63   :  { %v1444_v58 = vpop.xlane.xlu0 %1443 }
 0xb64   :  { %4907 = vpow2.f32 %v1279_v57  ;;  %v1445_v60 = vsub.f32 %v1441_v37, %v1444_v58 }
 0xb66   :  { %v1446_v61 = vmul.f32 1.442695, %v1445_v60 }
 0xb68   :  { %4909 = vpow2.f32 %v1446_v61  ;;  %v1090_v62 = vpop.xlane.xlu1 %1089 }
 0xb69   :  { %v1091_v17 = vsub.f32 %v1087_v47, %v1090_v62 }
 0xb6b   :  { %v1778_v63 = vpop.xlane.xlu0 %1777  ;;  %v1092_v19 = vmul.f32 1.442695, %v1091_v17 }
 0xb6c   :  { %v1779_v0 = vsub.f32 %v1775_v52, %v1778_v63  ;;  %v1611_v1 = vpop.xlane.xlu1 %1610 }
 0xb6d   :  { %v1612_v2 = vsub.f32 %v1608_v51, %v1611_v1 }
 0xb6e   :  { %v1780_v3 = vmul.f32 1.442695, %v1779_v0 }
 0xb6f   :  { %v1613_v4 = vmul.f32 1.442695, %v1612_v2 }
 0xb70   :  { %4911 = vpow2.f32 %v1780_v3 }
 0xb71   :  { %v4908_v5 = vpop.eup %4907  ;;  %4913 = vpow2.f32 %v1613_v4 }
 0xb72   :  { %v1281_v6 = vsel %vm279_vm0, %v4908_v5, 0.0  ;;  %4915 = vpow2.f32 %v1092_v19 }
 0xb73   :  { %1282 = vadd.xlane.f32.xlu0 %v1281_v6 }
 0xb75   :  { %v4910_v7 = vpop.eup %4909 }
 0xb76   :  { %v1448_v8 = vsel %vm279_vm0, %v4910_v7, 0.0 }
 0xb77   :  { %1449 = vadd.xlane.f32.xlu1 %v1448_v8 }
 0xb7d   :  { %v4912_v10 = vpop.eup %4911 }
 0xb7e   :  { %v4914_v11 = vpop.eup %4913  ;;  %v1782_v12 = vsel %vm279_vm0, %v4912_v10, 0.0 }
 0xb7f   :  { %1783 = vadd.xlane.f32.xlu1 %v1782_v12  ;;  %v1615_v14 = vsel %vm279_vm0, %v4914_v11, 0.0  ;;  %v4916_v21 = vpop.eup %4915 }
 0xb80   :  { %1616 = vadd.xlane.f32.xlu0 %v1615_v14  ;;  %v1094_v23 = vsel %vm279_vm0, %v4916_v21, 0.0 }
 0xb90   :  { %1286 = vrot.lane.b32.xlu1 %v5388_v20, %s5152_s2 }
 0xb96   :  { %1099 = vrot.lane.b32.xlu0 %v5390_v22, %s5159_s28 }
 0xb9a   :  { %1620 = vrot.lane.b32.xlu0 %v5388_v20, %s5158_s7 }
 0xb9e   :  { %1176 = vrot.lane.b32.xlu0 %v5442_v59, %s5890_s26 }
 0xbb4   :  { %1095 = vadd.xlane.f32.xlu1 %v1094_v23 }
 0xbc5   :  { %1453 = vrot.lane.b32.xlu1 %v5388_v20, %s5153_s6 }
 0xbc9   :  { %1787 = vrot.lane.b32.xlu1 %v5388_v20, %s5159_s28 }
 0xbcd   :  { %1180 = vrot.lane.b32.xlu1 %v5495_v35, %s5888_s29 }
 0xbfc   :  { %v1283_v22 = vpop.xlane.xlu0 %1282 }
 0xc00   :  { %v1450_v59 = vpop.xlane.xlu1 %1449 }
 0xc08   :  { %v1784_v27 = vpop.xlane.xlu1 %1783 }
 0xc09   :  { %v1617_v24 = vpop.xlane.xlu0 %1616 }
 0xc0c   :  { %v1287_v28 = vpop.permute.xlu1 %1286 }
 0xc0d   :  { %v1100_v26 = vpop.permute.xlu0 %1099 }
 0xc0e   :  { %4603 = vmatpush3.msra.mxu1 %v1100_v26 }
 0xc0f   :  { %4612 = vmatprep.subr.mxu1 %v5146_v29 }
 0xc11   :  { %v1621_v16 = vpop.permute.xlu0 %1620 }
 0xc15   :  { %v1177_v56 = vpop.permute.xlu0 %1176 }
 0xc16   :  { %v1187_v58 = vsel %vm279_vm0, %v5422_v41, %v1177_v56  ;;  %v4289_v41 = vld [vmem:[%s5870_s11] ss:$0 sm:$0xff]  ;;  %v2131_v56 = vld [vmem:[#allocation10 + $0x28] sm:$0xff] }
 0xc3d   :  { %v1096_v30 = vpop.xlane.xlu1 %1095 }
 0xc3e   :  { %4917 = vrcp.f32 %v1096_v30  ;;  %v2017_v30 = vld [vmem:[#allocation8 + $0x8] sm:$0xff] }
 0xc3f   :  { %4919 = vrcp.f32 %v1283_v22 }
 0xc40   :  { %4921 = vrcp.f32 %v1450_v59 }
 0xc41   :  { %4923 = vrcp.f32 %v1617_v24  ;;  %v1454_v35 = vpop.permute.xlu1 %1453 }
 0xc42   :  { %4925 = vrcp.f32 %v1784_v27 }
 0xc45   :  { %v1788_v39 = vpop.permute.xlu1 %1787 }
 0xc49   :  { %v1181_v57 = vpop.permute.xlu1 %1180 }
 0xc4a   :  { %v1189_v60 = vsel %vm1188_vm7, %v1187_v58, %v1181_v57  ;;  %v2130_v57 = vld [vmem:[#allocation10 + $0x20] sm:$0xff]  ;;  %v2129_v58 = vld [vmem:[#allocation10 + $0x18] sm:$0xff] }
 0xc4b   :  { %v4918_v31 = vpop.eup %4917 }
 0xc4c   :  { %v1098_v20 = vmul.f32 %v4918_v31, %v4916_v21  ;;  %v4920_v32 = vpop.eup %4919  ;;  %v2016_v31 = vld [vmem:[#allocation8] sm:$0xff] }
 0xc4d   :  { %v1285_v33 = vmul.f32 %v4920_v32, %v4908_v5  ;;  %v4922_v34 = vpop.eup %4921 }
 0xc4e   :  { %4605 = vmatmul.mubr.msk.f32.vlgmr.msra.gmra.mxu1 %vm279_vm0, %v1098_v20  ;;  %v1452_v36 = vmul.f32 %v4922_v34, %v4910_v7  ;;  %v4924_v9 = vpop.eup %4923 }
 0xc4f   :  { %4613 = vmatpush3.msra.mxu1 %v1287_v28  ;;  %4614 = vmatprep.mubr.msk.f32.mxu1 %vm5148_vm6, %v5146_v29  ;;  %v1619_v37 = vmul.f32 %v4924_v9, %v4914_v11  ;;  %v4926_v38 = vpop.eup %4925  ;;  %v2019_v28 = vld [vmem:[#allocation8 + $0x18] sm:$0xff] }
 0xc50   :  { %4622 = vmatprep.subr.mxu1 %v5146_v29  ;;  %v1786_v40 = vmul.f32 %v4926_v38, %v4912_v10  ;;  %v4293_v38 = vld [vmem:[%s5872_s13] ss:$0 sm:$0xff] }
 0xc52   :  { %4615 = vmatmul.mubr.msk.f32.vlgmr.msra.gmra.mxu1 %vm279_vm0, %v1285_v33 }
 0xc53   :  { %4623 = vmatpush3.msra.mxu1 %v1454_v35  ;;  %4624 = vmatprep.mubr.msk.f32.mxu1 %vm5148_vm6, %v5146_v29 }
 0xc54   :  { %4632 = vmatprep.subr.mxu1 %v5146_v29 }
 0xc56   :  { %4625 = vmatmul.mubr.msk.f32.vlgmr.msra.gmra.mxu1 %vm279_vm0, %v1452_v36 }
 0xc57   :  { %4633 = vmatpush3.msra.mxu1 %v1621_v16  ;;  %4634 = vmatprep.mubr.msk.f32.mxu1 %vm5148_vm6, %v5146_v29  ;;  %v4292_v16 = vld [vmem:[%s5871_s12] ss:$0 sm:$0xff] }
 0xc58   :  { %4642 = vmatprep.subr.mxu1 %v5146_v29 }
 0xc5a   :  { %4635 = vmatmul.mubr.msk.f32.vlgmr.msra.gmra.mxu1 %vm279_vm0, %v1619_v37 }
 0xc5b   :  { %4643 = vmatpush3.msra.mxu1 %v1788_v39  ;;  %4644 = vmatprep.mubr.msk.f32.mxu1 %vm5148_vm6, %v5146_v29 }
 0xc5c   :  { %4647 = vmatprep.subr.mxu1 %v1881_v42 }
 0xc5e   :  { %4645 = vmatmul.mubr.msk.f32.vlgmr.msra.gmra.mxu1 %vm279_vm0, %v1786_v40 }
 0xc5f   :  { %4648 = vmatpush3.msra.mxu1 %v1881_v42 }
 0xc60   :  { %4649 = vmatprep.subr.mxu1 %v1880_v43 }
 0xc61   :  { %4650 = vmatpush3.msra.mxu1 %v1880_v43 }
 0xc62   :  { %4651 = vmatprep.subr.mxu1 %v1879_v45 }
 0xc63   :  { %4652 = vmatpush3.msra.mxu1 %v1879_v45 }
 0xc64   :  { %4653 = vmatprep.subr.mxu1 %v1878_v46 }
 0xc65   :  { %4654 = vmatpush3.msra.mxu1 %v1878_v46  ;;  %v2141_v46 = vld [vmem:[#allocation10 + $0x78] sm:$0xff] }
 0xc66   :  { %4658 = vmatprep.subr.mxu1 %v2019_v28  ;;  %4669 = vmatprep.subr.mxu0 %v2141_v46 }
 0xc67   :  { %4670 = vmatpush3.msra.mxu0 %v2141_v46  ;;  %v4300_v46 = vld [vmem:[%s5867_s8 + $0x20] sm:$0xff] }
 0xd0e   :  { %v1171_v44 = vpop.f32.mrf.mxu1 }
 0xd0f   :  { %1184 = vrot.lane.b32.xlu1 %v1171_v44, %s5886_s3 }
 0xd10   :  { %v4606_v47 = vpop.f32.mrf.mxu1 }
 0xd11   :  { %v2140_v47 = vld [vmem:[#allocation10 + $0x70] sm:$0xff] }
 0xd12   :  { %v1358_v48 = vpop.f32.mrf.mxu1  ;;  %4671 = vmatprep.subr.mxu0 %v2140_v47 }
 0xd13   :  { %4672 = vmatpush3.msra.mxu0 %v2140_v47 }
 0xd14   :  { %v4616_v49 = vpop.f32.mrf.mxu1 }
 0xd15   :  { %v2138_v49 = vld [vmem:[#allocation10 + $0x60] sm:$0xff] }
 0xd16   :  { %v1525_v50 = vpop.f32.mrf.mxu1 }
 0xd17   :  { %1864 = vrot.lane.b32.xlu0 %v1525_v50, %s5890_s26  ;;  %v2137_v50 = vld [vmem:[#allocation10 + $0x58] sm:$0xff] }
 0xd18   :  { %v4626_v51 = vpop.f32.mrf.mxu1 }
 0xd19   :  { %v2136_v51 = vld [vmem:[#allocation10 + $0x50] sm:$0xff] }
 0xd1a   :  { %v1692_v52 = vpop.f32.mrf.mxu1 }
 0xd1b   :  { %1868 = vrot.lane.b32.xlu0 %v1692_v52, %s5888_s29  ;;  %v2135_v52 = vld [vmem:[#allocation10 + $0x48] sm:$0xff] }
 0xd1c   :  { %v4636_v53 = vpop.f32.mrf.mxu1 }
 0xd1d   :  { %v2134_v53 = vld [vmem:[#allocation10 + $0x40] sm:$0xff] }
 0xd1e   :  { %v1859_v54 = vpop.f32.mrf.mxu1 }
 0xd1f   :  { %1872 = vrot.lane.b32.xlu1 %v1859_v54, %s5886_s3  ;;  %v2133_v54 = vld [vmem:[#allocation10 + $0x38] sm:$0xff] }
 0xd20   :  { %v4646_v55 = vpop.f32.mrf.mxu1 }
 0xd21   :  { %v2132_v55 = vld [vmem:[#allocation10 + $0x30] sm:$0xff] }
 0xd81   :  { %v1185_v61 = vpop.permute.xlu1 %1184 }
 0xd82   :  { %v1191_v62 = vsel %vm1190_vm8, %v1189_v60, %v1185_v61  ;;  %v2128_v60 = vld [vmem:[#allocation10 + $0x10] sm:$0xff]  ;;  %v2127_v61 = vld [vmem:[#allocation10 + $0x8] sm:$0xff] }
 0xd83   :  { %4655 = vmatprep.mubr.msk.f32.mxu1 %vm365_vm5, %v1191_v62  ;;  %v2126_v62 = vld [vmem:[#allocation10] sm:$0xff] }
 0xd89   :  { %v1865_v63 = vpop.permute.xlu0 %1864 }
 0xd8a   :  { %v1875_v1 = vsel %vm279_vm0, %v1358_v48, %v1865_v63  ;;  %v2139_v48 = vld [vmem:[#allocation10 + $0x68] sm:$0xff]  ;;  %v4294_v63 = vld [vmem:[%s5874_s15] ss:$0 sm:$0xff] }
 0xd8b   :  { %4673 = vmatprep.subr.mxu0 %v2139_v48 }
 0xd8c   :  { %4674 = vmatpush3.msra.mxu0 %v2139_v48 }
 0xd8d   :  { %v1869_v0 = vpop.permute.xlu0 %1868  ;;  %4675 = vmatprep.subr.mxu0 %v2138_v49 }
 0xd8e   :  { %v1876_v2 = vsel %vm1188_vm7, %v1875_v1, %v1869_v0  ;;  %4676 = vmatpush3.msra.mxu0 %v2138_v49 }
 0xd8f   :  { %4677 = vmatprep.subr.mxu0 %v2137_v50 }
 0xd90   :  { %4678 = vmatpush3.msra.mxu0 %v2137_v50 }
 0xd91   :  { %v1873_v3 = vpop.permute.xlu1 %1872  ;;  %4679 = vmatprep.subr.mxu0 %v2136_v51 }
 0xd92   :  { %v1877_v4 = vsel %vm1190_vm8, %v1876_v2, %v1873_v3  ;;  %4680 = vmatpush3.msra.mxu0 %v2136_v51 }
 0xd93   :  { %4656 = vmatmul.mubr.msk.f32.vlgmr.msra.gmra.mxu1 %vm365_vm5, %v1877_v4  ;;  %4681 = vmatprep.subr.mxu0 %v2135_v52 }
 0xd94   :  { %4659 = vmatpush3.msra.mxu1 %v2019_v28  ;;  %4682 = vmatpush3.msra.mxu0 %v2135_v52 }
 0xd95   :  { %4683 = vmatprep.subr.mxu0 %v2134_v53 }
 0xd96   :  { %4684 = vmatpush3.msra.mxu0 %v2134_v53 }
 0xd97   :  { %4685 = vmatprep.subr.mxu0 %v2133_v54 }
 0xd98   :  { %4686 = vmatpush3.msra.mxu0 %v2133_v54  ;;  %v4298_v54 = vld [vmem:[%s5877_s18] ss:$0 sm:$0xff] }
 0xd99   :  { %4687 = vmatprep.subr.mxu0 %v2132_v55 }
 0xd9a   :  { %4688 = vmatpush3.msra.mxu0 %v2132_v55 }
 0xd9b   :  { %4689 = vmatprep.subr.mxu0 %v2131_v56 }
 0xd9c   :  { %4690 = vmatpush3.msra.mxu0 %v2131_v56 }
 0xd9d   :  { %4691 = vmatprep.subr.mxu0 %v2130_v57 }
 0xd9e   :  { %4692 = vmatpush3.msra.mxu0 %v2130_v57 }
 0xd9f   :  { %4693 = vmatprep.subr.mxu0 %v2129_v58 }
 0xda0   :  { %4694 = vmatpush3.msra.mxu0 %v2129_v58 }
 0xda1   :  { %4695 = vmatprep.subr.mxu0 %v2128_v60 }
 0xda2   :  { %4696 = vmatpush3.msra.mxu0 %v2128_v60  ;;  %v4299_v60 = vld [vmem:[%s5878_s19] ss:$0 sm:$0xff] }
 0xda3   :  { %4697 = vmatprep.subr.mxu0 %v2127_v61 }
 0xda4   :  { %4698 = vmatpush3.msra.mxu0 %v2127_v61 }
 0xda5   :  { %4699 = vmatprep.subr.mxu0 %v2126_v62 }
 0xda6   :  { %4700 = vmatpush3.msra.mxu0 %v2126_v62 }
 0xda7   :  { %4745 = vmatprep.subr.mxu0 %v5146_v29 }
 0xe53   :  { %v4657_v5 = vpop.f32.mrf.mxu1 }
 0xe54   :  { %v1967_v6 = vadd.f32 %v4657_v5, %v4289_v41 }
 0xe55   :  { %v1961_v7 = vpop.f32.mrf.mxu1 }
 0xe56   :  { %v1962_v8 = vadd.f32 %v4289_v41, %v1961_v7  ;;  %v1971_v10 = vadd.f32 %v1967_v6, %v5377_v15 }
 0xe58   :  { %v1977_v11 = vsel %vm365_vm5, %v1971_v10, 0.0  ;;  %v1970_v12 = vadd.f32 %v1962_v8, %v5373_v13  ;;  %v2018_v13 = vld [vmem:[#allocation8 + $0x10] sm:$0xff] }
 0xe59   :  { %1978 = vadd.xlane.f32.xlu1 %v1977_v11  ;;  %4660 = vmatprep.subr.mxu1 %v2018_v13 }
 0xe5a   :  { %v1974_v14 = vsel %vm365_vm5, %v1970_v12, 0.0  ;;  %4661 = vmatpush3.msra.mxu1 %v2018_v13 }
 0xe5b   :  { %1975 = vadd.xlane.f32.xlu0 %v1974_v14  ;;  %4662 = vmatprep.subr.mxu1 %v2017_v30 }
 0xe5c   :  { %4663 = vmatpush3.msra.mxu1 %v2017_v30 }
 0xe5d   :  { %4664 = vmatprep.subr.mxu1 %v2016_v31 }
 0xe5e   :  { %4665 = vmatpush3.msra.mxu1 %v2016_v31 }
 0xee2   :  { %v1979_v17 = vpop.xlane.xlu1 %1978 }
 0xee3   :  { %v1981_v19 = vmul.f32 0.03125, %v1979_v17 }
 0xee4   :  { %v1976_v21 = vpop.xlane.xlu0 %1975 }
 0xee5   :  { %v1980_v23 = vmul.f32 0.03125, %v1976_v21  ;;  %v1983_v22 = vsub.f32 %v1971_v10, %v1981_v19 }
 0xee7   :  { %v1982_v24 = vsub.f32 %v1970_v12, %v1980_v23  ;;  %v1985_v27 = vmul.f32 %v1983_v22, %v1983_v22 }
 0xee9   :  { %v1984_v26 = vmul.f32 %v1982_v24, %v1982_v24  ;;  %v1989_v15 = vsel %vm365_vm5, %v1985_v27, 0.0  ;;  %v4297_v27 = vld [vmem:[%s5876_s17] ss:$0 sm:$0xff] }
 0xeeb   :  { %v1986_v59 = vsel %vm365_vm5, %v1984_v26, 0.0 }
 0xeec   :  { %1987 = vadd.xlane.f32.xlu0 %v1986_v59 }
 0xef0   :  { %1990 = vadd.xlane.f32.xlu0 %v1989_v15 }
 0xf75   :  { %v1988_v20 = vpop.xlane.xlu0 %1987 }
 0xf76   :  { %v1992_v32 = vmul.f32 0.03125, %v1988_v20 }
 0xf78   :  { %v1994_v33 = vadd.f32 1e-12, %v1992_v32 }
 0xf79   :  { %v1991_v34 = vpop.xlane.xlu0 %1990 }
 0xf7a   :  { %4927 = vrsqrt.f32 %v1994_v33  ;;  %v1993_v35 = vmul.f32 0.03125, %v1991_v34 }
 0xf7c   :  { %v1995_v36 = vadd.f32 1e-12, %v1993_v35 }
 0xf7e   :  { %4929 = vrsqrt.f32 %v1995_v36 }
 0xf87   :  { %v4928_v9 = vpop.eup %4927 }
 0xf88   :  { %v1998_v37 = vmul.f32 %v4928_v9, %v1982_v24 }
 0xf8a   :  { %v2006_v39 = vmul.f32 %v4292_v16, %v1998_v37 }
 0xf8b   :  { %v4930_v40 = vpop.eup %4929 }
 0xf8c   :  { %v1999_v42 = vmul.f32 %v4930_v40, %v1983_v22  ;;  %v5570_v43 = vadd.f32 %v4293_v38, %v2006_v39 }
 0xf8e   :  { %v2007_v44 = vmul.f32 %v4292_v16, %v1999_v42  ;;  %4666 = vmatprep.mubr.msk.f32.mxu1 %vm365_vm5, %v5570_v43 }
 0xf90   :  { %v5574_v45 = vadd.f32 %v4293_v38, %v2007_v44  ;;  %v4302_v44 = vld [vmem:[%s5867_s8 + $0x30] sm:$0xff] }
 0xf92   :  { %4667 = vmatmul.mubr.msk.f32.vlgmr.msra.gmra.mxu1 %vm365_vm5, %v5574_v45 }
0x1052   :  { %v4668_v0 = vpop.f32.mrf.mxu1 }
0x1053   :  { %v2105_v1 = vadd.f32 %v4668_v0, %v4294_v63  ;;  %v4305_v0 = vld [vmem:[%s5868_s9 + $0x1] ss:$0 sm:$0xff]  ;;  %s5908_s9 = smov 8  }
0x1054   :  { %v2099_v2 = vpop.f32.mrf.mxu1 }
0x1055   :  { %v2111_v3 = vmul.f32 0.044715, %v2105_v1  ;;  %v2100_v4 = vadd.f32 %v4294_v63, %v2099_v2  ;;  %v2109_v24 = vmul.f32 0.5, %v2105_v1 }
0x1057   :  { %v2113_v41 = vmul.f32 %v2111_v3, %v2105_v1  ;;  %v2110_v5 = vmul.f32 0.044715, %v2100_v4  ;;  %v2108_v23 = vmul.f32 0.5, %v2100_v4 }
0x1059   :  { %v2115_v6 = vmul.f32 %v2113_v41, %v2105_v1  ;;  %v2112_v7 = vmul.f32 %v2110_v5, %v2100_v4 }
0x105b   :  { %v2117_v8 = vadd.f32 %v2115_v6, %v2105_v1  ;;  %v2114_v10 = vmul.f32 %v2112_v7, %v2100_v4 }
0x105d   :  { %v2116_v11 = vadd.f32 %v2114_v10, %v2100_v4  ;;  %v2119_v12 = vmul.f32 0.7978846, %v2117_v8 }
0x105f   :  { %v2118_v14 = vmul.f32 0.7978846, %v2116_v11  ;;  %4931 = vtanh.f32 %v2119_v12 }
0x1061   :  { %4933 = vtanh.f32 %v2118_v14 }
0x106c   :  { %v4932_v17 = vpop.eup %4931 }
0x106d   :  { %v2123_v21 = vadd.f32 1.0, %v4932_v17 }
0x106e   :  { %v4934_v19 = vpop.eup %4933 }
0x106f   :  { %v2122_v22 = vadd.f32 1.0, %v4934_v19  ;;  %v2125_v59 = vmul.f32 %v2123_v21, %v2109_v24 }
0x1071   :  { %v2124_v26 = vmul.f32 %v2122_v22, %v2108_v23 }
0x1073   :  { %4701 = vmatprep.mubr.f32.mxu0 %v2124_v26 }
0x1074   :  { %4702 = vmatmul.mubr.f32.vlgmr.msra.gmra.mxu0 %v2125_v59 }
0x1075   :  { %4747 = vmatprep.mubr.msk.f32.mxu0 %vm5148_vm6, %v5146_v29 }
0x1134   :  { %v4703_v15 = vpop.f32.mrf.mxu0 }
0x1135   :  { %v2221_v28 = vadd.f32 %v4703_v15, %v4297_v27 }
0x1136   :  { %v2215_v13 = vpop.f32.mrf.mxu0 }
0x1137   :  { %v2216_v30 = vadd.f32 %v4297_v27, %v2215_v13  ;;  %v2225_v31 = vadd.f32 %v2221_v28, %v5574_v45  ;;  %v4301_v45 = vld [vmem:[%s5867_s8 + $0x28] sm:$0xff] }
0x1139   :  { %v2231_v20 = vsel %vm365_vm5, %v2225_v31, 0.0  ;;  %v2224_v32 = vadd.f32 %v2216_v30, %v5570_v43  ;;  %v4303_v43 = vld [vmem:[%s5867_s8 + $0x38] sm:$0xff] }
0x113a   :  { %2232 = vadd.xlane.f32.xlu0 %v2231_v20  ;;  %4704 = vmatprep.subr.mxu1 %v4303_v43 }
0x113b   :  { %v2228_v33 = vsel %vm365_vm5, %v2224_v32, 0.0  ;;  %4705 = vmatpush3.msra.mxu1 %v4303_v43 }
0x113c   :  { %2229 = vadd.xlane.f32.xlu1 %v2228_v33  ;;  %4706 = vmatprep.subr.mxu1 %v4302_v44 }
0x113d   :  { %4707 = vmatpush3.msra.mxu1 %v4302_v44 }
0x113e   :  { %4708 = vmatprep.subr.mxu1 %v4301_v45 }
0x113f   :  { %4709 = vmatpush3.msra.mxu1 %v4301_v45 }
0x1140   :  { %4710 = vmatprep.subr.mxu1 %v4300_v46 }
0x1141   :  { %4711 = vmatpush3.msra.mxu1 %v4300_v46 }
0x1142   :  { %4715 = vmatprep.subr.mxu1 %v5146_v29 }
0x11c3   :  { %v2233_v34 = vpop.xlane.xlu0 %2232 }
0x11c4   :  { %v2235_v35 = vmul.f32 0.03125, %v2233_v34 }
0x11c5   :  { %v2230_v36 = vpop.xlane.xlu1 %2229 }
0x11c6   :  { %v2237_v9 = vsub.f32 %v2225_v31, %v2235_v35  ;;  %v2234_v16 = vmul.f32 0.03125, %v2230_v36 }
0x11c8   :  { %v2236_v37 = vsub.f32 %v2224_v32, %v2234_v16  ;;  %v2239_v38 = vmul.f32 %v2237_v9, %v2237_v9 }
0x11ca   :  { %v2243_v39 = vsel %vm365_vm5, %v2239_v38, 0.0  ;;  %v2238_v40 = vmul.f32 %v2236_v37, %v2236_v37 }
0x11cb   :  { %2244 = vadd.xlane.f32.xlu0 %v2243_v39 }
0x11cc   :  { %v2240_v42 = vsel %vm365_vm5, %v2238_v40, 0.0 }
0x11cd   :  { %2241 = vadd.xlane.f32.xlu1 %v2240_v42 }
0x1254   :  { %v2245_v47 = vpop.xlane.xlu0 %2244 }
0x1255   :  { %v2247_v48 = vmul.f32 0.03125, %v2245_v47 }
0x1256   :  { %v2242_v49 = vpop.xlane.xlu1 %2241 }
0x1257   :  { %v2249_v50 = vadd.f32 1e-12, %v2247_v48  ;;  %v2246_v51 = vmul.f32 0.03125, %v2242_v49 }
0x1259   :  { %4935 = vrsqrt.f32 %v2249_v50  ;;  %v2248_v52 = vadd.f32 1e-12, %v2246_v51 }
0x125b   :  { %4937 = vrsqrt.f32 %v2248_v52 }
0x1266   :  { %v4936_v53 = vpop.eup %4935 }
0x1267   :  { %v2253_v55 = vmul.f32 %v4936_v53, %v2237_v9 }
0x1268   :  { %v4938_v56 = vpop.eup %4937 }
0x1269   :  { %v2252_v57 = vmul.f32 %v4938_v56, %v2236_v37  ;;  %v2261_v58 = vmul.f32 %v4298_v54, %v2253_v55 }
0x126b   :  { %v2260_v61 = vmul.f32 %v4298_v54, %v2252_v57  ;;  %v5614_v63 = vadd.f32 %v4299_v60, %v2261_v58 }
0x126d   :  { %v5612_v62 = vadd.f32 %v4299_v60, %v2260_v61 }
0x126f   :  { %4712 = vmatprep.mubr.msk.f32.mxu1 %vm365_vm5, %v5612_v62 }
0x1270   :  { %4713 = vmatmul.mubr.msk.f32.vlgmr.msra.gmra.mxu1 %vm365_vm5, %v5614_v63 }
0x1271   :  { %4717 = vmatprep.mubr.msk.f32.mxu1 %vm5148_vm6, %v5146_v29 }
0x1330   :  { %v4714_v1 = vpop.f32.mrf.mxu1 }
0x1331   :  { %v5625_v2 = vadd.f32 %v4714_v1, %v4305_v0 }
0x1332   :  { %v2355_v3 = vpop.f32.mrf.mxu1 }
0x1333   :  { %v5627_v4 = vadd.f32 %v4305_v0, %v2355_v3 }
0x1335   :  { %2365 = vrot.lane.b32.xlu1 %v5627_v4, %s5149_s24 }
0x1339   :  { %2532 = vrot.lane.b32.xlu1 %v5627_v4, %s5150_s5 }
0x133d   :  { %2530 = vrot.lane.b32.xlu1 %v5627_v4, %s5151_s16 }
0x13a7   :  { %v2366_v41 = vpop.permute.xlu1 %2365 }
0x13a8   :  { %4716 = vmatpush3.xpose.msk.msra.mxu1 %vm279_vm0, %v2366_v41 }
0x13a9   :  { %4720 = vmatprep.subr.mxu1 %v5146_v29 }
0x13ab   :  { %4718 = vmatmul.mubr.msk.f32.vlgmr.msra.gmra.mxu1 %vm279_vm0, %v5627_v4  ;;  %v2533_v24 = vpop.permute.xlu1 %2532 }
0x13ac   :  { %4722 = vmatprep.mubr.msk.f32.mxu1 %vm5148_vm6, %v5146_v29 }
0x13af   :  { %v2531_v59 = vpop.permute.xlu1 %2530 }
0x146b   :  { %v2437_v5 = vpop.f32.mrf.mxu1 }
0x146c   :  { %v2441_v6 = vmul.f32 0.35355338, %v2437_v5 }
0x146d   :  { %v4719_v7 = vpop.f32.mrf.mxu1 }
0x146e   :  { %v2442_v8 = vadd.f32 %v2441_v6, %v5406_v25 }
0x1470   :  { %v2443_v10 = vsel %vm279_vm0, %v2442_v8, -inf }
0x1471   :  { %2444 = vmax.xlane.f32.xlu0 %v2443_v10 }
0x14fa   :  { %v2445_v11 = vpop.xlane.xlu0 %2444 }
0x14fb   :  { %v2446_v12 = vsub.f32 %v2442_v8, %v2445_v11 }
0x14fd   :  { %v2447_v14 = vmul.f32 1.442695, %v2446_v12 }
0x14ff   :  { %4939 = vpow2.f32 %v2447_v14 }
0x150c   :  { %v4940_v17 = vpop.eup %4939 }
0x150d   :  { %v2449_v19 = vsel %vm279_vm0, %v4940_v17, 0.0 }
0x150e   :  { %2450 = vadd.xlane.f32.xlu0 %v2449_v19 }
0x1524   :  { %2454 = vrot.lane.b32.xlu0 %v5627_v4, %s5152_s2 }
0x1597   :  { %v2451_v21 = vpop.xlane.xlu0 %2450 }
0x1598   :  { %4941 = vrcp.f32 %v2451_v21 }
0x159b   :  { %v2455_v23 = vpop.permute.xlu0 %2454 }
0x159c   :  { %4721 = vmatpush3.msra.mxu1 %v2455_v23 }
0x159d   :  { %4725 = vmatprep.subr.mxu1 %v5146_v29 }
0x15a5   :  { %v4942_v22 = vpop.eup %4941 }
0x15a6   :  { %v2453_v26 = vmul.f32 %v4942_v22, %v4940_v17 }
0x15a8   :  { %4723 = vmatmul.mubr.msk.f32.vlgmr.msra.gmra.mxu1 %vm279_vm0, %v2453_v26 }
0x15a9   :  { %4726 = vmatpush3.xpose.msk.msra.mxu1 %vm279_vm0, %v2533_v24  ;;  %4727 = vmatprep.mubr.msk.f32.mxu1 %vm5148_vm6, %v5146_v29 }
0x15aa   :  { %4730 = vmatprep.subr.mxu1 %v5146_v29 }
0x15ac   :  { %4728 = vmatmul.mubr.msk.f32.vlgmr.msra.gmra.mxu1 %vm279_vm0, %v2531_v59 }
0x15ad   :  { %4732 = vmatprep.mubr.msk.f32.mxu1 %vm5148_vm6, %v5146_v29 }
0x1668   :  { %v5655_v27 = vpop.f32.mrf.mxu1 }
0x166a   :  { %v4724_v15 = vpop.f32.mrf.mxu1 }
0x166c   :  { %v2604_v28 = vpop.f32.mrf.mxu1 }
0x166d   :  { %v2608_v13 = vmul.f32 0.35355338, %v2604_v28 }
0x166e   :  { %v4729_v30 = vpop.f32.mrf.mxu1 }
0x166f   :  { %v2609_v31 = vadd.f32 %v2608_v13, %v5406_v25 }
0x1671   :  { %v2610_v20 = vsel %vm279_vm0, %v2609_v31, -inf }
0x1672   :  { %2611 = vmax.xlane.f32.xlu1 %v2610_v20 }
0x1683   :  { %2621 = vrot.lane.b32.xlu1 %v5627_v4, %s5153_s6 }
0x1687   :  { %2697 = vrot.lane.b32.xlu1 %v5627_v4, %s5154_s14 }
0x168b   :  { %2866 = vrot.lane.b32.xlu1 %v5627_v4, %s5156_s27 }
0x168f   :  { %3047 = vrot.lane.b32.xlu1 %v5625_v2, %s5149_s24  ;;  %s5909_s24 = smov 16  }
0x1693   :  { %3212 = vrot.lane.b32.xlu1 %v5625_v2, %s5151_s16 }
0x1697   :  { %3379 = vrot.lane.b32.xlu1 %v5625_v2, %s5154_s14 }
0x169b   :  { %3546 = vrot.lane.b32.xlu1 %v5625_v2, %s5157_s20 }
0x16fb   :  { %v2612_v32 = vpop.xlane.xlu1 %2611 }
0x16fc   :  { %v2613_v33 = vsub.f32 %v2609_v31, %v2612_v32 }
0x16fe   :  { %v2614_v34 = vmul.f32 1.442695, %v2613_v33 }
0x16ff   :  { %v2622_v35 = vpop.permute.xlu1 %2621 }
0x1700   :  { %4943 = vpow2.f32 %v2614_v34  ;;  %4731 = vmatpush3.msra.mxu1 %v2622_v35 }
0x1701   :  { %4735 = vmatprep.subr.mxu1 %v5146_v29 }
0x1703   :  { %v2698_v36 = vpop.permute.xlu1 %2697 }
0x1707   :  { %v2867_v9 = vpop.permute.xlu1 %2866 }
0x1708   :  { %4746 = vmatpush3.xpose.msk.msra.mxu0 %vm279_vm0, %v2867_v9 }
0x1709   :  { %4755 = vmatprep.subr.mxu0 %v5146_v29 }
0x170b   :  { %v3048_v40 = vpop.permute.xlu1 %3047 }
0x170d   :  { %v4944_v16 = vpop.eup %4943 }
0x170e   :  { %v2616_v37 = vsel %vm279_vm0, %v4944_v16, 0.0 }
0x170f   :  { %2617 = vadd.xlane.f32.xlu0 %v2616_v37  ;;  %v3213_v43 = vpop.permute.xlu1 %3212 }
0x1713   :  { %v3380_v48 = vpop.permute.xlu1 %3379 }
0x1717   :  { %v3547_v50 = vpop.permute.xlu1 %3546 }
0x1725   :  { %2699 = vrot.lane.b32.xlu0 %v5627_v4, %s5155_s25 }
0x1729   :  { %2864 = vrot.lane.b32.xlu0 %v5627_v4, %s5157_s20 }
0x172d   :  { %3214 = vrot.lane.b32.xlu0 %v5625_v2, %s5150_s5  ;;  %s5910_s5 = smov 24  }
0x1731   :  { %3381 = vrot.lane.b32.xlu0 %v5625_v2, %s5155_s25 }
0x1735   :  { %3548 = vrot.lane.b32.xlu0 %v5625_v2, %s5156_s27 }
0x1798   :  { %v2618_v38 = vpop.xlane.xlu0 %2617 }
0x1799   :  { %4945 = vrcp.f32 %v2618_v38 }
0x179c   :  { %v2700_v39 = vpop.permute.xlu0 %2699 }
0x17a0   :  { %v2865_v42 = vpop.permute.xlu0 %2864 }
0x17a1   :  { %4748 = vmatmul.mubr.msk.f32.vlgmr.msra.gmra.mxu0 %vm279_vm0, %v2865_v42 }
0x17a2   :  { %4756 = vmatpush3.xpose.msk.msra.mxu0 %vm279_vm0, %v3048_v40  ;;  %4757 = vmatprep.mubr.msk.f32.mxu0 %vm5148_vm6, %v5146_v29 }
0x17a3   :  { %4765 = vmatprep.subr.mxu0 %v5146_v29 }
0x17a4   :  { %v3215_v44 = vpop.permute.xlu0 %3214 }
0x17a5   :  { %4758 = vmatmul.mubr.msk.f32.vlgmr.msra.gmra.mxu0 %vm279_vm0, %v5625_v2 }
0x17a6   :  { %v4946_v45 = vpop.eup %4945  ;;  %4766 = vmatpush3.xpose.msk.msra.mxu0 %vm279_vm0, %v3215_v44  ;;  %4767 = vmatprep.mubr.msk.f32.mxu0 %vm5148_vm6, %v5146_v29 }
0x17a7   :  { %4775 = vmatprep.subr.mxu0 %v5146_v29  ;;  %v2620_v46 = vmul.f32 %v4946_v45, %v4944_v16 }
0x17a8   :  { %v3382_v47 = vpop.permute.xlu0 %3381 }
0x17a9   :  { %4733 = vmatmul.mubr.msk.f32.vlgmr.msra.gmra.mxu1 %vm279_vm0, %v2620_v46  ;;  %4768 = vmatmul.mubr.msk.f32.vlgmr.msra.gmra.mxu0 %vm279_vm0, %v3213_v43 }
0x17aa   :  { %4736 = vmatpush3.xpose.msk.msra.mxu1 %vm279_vm0, %v2700_v39  ;;  %4776 = vmatpush3.xpose.msk.msra.mxu0 %vm279_vm0, %v3382_v47 }
0x17ab   :  { %4737 = vmatprep.mubr.msk.f32.mxu1 %vm5148_vm6, %v5146_v29  ;;  %4777 = vmatprep.mubr.msk.f32.mxu0 %vm5148_vm6, %v5146_v29 }
0x17ac   :  { %v3549_v49 = vpop.permute.xlu0 %3548  ;;  %4785 = vmatprep.subr.mxu0 %v5146_v29  ;;  %4740 = vmatprep.subr.mxu1 %v5146_v29 }
0x17ad   :  { %4738 = vmatmul.mubr.msk.f32.vlgmr.msra.gmra.mxu1 %vm279_vm0, %v2698_v36  ;;  %4778 = vmatmul.mubr.msk.f32.vlgmr.msra.gmra.mxu0 %vm279_vm0, %v3380_v48 }
0x17ae   :  { %4786 = vmatpush3.xpose.msk.msra.mxu0 %vm279_vm0, %v3549_v49  ;;  %4787 = vmatprep.mubr.msk.f32.mxu0 %vm5148_vm6, %v5146_v29 }
0x17af   :  { %4742 = vmatprep.mubr.msk.f32.mxu1 %vm5148_vm6, %v5146_v29 }
0x17b1   :  { %4788 = vmatmul.mubr.msk.f32.vlgmr.msra.gmra.mxu0 %vm279_vm0, %v3547_v50 }
0x1861   :  { %v2938_v51 = vpop.f32.mrf.mxu0 }
0x1862   :  { %v2942_v52 = vmul.f32 0.35355338, %v2938_v51 }
0x1863   :  { %v4749_v53 = vpop.f32.mrf.mxu0 }
0x1864   :  { %v2943_v54 = vadd.f32 %v2942_v52, %v5406_v25 }
0x1865   :  { %v3119_v55 = vpop.f32.mrf.mxu0 }
0x1866   :  { %v2944_v56 = vsel %vm279_vm0, %v2943_v54, -inf  ;;  %v3123_v41 = vmul.f32 0.35355338, %v3119_v55 }
0x1867   :  { %2945 = vmax.xlane.f32.xlu1 %v2944_v56  ;;  %v4759_v57 = vpop.f32.mrf.mxu0 }
0x1868   :  { %v3124_v21 = vadd.f32 %v3123_v41, %v5343_v18 }
0x1869   :  { %v5718_v58 = vpop.f32.mrf.mxu1  ;;  %v3286_v60 = vpop.f32.mrf.mxu0 }
0x186a   :  { %v3290_v14 = vmul.f32 0.35355338, %v3286_v60  ;;  %v3125_v24 = vsel %vm279_vm0, %v3124_v21, -inf }
0x186b   :  { %v4734_v61 = vpop.f32.mrf.mxu1  ;;  %v4769_v0 = vpop.f32.mrf.mxu0 }
0x186c   :  { %v3291_v26 = vadd.f32 %v3290_v14, %v5343_v18 }
0x186d   :  { %v2771_v1 = vpop.f32.mrf.mxu1  ;;  %v3453_v3 = vpop.f32.mrf.mxu0 }
0x186e   :  { %v2775_v5 = vmul.f32 0.35355338, %v2771_v1  ;;  %v3457_v6 = vmul.f32 0.35355338, %v3453_v3  ;;  %v3292_v59 = vsel %vm279_vm0, %v3291_v26, -inf }
0x186f   :  { %v4739_v7 = vpop.f32.mrf.mxu1  ;;  %v4779_v8 = vpop.f32.mrf.mxu0 }
0x1870   :  { %v3458_v10 = vadd.f32 %v3457_v6, %v5343_v18  ;;  %v2776_v11 = vadd.f32 %v2775_v5, %v5406_v25 }
0x1871   :  { %v3620_v12 = vpop.f32.mrf.mxu0 }
0x1872   :  { %v3459_v17 = vsel %vm279_vm0, %v3458_v10, -inf  ;;  %v2777_v19 = vsel %vm279_vm0, %v2776_v11, -inf  ;;  %v3624_v22 = vmul.f32 0.35355338, %v3620_v12 }
0x1873   :  { %3460 = vmax.xlane.f32.xlu1 %v3459_v17  ;;  %v4789_v23 = vpop.f32.mrf.mxu0  ;;  %2778 = vmax.xlane.f32.xlu0 %v2777_v19 }
0x1874   :  { %v3625_v25 = vadd.f32 %v3624_v22, %v5343_v18 }
0x1876   :  { %v3626_v15 = vsel %vm279_vm0, %v3625_v25, -inf }
0x1877   :  { %3126 = vmax.xlane.f32.xlu0 %v3125_v24  ;;  %v3732_v24 = vld [vmem:[#allocation7 + $0x38] sm:$0xff] }
0x1878   :  { %4795 = vmatprep.subr.mxu0 %v3732_v24 }
0x1879   :  { %4796 = vmatpush3.msra.mxu0 %v3732_v24 }
0x187b   :  { %3293 = vmax.xlane.f32.xlu0 %v3292_v59 }
0x187f   :  { %3627 = vmax.xlane.f32.xlu0 %v3626_v15  ;;  %v3730_v15 = vld [vmem:[#allocation7 + $0x28] sm:$0xff] }
0x18f0   :  { %v2946_v28 = vpop.xlane.xlu1 %2945 }
0x18f1   :  { %v2947_v13 = vsub.f32 %v2943_v54, %v2946_v28  ;;  %v3729_v28 = vld [vmem:[#allocation7 + $0x20] sm:$0xff] }
0x18f3   :  { %v2948_v30 = vmul.f32 1.442695, %v2947_v13 }
0x18f5   :  { %4947 = vpow2.f32 %v2948_v30 }
0x18fc   :  { %v3461_v31 = vpop.xlane.xlu1 %3460  ;;  %v2779_v20 = vpop.xlane.xlu0 %2778 }
0x18fd   :  { %v3462_v32 = vsub.f32 %v3458_v10, %v3461_v31  ;;  %v2780_v51 = vsub.f32 %v2776_v11, %v2779_v20 }
0x18ff   :  { %v3463_v36 = vmul.f32 1.442695, %v3462_v32  ;;  %v2781_v52 = vmul.f32 1.442695, %v2780_v51 }
0x1900   :  { %v3127_v33 = vpop.xlane.xlu0 %3126 }
0x1901   :  { %v3128_v34 = vsub.f32 %v3124_v21, %v3127_v33 }
0x1902   :  { %v5730_v35 = vpop.eup %4947 }
0x1903   :  { %v3129_v9 = vmul.f32 1.442695, %v3128_v34  ;;  %v2950_v18 = vsel %vm279_vm0, %v5730_v35, 0.0 }
0x1904   :  { %2951 = vadd.xlane.f32.xlu0 %v2950_v18  ;;  %v3294_v16 = vpop.xlane.xlu0 %3293 }
0x1905   :  { %4949 = vpow2.f32 %v3129_v9  ;;  %v3295_v37 = vsub.f32 %v3291_v26, %v3294_v16  ;;  %v3731_v26 = vld [vmem:[#allocation7 + $0x30] sm:$0xff] }
0x1906   :  { %4951 = vpow2.f32 %v3463_v36  ;;  %4797 = vmatprep.subr.mxu0 %v3731_v26 }
0x1907   :  { %v3296_v38 = vmul.f32 1.442695, %v3295_v37  ;;  %4798 = vmatpush3.msra.mxu0 %v3731_v26 }
0x1908   :  { %v3628_v39 = vpop.xlane.xlu0 %3627  ;;  %4799 = vmatprep.subr.mxu0 %v3730_v15 }
0x1909   :  { %4953 = vpow2.f32 %v3296_v38  ;;  %v3629_v40 = vsub.f32 %v3625_v25, %v3628_v39  ;;  %4800 = vmatpush3.msra.mxu0 %v3730_v15  ;;  %v3996_v15 = vld [vmem:[#allocation10 + $0xe8] sm:$0xff] }
0x190a   :  { %4801 = vmatprep.subr.mxu0 %v3729_v28 }
0x190b   :  { %v3630_v42 = vmul.f32 1.442695, %v3629_v40  ;;  %4802 = vmatpush3.msra.mxu0 %v3729_v28  ;;  %v3995_v28 = vld [vmem:[#allocation10 + $0xe0] sm:$0xff] }
0x190d   :  { %4955 = vpow2.f32 %v3630_v42 }
0x190e   :  { %4957 = vpow2.f32 %v2781_v52 }
0x1912   :  { %v4950_v43 = vpop.eup %4949 }
0x1913   :  { %v3131_v44 = vsel %vm279_vm0, %v4950_v43, 0.0  ;;  %v5735_v45 = vpop.eup %4951 }
0x1914   :  { %3132 = vadd.xlane.f32.xlu1 %v3131_v44  ;;  %v3465_v47 = vsel %vm279_vm0, %v5735_v45, 0.0 }
0x1916   :  { %v4954_v46 = vpop.eup %4953 }
0x1917   :  { %v3298_v48 = vsel %vm279_vm0, %v4954_v46, 0.0 }
0x1918   :  { %3466 = vadd.xlane.f32.xlu1 %v3465_v47  ;;  %3299 = vadd.xlane.f32.xlu0 %v3298_v48 }
0x191a   :  { %v5740_v49 = vpop.eup %4955 }
0x191b   :  { %v3632_v50 = vsel %vm279_vm0, %v5740_v49, 0.0  ;;  %v4958_v53 = vpop.eup %4957 }
0x191c   :  { %3633 = vadd.xlane.f32.xlu0 %v3632_v50  ;;  %v2783_v54 = vsel %vm279_vm0, %v4958_v53, 0.0 }
0x1929   :  { %2788 = vrot.lane.b32.xlu1 %v5627_v4, %s5158_s7 }
0x1932   :  { %2955 = vrot.lane.b32.xlu0 %v5627_v4, %s5159_s28 }
0x1936   :  { %3470 = vrot.lane.b32.xlu0 %v5625_v2, %s5158_s7 }
0x193a   :  { %3032 = vrot.lane.b32.xlu0 %v5718_v58, %s5908_s9 }
0x194d   :  { %2784 = vadd.xlane.f32.xlu1 %v2783_v54 }
0x195e   :  { %3136 = vrot.lane.b32.xlu1 %v5625_v2, %s5152_s2 }
0x1962   :  { %3303 = vrot.lane.b32.xlu1 %v5625_v2, %s5153_s6 }
0x1966   :  { %3637 = vrot.lane.b32.xlu1 %v5625_v2, %s5159_s28 }
0x198d   :  { %v2952_v57 = vpop.xlane.xlu0 %2951 }
0x199d   :  { %v3133_v4 = vpop.xlane.xlu1 %3132 }
0x19a1   :  { %v3467_v55 = vpop.xlane.xlu1 %3466  ;;  %v3300_v60 = vpop.xlane.xlu0 %3299 }
0x19a5   :  { %v2789_v56 = vpop.permute.xlu1 %2788  ;;  %v3634_v61 = vpop.xlane.xlu0 %3633 }
0x19a6   :  { %4741 = vmatpush3.msra.mxu1 %v2789_v56 }
0x19a7   :  { %4750 = vmatprep.subr.mxu1 %v5146_v29 }
0x19a9   :  { %v2956_v41 = vpop.permute.xlu0 %2955 }
0x19ad   :  { %v3471_v14 = vpop.permute.xlu0 %3470 }
0x19b1   :  { %v3033_v36 = vpop.permute.xlu0 %3032 }
0x19b2   :  { %v3043_v18 = vsel %vm279_vm0, %v5655_v27, %v3033_v36  ;;  %v4333_v27 = vld [vmem:[%s5870_s11 + $0x1] ss:$0 sm:$0xff] }
0x19b3   :  { %v3985_v36 = vld [vmem:[#allocation10 + $0x90] sm:$0xff] }
0x19d6   :  { %v2785_v58 = vpop.xlane.xlu1 %2784 }
0x19d7   :  { %4959 = vrcp.f32 %v2785_v58 }
0x19d8   :  { %4961 = vrcp.f32 %v2952_v57 }
0x19d9   :  { %4963 = vrcp.f32 %v3133_v4 }
0x19da   :  { %4965 = vrcp.f32 %v3300_v60  ;;  %v3137_v2 = vpop.permute.xlu1 %3136 }
0x19db   :  { %4967 = vrcp.f32 %v3467_v55 }
0x19dc   :  { %4969 = vrcp.f32 %v3634_v61 }
0x19de   :  { %v3304_v10 = vpop.permute.xlu1 %3303 }
0x19e2   :  { %v3638_v21 = vpop.permute.xlu1 %3637 }
0x19e4   :  { %v4960_v0 = vpop.eup %4959 }
0x19e5   :  { %v2787_v1 = vmul.f32 %v4960_v0, %v4958_v53  ;;  %v4962_v3 = vpop.eup %4961 }
0x19e6   :  { %v2954_v5 = vmul.f32 %v4962_v3, %v5730_v35  ;;  %v4964_v6 = vpop.eup %4963  ;;  %v3872_v3 = vld [vmem:[#allocation8 + $0x28] sm:$0xff] }
0x19e7   :  { %4743 = vmatmul.mubr.msk.f32.vlgmr.msra.gmra.mxu1 %vm279_vm0, %v2787_v1  ;;  %v3135_v7 = vmul.f32 %v4964_v6, %v4950_v43  ;;  %v4966_v8 = vpop.eup %4965  ;;  %v3873_v1 = vld [vmem:[#allocation8 + $0x30] sm:$0xff] }
0x19e8   :  { %4751 = vmatpush3.msra.mxu1 %v2956_v41  ;;  %4752 = vmatprep.mubr.msk.f32.mxu1 %vm5148_vm6, %v5146_v29  ;;  %v3302_v11 = vmul.f32 %v4966_v8, %v4954_v46  ;;  %v4968_v12 = vpop.eup %4967  ;;  %v3871_v41 = vld [vmem:[#allocation8 + $0x20] sm:$0xff] }
0x19e9   :  { %4760 = vmatprep.subr.mxu1 %v5146_v29  ;;  %v3469_v17 = vmul.f32 %v4968_v12, %v5735_v45  ;;  %v4970_v19 = vpop.eup %4969  ;;  %v4338_v12 = vld [vmem:[%s5871_s12 + $0x1] ss:$0 sm:$0xff] }
0x19ea   :  { %v3636_v23 = vmul.f32 %v4970_v19, %v5740_v49 }
0x19eb   :  { %4753 = vmatmul.mubr.msk.f32.vlgmr.msra.gmra.mxu1 %vm279_vm0, %v2954_v5 }
0x19ec   :  { %4761 = vmatpush3.msra.mxu1 %v3137_v2  ;;  %4762 = vmatprep.mubr.msk.f32.mxu1 %vm5148_vm6, %v5146_v29 }
0x19ed   :  { %4770 = vmatprep.subr.mxu1 %v5146_v29 }
0x19ef   :  { %4763 = vmatmul.mubr.msk.f32.vlgmr.msra.gmra.mxu1 %vm279_vm0, %v3135_v7 }
0x19f0   :  { %4771 = vmatpush3.msra.mxu1 %v3304_v10  ;;  %4772 = vmatprep.mubr.msk.f32.mxu1 %vm5148_vm6, %v5146_v29 }
0x19f1   :  { %4780 = vmatprep.subr.mxu1 %v5146_v29 }
0x19f3   :  { %4773 = vmatmul.mubr.msk.f32.vlgmr.msra.gmra.mxu1 %vm279_vm0, %v3302_v11 }
0x19f4   :  { %4781 = vmatpush3.msra.mxu1 %v3471_v14  ;;  %4782 = vmatprep.mubr.msk.f32.mxu1 %vm5148_vm6, %v5146_v29 }
0x19f5   :  { %4790 = vmatprep.subr.mxu1 %v5146_v29 }
0x19f7   :  { %4783 = vmatmul.mubr.msk.f32.vlgmr.msra.gmra.mxu1 %vm279_vm0, %v3469_v17  ;;  %v4339_v17 = vld [vmem:[%s5872_s13 + $0x1] ss:$0 sm:$0xff] }
0x19f8   :  { %4791 = vmatpush3.msra.mxu1 %v3638_v21  ;;  %4792 = vmatprep.mubr.msk.f32.mxu1 %vm5148_vm6, %v5146_v29 }
0x19fb   :  { %4793 = vmatmul.mubr.msk.f32.vlgmr.msra.gmra.mxu1 %vm279_vm0, %v3636_v23 }
0x1aa7   :  { %v2860_v22 = vpop.f32.mrf.mxu1 }
0x1aa8   :  { %3036 = vrot.lane.b32.xlu1 %v2860_v22, %s5909_s24 }
0x1aa9   :  { %v4744_v59 = vpop.f32.mrf.mxu1 }
0x1aaa   :  { %v3998_v59 = vld [vmem:[#allocation10 + $0xf8] sm:$0xff] }
0x1aab   :  { %v3027_v25 = vpop.f32.mrf.mxu1  ;;  %4817 = vmatprep.subr.mxu0 %v3998_v59 }
0x1aac   :  { %3040 = vrot.lane.b32.xlu1 %v3027_v25, %s5910_s5  ;;  %v3997_v25 = vld [vmem:[#allocation10 + $0xf0] sm:$0xff] }
0x1aad   :  { %v4754_v29 = vpop.f32.mrf.mxu1 }
0x1aae   :  { %v3994_v29 = vld [vmem:[#allocation10 + $0xd8] sm:$0xff] }
0x1aaf   :  { %v3208_v13 = vpop.f32.mrf.mxu1 }
0x1ab1   :  { %v4764_v30 = vpop.f32.mrf.mxu1 }
0x1ab2   :  { %v3992_v30 = vld [vmem:[#allocation10 + $0xc8] sm:$0xff] }
0x1ab3   :  { %v3375_v31 = vpop.f32.mrf.mxu1 }
0x1ab4   :  { %3714 = vrot.lane.b32.xlu0 %v3375_v31, %s5908_s9  ;;  %v3991_v31 = vld [vmem:[#allocation10 + $0xc0] sm:$0xff] }
0x1ab5   :  { %v4774_v20 = vpop.f32.mrf.mxu1 }
0x1ab6   :  { %v3990_v20 = vld [vmem:[#allocation10 + $0xb8] sm:$0xff] }
0x1ab7   :  { %v3542_v32 = vpop.f32.mrf.mxu1 }
0x1ab8   :  { %3718 = vrot.lane.b32.xlu0 %v3542_v32, %s5909_s24  ;;  %v3989_v32 = vld [vmem:[#allocation10 + $0xb0] sm:$0xff] }
0x1ab9   :  { %v4784_v33 = vpop.f32.mrf.mxu1 }
0x1aba   :  { %v3988_v33 = vld [vmem:[#allocation10 + $0xa8] sm:$0xff] }
0x1abb   :  { %v3709_v34 = vpop.f32.mrf.mxu1 }
0x1abc   :  { %3722 = vrot.lane.b32.xlu1 %v3709_v34, %s5910_s5  ;;  %v3987_v34 = vld [vmem:[#allocation10 + $0xa0] sm:$0xff] }
0x1abd   :  { %v4794_v35 = vpop.f32.mrf.mxu1 }
0x1abe   :  { %v3986_v35 = vld [vmem:[#allocation10 + $0x98] sm:$0xff] }
0x1b1a   :  { %v3037_v9 = vpop.permute.xlu1 %3036 }
0x1b1b   :  { %v3044_v16 = vsel %vm1188_vm7, %v3043_v18, %v3037_v9  ;;  %v3984_v9 = vld [vmem:[#allocation10 + $0x88] sm:$0xff]  ;;  %v3983_v18 = vld [vmem:[#allocation10 + $0x80] sm:$0xff] }
0x1b1e   :  { %v3041_v37 = vpop.permute.xlu1 %3040 }
0x1b1f   :  { %v3045_v38 = vsel %vm1190_vm8, %v3044_v16, %v3041_v37  ;;  %v4341_v16 = vld [vmem:[%s5874_s15 + $0x1] ss:$0 sm:$0xff] }
0x1b20   :  { %4803 = vmatprep.mubr.msk.f32.mxu0 %vm365_vm5, %v3045_v38 }
0x1b26   :  { %v3715_v39 = vpop.permute.xlu0 %3714 }
0x1b27   :  { %v3725_v42 = vsel %vm279_vm0, %v3208_v13, %v3715_v39  ;;  %v3993_v13 = vld [vmem:[#allocation10 + $0xd0] sm:$0xff] }
0x1b2a   :  { %v3719_v40 = vpop.permute.xlu0 %3718 }
0x1b2b   :  { %v3726_v43 = vsel %vm1188_vm7, %v3725_v42, %v3719_v40 }
0x1b2e   :  { %v3723_v44 = vpop.permute.xlu1 %3722 }
0x1b2f   :  { %v3727_v45 = vsel %vm1190_vm8, %v3726_v43, %v3723_v44 }
0x1b30   :  { %4804 = vmatmul.mubr.msk.f32.vlgmr.msra.gmra.mxu0 %vm365_vm5, %v3727_v45 }
0x1b31   :  { %4818 = vmatpush3.msra.mxu0 %v3998_v59 }
0x1b32   :  { %4819 = vmatprep.subr.mxu0 %v3997_v25 }
0x1b33   :  { %4820 = vmatpush3.msra.mxu0 %v3997_v25 }
0x1b34   :  { %4821 = vmatprep.subr.mxu0 %v3996_v15 }
0x1b35   :  { %4822 = vmatpush3.msra.mxu0 %v3996_v15 }
0x1b36   :  { %4823 = vmatprep.subr.mxu0 %v3995_v28 }
0x1b37   :  { %4824 = vmatpush3.msra.mxu0 %v3995_v28 }
0x1b38   :  { %4825 = vmatprep.subr.mxu0 %v3994_v29 }
0x1b39   :  { %4826 = vmatpush3.msra.mxu0 %v3994_v29 }
0x1b3a   :  { %4827 = vmatprep.subr.mxu0 %v3993_v13 }
0x1b3b   :  { %4828 = vmatpush3.msra.mxu0 %v3993_v13  ;;  %v4348_v13 = vld [vmem:[%s5877_s18 + $0x1] ss:$0 sm:$0xff]  ;;  %s5162_s18 = smov [#allocation13]  }
0x1b3c   :  { %4829 = vmatprep.subr.mxu0 %v3992_v30  ;;  %s4233_s10 = sshll.u32 %s5162_s18, 4  ;;  %s4234_s10 = int_to_ptr.vmem [resolvable:$true] %s4233_s10 }
0x1b3d   :  { %4830 = vmatpush3.msra.mxu0 %v3992_v30  ;;  %s5107_s0 = scalar_lea.vmem %s4234_s10, 256  ;;  %p5112_p3 = scmp.lt.s32.totalorder %s4234_s10, %s4234_s10 }
0x1b3e   :  { %4831 = vmatprep.subr.mxu0 %v3991_v31  ;;  %p5108_p2 = scmp.ne.s32.totalorder %s4234_s10, %s5107_s0  ;;  %p5113_p4 = scmp.lt.s32.totalorder %s5107_s0, %s5107_s0 }
0x1b3f   :  { %4832 = vmatpush3.msra.mxu0 %v3991_v31 }
0x1b40   :  { %4833 = vmatprep.subr.mxu0 %v3990_v20  ;;  %p5114_p5 = por %p5113_p4, %p5112_p3 }
0x1b41   :  { %4834 = vmatpush3.msra.mxu0 %v3990_v20  ;;  %v4349_v20 = vld [vmem:[%s5878_s19 + $0x1] ss:$0 sm:$0xff] }
0x1b42   :  { %4835 = vmatprep.subr.mxu0 %v3989_v32  ;;  %p5115_p6 = pnand %p5114_p5, %p5108_p2 }
0x1b43   :  { %4836 = vmatpush3.msra.mxu0 %v3989_v32 }
0x1b44   :  { %4837 = vmatprep.subr.mxu0 %v3988_v33 }
0x1b45   :  { %4838 = vmatpush3.msra.mxu0 %v3988_v33 }
0x1b46   :  { %4839 = vmatprep.subr.mxu0 %v3987_v34 }
0x1b47   :  { %4840 = vmatpush3.msra.mxu0 %v3987_v34 }
0x1b48   :  { %4841 = vmatprep.subr.mxu0 %v3986_v35 }
0x1b49   :  { %4842 = vmatpush3.msra.mxu0 %v3986_v35 }
0x1b4a   :  { %4843 = vmatprep.subr.mxu0 %v3985_v36 }
0x1b4b   :  { %4844 = vmatpush3.msra.mxu0 %v3985_v36 }
0x1b4c   :  { %4845 = vmatprep.subr.mxu0 %v3984_v9 }
0x1b4d   :  { %4846 = vmatpush3.msra.mxu0 %v3984_v9 }
0x1b4e   :  { %4847 = vmatprep.subr.mxu0 %v3983_v18 }
0x1b4f   :  { %4848 = vmatpush3.msra.mxu0 %v3983_v18 }
0x1bf0   :  { %v4805_v46 = vpop.f32.mrf.mxu0 }
0x1bf1   :  { %v3819_v47 = vadd.f32 %v4805_v46, %v4333_v27 }
0x1bf2   :  { %v3813_v48 = vpop.f32.mrf.mxu0 }
0x1bf3   :  { %v3823_v49 = vadd.f32 %v3819_v47, %v5614_v63  ;;  %v3814_v50 = vadd.f32 %v4333_v27, %v3813_v48 }
0x1bf5   :  { %v3822_v51 = vadd.f32 %v3814_v50, %v5612_v62  ;;  %v3831_v52 = vsel %vm365_vm5, %v3823_v49, 0.0  ;;  %v3874_v62 = vld [vmem:[#allocation8 + $0x38] sm:$0xff] }
0x1bf6   :  { %3832 = vadd.xlane.f32.xlu1 %v3831_v52  ;;  %4806 = vmatprep.subr.mxu1 %v3874_v62 }
0x1bf7   :  { %v3828_v53 = vsel %vm365_vm5, %v3822_v51, 0.0  ;;  %4807 = vmatpush3.msra.mxu1 %v3874_v62 }
0x1bf8   :  { %3829 = vadd.xlane.f32.xlu0 %v3828_v53  ;;  %4808 = vmatprep.subr.mxu1 %v3873_v1 }
0x1bf9   :  { %4809 = vmatpush3.msra.mxu1 %v3873_v1 }
0x1bfa   :  { %4810 = vmatprep.subr.mxu1 %v3872_v3 }
0x1bfb   :  { %4811 = vmatpush3.msra.mxu1 %v3872_v3 }
0x1bfc   :  { %4812 = vmatprep.subr.mxu1 %v3871_v41 }
0x1bfd   :  { %4813 = vmatpush3.msra.mxu1 %v3871_v41 }
0x1c7f   :  { %v3833_v54 = vpop.xlane.xlu1 %3832 }
0x1c80   :  { %v3835_v4 = vmul.f32 0.03125, %v3833_v54 }
0x1c81   :  { %v3830_v55 = vpop.xlane.xlu0 %3829 }
0x1c82   :  { %v3834_v56 = vmul.f32 0.03125, %v3830_v55  ;;  %v3837_v57 = vsub.f32 %v3823_v49, %v3835_v4 }
0x1c84   :  { %v3836_v58 = vsub.f32 %v3822_v51, %v3834_v56  ;;  %v3839_v0 = vmul.f32 %v3837_v57, %v3837_v57 }
0x1c86   :  { %v3838_v60 = vmul.f32 %v3836_v58, %v3836_v58  ;;  %v3843_v63 = vsel %vm365_vm5, %v3839_v0, 0.0 }
0x1c88   :  { %v3840_v61 = vsel %vm365_vm5, %v3838_v60, 0.0 }
0x1c89   :  { %3841 = vadd.xlane.f32.xlu0 %v3840_v61 }
0x1c8d   :  { %3844 = vadd.xlane.f32.xlu0 %v3843_v63 }
0x1d12   :  { %v3842_v2 = vpop.xlane.xlu0 %3841 }
0x1d13   :  { %v3846_v5 = vmul.f32 0.03125, %v3842_v2 }
0x1d15   :  { %v3848_v6 = vadd.f32 1e-12, %v3846_v5 }
0x1d16   :  { %v3845_v7 = vpop.xlane.xlu0 %3844 }
0x1d17   :  { %4971 = vrsqrt.f32 %v3848_v6  ;;  %v3847_v8 = vmul.f32 0.03125, %v3845_v7 }
0x1d19   :  { %v3849_v10 = vadd.f32 1e-12, %v3847_v8 }
0x1d1b   :  { %4973 = vrsqrt.f32 %v3849_v10 }
0x1d24   :  { %v4972_v11 = vpop.eup %4971 }
0x1d25   :  { %v3852_v14 = vmul.f32 %v4972_v11, %v3836_v58  ;;  %v4345_v58 = vld [vmem:[%s5876_s17 + $0x1] ss:$0 sm:$0xff] }
0x1d27   :  { %v3860_v19 = vmul.f32 %v4338_v12, %v3852_v14 }
0x1d28   :  { %v4974_v21 = vpop.eup %4973 }
0x1d29   :  { %v3853_v23 = vmul.f32 %v4974_v21, %v3837_v57  ;;  %v5812_v22 = vadd.f32 %v4339_v17, %v3860_v19  ;;  %v4135_v19 = vld [vmem:[#allocation11 + $0x18] sm:$0xff]  ;;  %v4134_v21 = vld [vmem:[#allocation11 + $0x10] sm:$0xff] }
0x1d2a   :  { %4852 = vmatprep.subr.mxu1 %v4135_v19 }
0x1d2b   :  { %v3861_v24 = vmul.f32 %v4338_v12, %v3853_v23  ;;  %4814 = vmatprep.mubr.msk.f32.mxu1 %vm365_vm5, %v5812_v22  ;;  %v4133_v23 = vld [vmem:[#allocation11 + $0x8] sm:$0xff] }
0x1d2d   :  { %v5816_v26 = vadd.f32 %v4339_v17, %v3861_v24 }
0x1d2f   :  { %4815 = vmatmul.mubr.msk.f32.vlgmr.msra.gmra.mxu1 %vm365_vm5, %v5816_v26 }
0x1d30   :  { %4853 = vmatpush3.msra.mxu1 %v4135_v19 }
0x1d31   :  { %4854 = vmatprep.subr.mxu1 %v4134_v21 }
0x1d32   :  { %4855 = vmatpush3.msra.mxu1 %v4134_v21 }
0x1d33   :  { %4856 = vmatprep.subr.mxu1 %v4133_v23 }
0x1d34   :  { %4857 = vmatpush3.msra.mxu1 %v4133_v23 }
0x1def   :  { %v4816_v37 = vpop.f32.mrf.mxu1 }
0x1df0   :  { %v3961_v38 = vadd.f32 %v4816_v37, %v4341_v16 }
0x1df1   :  { %v3955_v39 = vpop.f32.mrf.mxu1 }
0x1df2   :  { %v3967_v40 = vmul.f32 0.044715, %v3961_v38  ;;  %v3956_v42 = vadd.f32 %v4341_v16, %v3955_v39  ;;  %v3965_v55 = vmul.f32 0.5, %v3961_v38 }
0x1df4   :  { %v3969_v43 = vmul.f32 %v3967_v40, %v3961_v38  ;;  %v3966_v44 = vmul.f32 0.044715, %v3956_v42  ;;  %v3964_v54 = vmul.f32 0.5, %v3956_v42 }
0x1df6   :  { %v3971_v45 = vmul.f32 %v3969_v43, %v3961_v38  ;;  %v3968_v27 = vmul.f32 %v3966_v44, %v3956_v42 }
0x1df8   :  { %v3973_v46 = vadd.f32 %v3971_v45, %v3961_v38  ;;  %v3970_v47 = vmul.f32 %v3968_v27, %v3956_v42 }
0x1dfa   :  { %v3972_v48 = vadd.f32 %v3970_v47, %v3956_v42  ;;  %v3975_v49 = vmul.f32 0.7978846, %v3973_v46 }
0x1dfc   :  { %v3974_v50 = vmul.f32 0.7978846, %v3972_v48  ;;  %4975 = vtanh.f32 %v3975_v49 }
0x1dfe   :  { %4977 = vtanh.f32 %v3974_v50 }
0x1e09   :  { %v4976_v51 = vpop.eup %4975 }
0x1e0a   :  { %v3979_v53 = vadd.f32 1.0, %v4976_v51 }
0x1e0b   :  { %v4978_v52 = vpop.eup %4977 }
0x1e0c   :  { %v3978_v4 = vadd.f32 1.0, %v4978_v52  ;;  %v3981_v57 = vmul.f32 %v3979_v53, %v3965_v55 }
0x1e0e   :  { %v3980_v56 = vmul.f32 %v3978_v4, %v3964_v54 }
0x1e10   :  { %4849 = vmatprep.mubr.f32.mxu0 %v3980_v56 }
0x1e11   :  { %4850 = vmatmul.mubr.f32.vlgmr.msra.gmra.mxu0 %v3981_v57 }
0x1ed1   :  { %v4851_v60 = vpop.f32.mrf.mxu0 }
0x1ed2   :  { %v4079_v61 = vadd.f32 %v4851_v60, %v4345_v58 }
0x1ed3   :  { %v4073_v0 = vpop.f32.mrf.mxu0 }
0x1ed4   :  { %v4083_v63 = vadd.f32 %v4079_v61, %v5816_v26  ;;  %v4074_v62 = vadd.f32 %v4345_v58, %v4073_v0 }
0x1ed6   :  { %v4082_v1 = vadd.f32 %v4074_v62, %v5812_v22  ;;  %v4091_v3 = vsel %vm365_vm5, %v4083_v63, 0.0  ;;  %v4132_v22 = vld [vmem:[#allocation11] sm:$0xff] }
0x1ed7   :  { %4092 = vadd.xlane.f32.xlu0 %v4091_v3  ;;  %4858 = vmatprep.subr.mxu1 %v4132_v22 }
0x1ed8   :  { %v4088_v41 = vsel %vm365_vm5, %v4082_v1, 0.0  ;;  %4859 = vmatpush3.msra.mxu1 %v4132_v22 }
0x1ed9   :  { %4089 = vadd.xlane.f32.xlu1 %v4088_v41 }
0x1f60   :  { %v4093_v2 = vpop.xlane.xlu0 %4092 }
0x1f61   :  { %v4095_v5 = vmul.f32 0.03125, %v4093_v2 }
0x1f62   :  { %v4090_v6 = vpop.xlane.xlu1 %4089 }
0x1f63   :  { %v4097_v7 = vsub.f32 %v4083_v63, %v4095_v5  ;;  %v4094_v8 = vmul.f32 0.03125, %v4090_v6 }
0x1f65   :  { %v4096_v10 = vsub.f32 %v4082_v1, %v4094_v8  ;;  %v4099_v11 = vmul.f32 %v4097_v7, %v4097_v7 }
0x1f67   :  { %v4103_v12 = vsel %vm365_vm5, %v4099_v11, 0.0  ;;  %v4098_v14 = vmul.f32 %v4096_v10, %v4096_v10 }
0x1f68   :  { %4104 = vadd.xlane.f32.xlu0 %v4103_v12 }
0x1f69   :  { %v4100_v17 = vsel %vm365_vm5, %v4098_v14, 0.0 }
0x1f6a   :  { %4101 = vadd.xlane.f32.xlu1 %v4100_v17 }
0x1ff1   :  { %v4105_v24 = vpop.xlane.xlu0 %4104 }
0x1ff2   :  { %v4107_v26 = vmul.f32 0.03125, %v4105_v24 }
0x1ff3   :  { %v4102_v59 = vpop.xlane.xlu1 %4101 }
0x1ff4   :  { %v4109_v25 = vadd.f32 1e-12, %v4107_v26  ;;  %v4106_v15 = vmul.f32 0.03125, %v4102_v59 }
0x1ff6   :  { %4979 = vrsqrt.f32 %v4109_v25  ;;  %v4108_v28 = vadd.f32 1e-12, %v4106_v15 }
0x1ff8   :  { %4981 = vrsqrt.f32 %v4108_v28 }
0x2003   :  { %v4980_v29 = vpop.eup %4979 }
0x2004   :  { %v4113_v30 = vmul.f32 %v4980_v29, %v4097_v7 }
0x2005   :  { %v4982_v31 = vpop.eup %4981 }
0x2006   :  { %v4112_v32 = vmul.f32 %v4982_v31, %v4096_v10  ;;  %v4121_v33 = vmul.f32 %v4348_v13, %v4113_v30 }
0x2008   :  { %v4120_v34 = vmul.f32 %v4348_v13, %v4112_v32  ;;  %v4129_v35 = vadd.f32 %v4349_v20, %v4121_v33 }
0x200a   :  { %v4128_v36 = vadd.f32 %v4349_v20, %v4120_v34  ;;  %4131 = vst.msk [vmem:[#allocation13 + $0x8] sm:$0xff] %vm365_vm5, %v4129_v35 }
0x200c   :  { %4860 = vmatprep.mubr.msk.f32.mxu1 %vm365_vm5, %v4128_v36  ;;  %4130 = vst.msk [vmem:[#allocation13] sm:$0xff] %vm365_vm5, %v4128_v36 }
0x200d   :  { %4861 = vmatmul.mubr.msk.f32.vlgmr.msra.gmra.mxu1 %vm365_vm5, %v4129_v35 }
0x200e   :  { %5118 = shalt.err (!%p5115_p6)
}
0x200f   :  { %s5911_s19 = smov 128   ;;  %v4350_v9 = vld [vmem:[%s5880_s21] ss:$0 sm:$0xff] }
0x2010   :  { %4239 = dma.vmem_to_hbm [thread:$0]  %s4234_s10, 256, %s5881_s22, [#allocation4], %s5911_s19, %s5911_s19, %s5908_s9  }
0x20cd   :  { %v4862_v18 = vpop.f32.mrf.mxu1 }
0x20ce   :  { %v4221_v16 = vadd.f32 %v4862_v18, %v4350_v9 }
0x20cf   :  { %v4215_v37 = vpop.f32.mrf.mxu1 }
0x20d0   :  { %4983 = vtanh.f32 %v4221_v16  ;;  %v4216_v38 = vadd.f32 %v4350_v9, %v4215_v37 }
0x20d2   :  { %4985 = vtanh.f32 %v4216_v38 }
0x20dd   :  { %v4984_v39 = vpop.eup %4983 }
0x20de   :  { %4227 = vst.msk [vmem:[%s5882_s23 + $0x8] sm:$0xff] %vm365_vm5, %v4984_v39 }
0x20df   :  { %v4986_v40 = vpop.eup %4985 }
0x20e0   :  { %4226 = vst.msk [vmem:[%s5882_s23] sm:$0xff] %vm365_vm5, %v4986_v40 }
0x20e1   :  { %5135 = dma.done.wait [#allocation4], 256  }
0x20e2   :  { %5136 = vsyncadd [#allocation4], 4294967040 }
0x20e3   :  { %4247 = vsyncpa [#allocation3], 1 }
0x20e4   :  { %4248 = vsyncpa [#allocation6], 1 }
0x20e5   :  { %4249 = vsyncpa [#allocation9], 1 }
0x20e6   :  { %4250 = vsyncpa [#allocation12], 1 }
0x20e7   :  { %4251 = vsyncpa [#allocation4], 1 }

</bundles_post_ra>
